<compile_context>
chip_gen: v7x
topology: tpu7x:2x2x1
jax: 0.10.0
libtpu: 0.0.40
codegen_flags: <defaults>
</compile_context>

<pallas_src>
import functools

import jax
import jax.numpy as jnp
from jax.experimental import pallas as pl
from jax.experimental.pallas import tpu as pltpu


_LANE = 128  # TPU lane width; channel dims are padded to a multiple of this.


def _round_up(x, m):
    return ((x + m - 1) // m) * m


# ----------------------------- Pallas kernel -------------------------------

def _bottleneck_kernel(x_ref, w1_ref, b1_ref, w2_ref, b2_ref, w3_ref, b3_ref,
                       o_ref, hflat_ref, acc_ref, *, H, W, CH):
    """Fully fused Bottleneck forward for one image (one grid step).

    x_ref     : (1, H*W, Cin_p)   bf16  input rows (channels padded, NHWC flat)
    w1_ref    : (Cin_p, Cm_p)     bf16  1x1 conv1 weights, BN1 scale folded in
    b1_ref    : (1, Cm_p)         f32   BN1 shift
    w2_ref    : (9, Cm_p, Cm_p)   bf16  3x3 conv2 weights per tap, BN2 folded
    b2_ref    : (1, Cm_p)         f32   BN2 shift
    w3_ref    : (Cm_p, Cout_p)    bf16  1x1 conv3 weights, BN3 scale folded in
    b3_ref    : (1, Cout_p)       f32   BN3 shift
    o_ref     : (1, H*W, Cout_p)  bf16  output
    hflat_ref : (Rpad, Cm_p)      bf16  flat spatially zero-padded conv1 out;
                                        flat row r*(W+2)+c <-> padded pos (r,c)
    acc_ref   : (ACC_ROWS, Cm_p)  f32   conv2 accumulator (wide row layout)
    """
    HW = H * W
    Wp = W + 2
    Cm = hflat_ref.shape[-1]

    # ---- conv1 (1x1) + bn1 (scale folded into w1) + relu, whole image ----
    h1 = jnp.dot(x_ref[0], w1_ref[...], preferred_element_type=jnp.float32)
    h1 = jnp.maximum(h1 + b1_ref[...], 0.0).astype(hflat_ref.dtype)

    # ---- stage into the flat spatially zero-padded scratch ----
    # Zero the whole scratch every grid step (padding must be valid on every
    # core under "parallel" sharding), then write the W interior columns of
    # each image row.  Total store traffic ~= 2x one h1 copy, vs. the ~9x
    # relayout copies the old per-tap slices cost.
    hflat_ref[...] = jnp.zeros_like(hflat_ref)
    for y in range(H):
        dst = (y + 1) * Wp + 1
        hflat_ref[dst:dst + W, :] = h1[y * W:(y + 1) * W, :]

    # ---- conv2 (3x3, stride 1, pad 1) + conv3 (1x1) over row chunks ----
    # Each tap is ONE contiguous row window of the flat scratch starting at
    # (y0+ky)*(W+2)+kx; wide rows dy*(W+2)+x with x in [0,W) are the valid
    # conv2 outputs, x in {W, W+1} are junk discarded after the epilogue.
    n_chunks = -(-H // CH)
    for c in range(n_chunks):
        y0 = c * CH
        rows = min(CH, H - y0)          # static (Python ints)
        rw = rows * Wp                  # wide rows in this chunk
        rv = rows * W                   # valid rows in this chunk

        for t in range(9):
            ky, kx = divmod(t, 3)
            start = (y0 + ky) * Wp + kx
            tap = hflat_ref[start:start + rw, :]            # contiguous window
            d = jnp.dot(tap, w2_ref[t], preferred_element_type=jnp.float32)
            if t == 0:
                acc_ref[0:rw, :] = d
            else:
                acc_ref[0:rw, :] += d

        h2w = jnp.maximum(acc_ref[0:rw, :] + b2_ref[...], 0.0).astype(x_ref.dtype)
        # Drop the 2 junk columns per image row (one small relayout per chunk).
        h2 = h2w.reshape(rows, Wp, Cm)[:, :W, :].reshape(rv, Cm)

        # conv3 (1x1) + bn3 + identity residual (x tile already in VMEM) + relu
        h3 = jnp.dot(h2, w3_ref[...], preferred_element_type=jnp.float32)
        h3 = h3 + b3_ref[...] + x_ref[0, y0 * W:y0 * W + rv, :].astype(jnp.float32)
        o_ref[0, y0 * W:y0 * W + rv, :] = jnp.maximum(h3, 0.0).astype(o_ref.dtype)


# ---------------------- one-time parameter preparation ----------------------

def _fold_bn(gamma, beta, mean, var, eps=1e-5):
    scale = gamma / jnp.sqrt(var + eps)
    return scale, beta - mean * scale


def prepare_params(p, eps=1e-5, compute_dtype=jnp.bfloat16):
    """Fold BN into the conv weights, re-layout for the MXU and pad channel
    dims to multiples of 128.  Run once; reuse the result every forward."""
    # TODO(synk): optional fp8 weight quantization for v7x (bf16 activations,
    # f32 accumulate) would halve weight VMEM/DMA; needs per-stage validation.
    planes, inplanes = p["conv1_w"].shape[:2]
    outplanes = p["conv3_w"].shape[0]
    cin_p = _round_up(inplanes, _LANE)
    cmid_p = _round_up(planes, _LANE)
    cout_p = _round_up(outplanes, _LANE)

    s1, b1 = _fold_bn(p["bn1_gamma"], p["bn1_beta"], p["bn1_mean"], p["bn1_var"], eps)
    s2, b2 = _fold_bn(p["bn2_gamma"], p["bn2_beta"], p["bn2_mean"], p["bn2_var"], eps)
    s3, b3 = _fold_bn(p["bn3_gamma"], p["bn3_beta"], p["bn3_mean"], p["bn3_var"], eps)

    # (Cin, planes): 1x1 conv as matmul; BN scale folded into output columns.
    w1 = p["conv1_w"].reshape(planes, inplanes).T * s1[None, :]
    # (9, planes, planes) ordered (ky, kx), (ci, co) per tap, scale folded in.
    w2 = (jnp.transpose(p["conv2_w"], (2, 3, 1, 0)) * s2[None, None, None, :]
          ).reshape(9, planes, planes)
    # (planes, planes*4)
    w3 = p["conv3_w"].reshape(outplanes, planes).T * s3[None, :]

    def padw(w, shape):
        pads = [(0, t - s) for s, t in zip(w.shape, shape)]
        return jnp.pad(w, pads).astype(compute_dtype)

    def padb(b, c):
        return jnp.pad(b, (0, c - b.shape[0])).reshape(1, c).astype(jnp.float32)

    return {
        "w1": padw(w1, (cin_p, cmid_p)), "b1": padb(b1, cmid_p),
        "w2": padw(w2, (9, cmid_p, cmid_p)), "b2": padb(b2, cmid_p),
        "w3": padw(w3, (cmid_p, cout_p)), "b3": padb(b3, cout_p),
    }


# ------------------------------- forward ------------------------------------

@jax.jit
def bottleneck_forward_nhwc(x_nhwc, prep):
    """Hot path: channel-padded NHWC bf16 in -> channel-padded NHWC bf16 out.
    This is the steady-state inter-block layout (no per-call transpose / pad /
    cast HBM round trips)."""
    N, H, W, cin_p = x_nhwc.shape
    cmid_p = prep["w1"].shape[1]
    cout_p = prep["w3"].shape[1]
    assert cin_p == prep["w1"].shape[0]
    assert cin_p == cout_p, "identity residual requires inplanes == planes*4"
    HW = H * W

    # Row-chunking for conv2/conv3: ~512-row matmul M per issue, bounded temps.
    CH = max(1, min(H, 512 // (W + 2)))
    rpad = _round_up((H + 2) * (W + 2) + 2, 8)      # +2: widest tap window end
    acc_rows = _round_up(CH * (W + 2), 8)

    xm = x_nhwc.reshape(N, HW, cin_p).astype(jnp.bfloat16)

    # Explicit VMEM budget: double-buffered in/out tiles + weights, both
    # scratch buffers, plus compiler temporaries (h1 f32/bf16, per-chunk
    # h2/h3).  1.5x headroom, capped below v7x's 64 MiB physical VMEM.
    est = (2 * HW * cin_p * 2                                      # x tiles
           + 2 * HW * cout_p * 2                                   # out tiles (bf16)
           + 2 * (cin_p * cmid_p + 9 * cmid_p * cmid_p + cmid_p * cout_p) * 2
           + 2 * (2 * cmid_p + cout_p) * 4                         # biases
           + rpad * cmid_p * 2                                     # hflat scratch
           + acc_rows * cmid_p * 4                                 # acc scratch
           + HW * cmid_p * 6                                       # h1 f32 + bf16
           + acc_rows * (cmid_p * 8 + cout_p * 6))                 # chunk temps
    vmem_limit = int(min(max(3 * est // 2, 8 * 1024 * 1024), 48 * 1024 * 1024))

    kernel = functools.partial(_bottleneck_kernel, H=H, W=W, CH=CH)
    out = pl.pallas_call(
        kernel,
        out_shape=jax.ShapeDtypeStruct((N, HW, cout_p), jnp.bfloat16),
        grid=(N,),
        in_specs=[
            pl.BlockSpec((1, HW, cin_p), lambda n: (n, 0, 0)),       # x tile
            pl.BlockSpec((cin_p, cmid_p), lambda n: (0, 0)),         # w1 (resident)
            pl.BlockSpec((1, cmid_p), lambda n: (0, 0)),             # b1
            pl.BlockSpec((9, cmid_p, cmid_p), lambda n: (0, 0, 0)),  # w2
            pl.BlockSpec((1, cmid_p), lambda n: (0, 0)),             # b2
            pl.BlockSpec((cmid_p, cout_p), lambda n: (0, 0)),        # w3
            pl.BlockSpec((1, cout_p), lambda n: (0, 0)),             # b3
        ],
        out_specs=pl.BlockSpec((1, HW, cout_p), lambda n: (n, 0, 0)),
        scratch_shapes=[pltpu.VMEM((rpad, cmid_p), jnp.bfloat16),
                        pltpu.VMEM((acc_rows, cmid_p), jnp.float32)],
        compiler_params=pltpu.CompilerParams(
            dimension_semantics=("parallel",),
            vmem_limit_bytes=vmem_limit,
        ),
    )(xm, prep["w1"], prep["b1"], prep["w2"], prep["b2"], prep["w3"], prep["b3"])

    return out.reshape(N, H, W, cout_p)


@functools.partial(jax.jit, static_argnames=("stride",))
def bottleneck_forward(x_nchw, prep, stride=1):
    """NCHW f32 adapter (for parity with the PyTorch interface / testing).
    The layout conversion here is NOT the steady-state path; chain blocks via
    `bottleneck_forward_nhwc` to keep activations in padded NHWC bf16."""
    if stride != 1:
        # TODO(synk): downsample is an arbitrary external nn.Module; stride>1
        # without downsample is ill-defined in the PyTorch module too (shape
        # mismatch at `out += residual`).  Only stride=1 identity residual.
        raise NotImplementedError("only the stride=1 identity-residual path")

    N, Cin, H, W = x_nchw.shape
    cin_p = prep["w1"].shape[0]
    x = jnp.transpose(x_nchw, (0, 2, 3, 1)).astype(jnp.bfloat16)
    x = jnp.pad(x, ((0, 0), (0, 0), (0, 0), (0, cin_p - Cin)))
    y = bottleneck_forward_nhwc(x, prep)                # (N, H, W, Cout_p) bf16
    y = y[..., :Cin].astype(x_nchw.dtype)
    return jnp.transpose(y, (0, 3, 1, 2))               # back to NCHW


# ------------------------- pure-JAX reference ------------------------------

def reference_forward(x, p, stride=1, eps=1e-5):
    def conv(x, w, stride=1, padding='VALID'):
        return jax.lax.conv_general_dilated(
            x, w, (stride, stride), padding,
            dimension_numbers=('NCHW', 'OIHW', 'NCHW'))

    def bn(x, g, b, m, v):
        r = lambda a: a.reshape(1, -1, 1, 1)
        return (x - r(m)) / jnp.sqrt(r(v) + eps) * r(g) + r(b)

    out = jax.nn.relu(bn(conv(x, p["conv1_w"]),
                         p["bn1_gamma"], p["bn1_beta"], p["bn1_mean"], p["bn1_var"]))
    out = jax.nn.relu(bn(conv(out, p["conv2_w"], stride, ((1, 1), (1, 1))),
                         p["bn2_gamma"], p["bn2_beta"], p["bn2_mean"], p["bn2_var"]))
    out = bn(conv(out, p["conv3_w"]),
             p["bn3_gamma"], p["bn3_beta"], p["bn3_mean"], p["bn3_var"])
    return jax.nn.relu(out + x)


# --------------------------------- main -------------------------------------

def make_params(key, inplanes, planes):
    exp = 4
    ks = jax.random.split(key, 16)

    def nrm(k, shape, s=0.1):
        return (s * jax.random.normal(k, shape)).astype(jnp.float32)

    p = {
        "conv1_w": nrm(ks[0], (planes, inplanes, 1, 1)),
        "conv2_w": nrm(ks[1], (planes, planes, 3, 3)),
        "conv3_w": nrm(ks[2], (planes * exp, planes, 1, 1)),
    }
    for i, (name, c) in enumerate([("bn1", planes), ("bn2", planes), ("bn3", planes * exp)]):
        base = 3 + 4 * i
        p[f"{name}_gamma"] = 1.0 + nrm(ks[base], (c,))
        p[f"{name}_beta"] = nrm(ks[base + 1], (c,))
        p[f"{name}_mean"] = nrm(ks[base + 2], (c,), 0.05)
        p[f"{name}_var"] = 0.5 + jnp.abs(nrm(ks[base + 3], (c,)))
    return p


if __name__ == "__main__":
    key = jax.random.PRNGKey(0)
    kx, kp = jax.random.split(key)

    N, planes, H, W = 2, 8, 16, 16
    inplanes = planes * 4          # identity residual needs inplanes == planes*expansion
    stride = 1

    x = jax.random.normal(kx, (N, inplanes, H, W), dtype=jnp.float32)
    params = make_params(kp, inplanes, planes)
    prep = prepare_params(params)  # one-time BN fold + weight re-layout + padding

    out = jax.block_until_ready(bottleneck_forward(x, prep, stride=stride))
    ref = jax.block_until_ready(reference_forward(x, params, stride=stride))

    assert out.shape == (N, inplanes, H, W)
    err = float(jnp.max(jnp.abs(out - ref)))
    assert jnp.allclose(out, ref, rtol=4e-2, atol=4e-2), f"max abs err {err}"

    print("KERNEL_OK")
</pallas_src>

<mosaic_0001>
module attributes {stable_mosaic.version = 11 : i64} {
  func.func @_bottleneck_kernel(%arg0: i32, %arg1: memref<1x256x128xbf16, #tpu.memory_space<vmem>>, %arg2: memref<128x128xbf16, #tpu.memory_space<vmem>>, %arg3: memref<1x128xf32, #tpu.memory_space<vmem>>, %arg4: memref<9x128x128xbf16, #tpu.memory_space<vmem>>, %arg5: memref<1x128xf32, #tpu.memory_space<vmem>>, %arg6: memref<128x128xbf16, #tpu.memory_space<vmem>>, %arg7: memref<1x128xf32, #tpu.memory_space<vmem>>, %arg8: memref<1x256x128xbf16, #tpu.memory_space<vmem>>, %arg9: memref<328x128xbf16, #tpu.memory_space<vmem>>, %arg10: memref<288x128xf32, #tpu.memory_space<vmem>>) attributes {dimension_semantics = [#tpu.dimension_semantics<parallel>], iteration_bounds = array<i64: 2>, scalar_prefetch = 0 : i64, scratch_operands = 2 : i64, tpu.core_type = #tpu.core_type<tc>, window_params = [{transform_indices = @transform_0, window_bounds = array<i64: 1, 256, 128>}, {pipeline_mode = #tpu.pipeline_mode<synchronous>, transform_indices = @transform_1, window_bounds = array<i64: 128, 128>}, {pipeline_mode = #tpu.pipeline_mode<synchronous>, transform_indices = @transform_2, window_bounds = array<i64: 1, 128>}, {pipeline_mode = #tpu.pipeline_mode<synchronous>, transform_indices = @transform_3, window_bounds = array<i64: 9, 128, 128>}, {pipeline_mode = #tpu.pipeline_mode<synchronous>, transform_indices = @transform_4, window_bounds = array<i64: 1, 128>}, {pipeline_mode = #tpu.pipeline_mode<synchronous>, transform_indices = @transform_5, window_bounds = array<i64: 128, 128>}, {pipeline_mode = #tpu.pipeline_mode<synchronous>, transform_indices = @transform_6, window_bounds = array<i64: 1, 128>}, {transform_indices = @transform_7, window_bounds = array<i64: 1, 256, 128>}]} {
    %c0 = arith.constant 0 : index
    %c0_0 = arith.constant 0 : index
    %c0_1 = arith.constant 0 : index
    %0 = vector.load %arg1[%c0, %c0_0, %c0_1] : memref<1x256x128xbf16, #tpu.memory_space<vmem>>, vector<1x256x128xbf16>
    %1 = vector.shape_cast %0 : vector<1x256x128xbf16> to vector<256x128xbf16>
    %c0_2 = arith.constant 0 : index
    %c0_3 = arith.constant 0 : index
    %2 = vector.load %arg2[%c0_2, %c0_3] : memref<128x128xbf16, #tpu.memory_space<vmem>>, vector<128x128xbf16>
    %cst = arith.constant dense<0.000000e+00> : vector<256x128xf32>
    %3 = tpu.matmul %1, %2, %cst {dimension_numbers = #tpu.dot_dimension_numbers<[1], [0], [0], [1], [0, 0, 1, 1], [], []>} : vector<256x128xbf16>, vector<128x128xbf16>, vector<256x128xf32> -> vector<256x128xf32>
    %c0_4 = arith.constant 0 : index
    %c0_5 = arith.constant 0 : index
    %4 = vector.load %arg3[%c0_4, %c0_5] : memref<1x128xf32, #tpu.memory_space<vmem>>, vector<1x128xf32>
    %5 = vector.broadcast %4 : vector<1x128xf32> to vector<256x128xf32>
    %6 = arith.addf %3, %5 : vector<256x128xf32>
    %cst_6 = arith.constant 0.000000e+00 : f32
    %7 = vector.broadcast %cst_6 : f32 to vector<256x128xf32>
    %8 = arith.maximumf %6, %7 : vector<256x128xf32>
    %9 = arith.truncf %8 : vector<256x128xf32> to vector<256x128xbf16>
    %cst_7 = arith.constant 0.000000e+00 : bf16
    %10 = vector.broadcast %cst_7 : bf16 to vector<328x128xbf16>
    %c0_8 = arith.constant 0 : index
    %c0_9 = arith.constant 0 : index
    %11 = vector.load %arg9[%c0_8, %c0_9] : memref<328x128xbf16, #tpu.memory_space<vmem>>, vector<328x128xbf16>
    tpu.vector_store %arg9[%c0_8, %c0_9], %10 {strides = array<i32>} : memref<328x128xbf16, #tpu.memory_space<vmem>>, vector<328x128xbf16>,
    %12 = vector.extract_strided_slice %9 {offsets = [0, 0], sizes = [16, 128], strides = [1, 1]} : vector<256x128xbf16> to vector<16x128xbf16>
    %c19 = arith.constant 19 : index
    %c0_10 = arith.constant 0 : index
    %13 = vector.load %arg9[%c19, %c0_10] : memref<328x128xbf16, #tpu.memory_space<vmem>>, vector<16x128xbf16>
    tpu.vector_store %arg9[%c19, %c0_10], %12 {strides = array<i32>} : memref<328x128xbf16, #tpu.memory_space<vmem>>, vector<16x128xbf16>,
    %14 = vector.extract_strided_slice %9 {offsets = [16, 0], sizes = [16, 128], strides = [1, 1]} : vector<256x128xbf16> to vector<16x128xbf16>
    %c37 = arith.constant 37 : index
    %c0_11 = arith.constant 0 : index
    %15 = vector.load %arg9[%c37, %c0_11] : memref<328x128xbf16, #tpu.memory_space<vmem>>, vector<16x128xbf16>
    tpu.vector_store %arg9[%c37, %c0_11], %14 {strides = array<i32>} : memref<328x128xbf16, #tpu.memory_space<vmem>>, vector<16x128xbf16>,
    %16 = vector.extract_strided_slice %9 {offsets = [32, 0], sizes = [16, 128], strides = [1, 1]} : vector<256x128xbf16> to vector<16x128xbf16>
    %c55 = arith.constant 55 : index
    %c0_12 = arith.constant 0 : index
    %17 = vector.load %arg9[%c55, %c0_12] : memref<328x128xbf16, #tpu.memory_space<vmem>>, vector<16x128xbf16>
    tpu.vector_store %arg9[%c55, %c0_12], %16 {strides = array<i32>} : memref<328x128xbf16, #tpu.memory_space<vmem>>, vector<16x128xbf16>,
    %18 = vector.extract_strided_slice %9 {offsets = [48, 0], sizes = [16, 128], strides = [1, 1]} : vector<256x128xbf16> to vector<16x128xbf16>
    %c73 = arith.constant 73 : index
    %c0_13 = arith.constant 0 : index
    %19 = vector.load %arg9[%c73, %c0_13] : memref<328x128xbf16, #tpu.memory_space<vmem>>, vector<16x128xbf16>
    tpu.vector_store %arg9[%c73, %c0_13], %18 {strides = array<i32>} : memref<328x128xbf16, #tpu.memory_space<vmem>>, vector<16x128xbf16>,
    %20 = vector.extract_strided_slice %9 {offsets = [64, 0], sizes = [16, 128], strides = [1, 1]} : vector<256x128xbf16> to vector<16x128xbf16>
    %c91 = arith.constant 91 : index
    %c0_14 = arith.constant 0 : index
    %21 = vector.load %arg9[%c91, %c0_14] : memref<328x128xbf16, #tpu.memory_space<vmem>>, vector<16x128xbf16>
    tpu.vector_store %arg9[%c91, %c0_14], %20 {strides = array<i32>} : memref<328x128xbf16, #tpu.memory_space<vmem>>, vector<16x128xbf16>,
    %22 = vector.extract_strided_slice %9 {offsets = [80, 0], sizes = [16, 128], strides = [1, 1]} : vector<256x128xbf16> to vector<16x128xbf16>
    %c109 = arith.constant 109 : index
    %c0_15 = arith.constant 0 : index
    %23 = vector.load %arg9[%c109, %c0_15] : memref<328x128xbf16, #tpu.memory_space<vmem>>, vector<16x128xbf16>
    tpu.vector_store %arg9[%c109, %c0_15], %22 {strides = array<i32>} : memref<328x128xbf16, #tpu.memory_space<vmem>>, vector<16x128xbf16>,
    %24 = vector.extract_strided_slice %9 {offsets = [96, 0], sizes = [16, 128], strides = [1, 1]} : vector<256x128xbf16> to vector<16x128xbf16>
    %c127 = arith.constant 127 : index
    %c0_16 = arith.constant 0 : index
    %25 = vector.load %arg9[%c127, %c0_16] : memref<328x128xbf16, #tpu.memory_space<vmem>>, vector<16x128xbf16>
    tpu.vector_store %arg9[%c127, %c0_16], %24 {strides = array<i32>} : memref<328x128xbf16, #tpu.memory_space<vmem>>, vector<16x128xbf16>,
    %26 = vector.extract_strided_slice %9 {offsets = [112, 0], sizes = [16, 128], strides = [1, 1]} : vector<256x128xbf16> to vector<16x128xbf16>
    %c145 = arith.constant 145 : index
    %c0_17 = arith.constant 0 : index
    %27 = vector.load %arg9[%c145, %c0_17] : memref<328x128xbf16, #tpu.memory_space<vmem>>, vector<16x128xbf16>
    tpu.vector_store %arg9[%c145, %c0_17], %26 {strides = array<i32>} : memref<328x128xbf16, #tpu.memory_space<vmem>>, vector<16x128xbf16>,
    %28 = vector.extract_strided_slice %9 {offsets = [128, 0], sizes = [16, 128], strides = [1, 1]} : vector<256x128xbf16> to vector<16x128xbf16>
    %c163 = arith.constant 163 : index
    %c0_18 = arith.constant 0 : index
    %29 = vector.load %arg9[%c163, %c0_18] : memref<328x128xbf16, #tpu.memory_space<vmem>>, vector<16x128xbf16>
    tpu.vector_store %arg9[%c163, %c0_18], %28 {strides = array<i32>} : memref<328x128xbf16, #tpu.memory_space<vmem>>, vector<16x128xbf16>,
    %30 = vector.extract_strided_slice %9 {offsets = [144, 0], sizes = [16, 128], strides = [1, 1]} : vector<256x128xbf16> to vector<16x128xbf16>
    %c181 = arith.constant 181 : index
    %c0_19 = arith.constant 0 : index
    %31 = vector.load %arg9[%c181, %c0_19] : memref<328x128xbf16, #tpu.memory_space<vmem>>, vector<16x128xbf16>
    tpu.vector_store %arg9[%c181, %c0_19], %30 {strides = array<i32>} : memref<328x128xbf16, #tpu.memory_space<vmem>>, vector<16x128xbf16>,
    %32 = vector.extract_strided_slice %9 {offsets = [160, 0], sizes = [16, 128], strides = [1, 1]} : vector<256x128xbf16> to vector<16x128xbf16>
    %c199 = arith.constant 199 : index
    %c0_20 = arith.constant 0 : index
    %33 = vector.load %arg9[%c199, %c0_20] : memref<328x128xbf16, #tpu.memory_space<vmem>>, vector<16x128xbf16>
    tpu.vector_store %arg9[%c199, %c0_20], %32 {strides = array<i32>} : memref<328x128xbf16, #tpu.memory_space<vmem>>, vector<16x128xbf16>,
    %34 = vector.extract_strided_slice %9 {offsets = [176, 0], sizes = [16, 128], strides = [1, 1]} : vector<256x128xbf16> to vector<16x128xbf16>
    %c217 = arith.constant 217 : index
    %c0_21 = arith.constant 0 : index
    %35 = vector.load %arg9[%c217, %c0_21] : memref<328x128xbf16, #tpu.memory_space<vmem>>, vector<16x128xbf16>
    tpu.vector_store %arg9[%c217, %c0_21], %34 {strides = array<i32>} : memref<328x128xbf16, #tpu.memory_space<vmem>>, vector<16x128xbf16>,
    %36 = vector.extract_strided_slice %9 {offsets = [192, 0], sizes = [16, 128], strides = [1, 1]} : vector<256x128xbf16> to vector<16x128xbf16>
    %c235 = arith.constant 235 : index
    %c0_22 = arith.constant 0 : index
    %37 = vector.load %arg9[%c235, %c0_22] : memref<328x128xbf16, #tpu.memory_space<vmem>>, vector<16x128xbf16>
    tpu.vector_store %arg9[%c235, %c0_22], %36 {strides = array<i32>} : memref<328x128xbf16, #tpu.memory_space<vmem>>, vector<16x128xbf16>,
    %38 = vector.extract_strided_slice %9 {offsets = [208, 0], sizes = [16, 128], strides = [1, 1]} : vector<256x128xbf16> to vector<16x128xbf16>
    %c253 = arith.constant 253 : index
    %c0_23 = arith.constant 0 : index
    %39 = vector.load %arg9[%c253, %c0_23] : memref<328x128xbf16, #tpu.memory_space<vmem>>, vector<16x128xbf16>
    tpu.vector_store %arg9[%c253, %c0_23], %38 {strides = array<i32>} : memref<328x128xbf16, #tpu.memory_space<vmem>>, vector<16x128xbf16>,
    %40 = vector.extract_strided_slice %9 {offsets = [224, 0], sizes = [16, 128], strides = [1, 1]} : vector<256x128xbf16> to vector<16x128xbf16>
    %c271 = arith.constant 271 : index
    %c0_24 = arith.constant 0 : index
    %41 = vector.load %arg9[%c271, %c0_24] : memref<328x128xbf16, #tpu.memory_space<vmem>>, vector<16x128xbf16>
    tpu.vector_store %arg9[%c271, %c0_24], %40 {strides = array<i32>} : memref<328x128xbf16, #tpu.memory_space<vmem>>, vector<16x128xbf16>,
    %42 = vector.extract_strided_slice %9 {offsets = [240, 0], sizes = [16, 128], strides = [1, 1]} : vector<256x128xbf16> to vector<16x128xbf16>
    %c289 = arith.constant 289 : index
    %c0_25 = arith.constant 0 : index
    %43 = vector.load %arg9[%c289, %c0_25] : memref<328x128xbf16, #tpu.memory_space<vmem>>, vector<16x128xbf16>
    tpu.vector_store %arg9[%c289, %c0_25], %42 {strides = array<i32>} : memref<328x128xbf16, #tpu.memory_space<vmem>>, vector<16x128xbf16>,
    %c0_26 = arith.constant 0 : index
    %c0_27 = arith.constant 0 : index
    %44 = vector.load %arg9[%c0_26, %c0_27] : memref<328x128xbf16, #tpu.memory_space<vmem>>, vector<288x128xbf16>
    %c0_28 = arith.constant 0 : index
    %c0_29 = arith.constant 0 : index
    %c0_30 = arith.constant 0 : index
    %45 = vector.load %arg4[%c0_28, %c0_29, %c0_30] : memref<9x128x128xbf16, #tpu.memory_space<vmem>>, vector<1x128x128xbf16>
    %46 = vector.shape_cast %45 : vector<1x128x128xbf16> to vector<128x128xbf16>
    %cst_31 = arith.constant dense<0.000000e+00> : vector<288x128xf32>
    %47 = tpu.matmul %44, %46, %cst_31 {dimension_numbers = #tpu.dot_dimension_numbers<[1], [0], [0], [1], [0, 0, 1, 1], [], []>} : vector<288x128xbf16>, vector<128x128xbf16>, vector<288x128xf32> -> vector<288x128xf32>
    %c0_32 = arith.constant 0 : index
    %c0_33 = arith.constant 0 : index
    %48 = vector.load %arg10[%c0_32, %c0_33] : memref<288x128xf32, #tpu.memory_space<vmem>>, vector<288x128xf32>
    tpu.vector_store %arg10[%c0_32, %c0_33], %47 {strides = array<i32>} : memref<288x128xf32, #tpu.memory_space<vmem>>, vector<288x128xf32>,
    %c1 = arith.constant 1 : index
    %c0_34 = arith.constant 0 : index
    %49 = vector.load %arg9[%c1, %c0_34] : memref<328x128xbf16, #tpu.memory_space<vmem>>, vector<288x128xbf16>
    %c1_35 = arith.constant 1 : index
    %c0_36 = arith.constant 0 : index
    %c0_37 = arith.constant 0 : index
    %50 = vector.load %arg4[%c1_35, %c0_36, %c0_37] : memref<9x128x128xbf16, #tpu.memory_space<vmem>>, vector<1x128x128xbf16>
    %51 = vector.shape_cast %50 : vector<1x128x128xbf16> to vector<128x128xbf16>
    %cst_38 = arith.constant dense<0.000000e+00> : vector<288x128xf32>
    %52 = tpu.matmul %49, %51, %cst_38 {dimension_numbers = #tpu.dot_dimension_numbers<[1], [0], [0], [1], [0, 0, 1, 1], [], []>} : vector<288x128xbf16>, vector<128x128xbf16>, vector<288x128xf32> -> vector<288x128xf32>
    %c0_39 = arith.constant 0 : index
    %c0_40 = arith.constant 0 : index
    %53 = vector.load %arg10[%c0_39, %c0_40] : memref<288x128xf32, #tpu.memory_space<vmem>>, vector<288x128xf32>
    %54 = arith.addf %53, %52 : vector<288x128xf32>
    %c0_41 = arith.constant 0 : index
    %c0_42 = arith.constant 0 : index
    %55 = vector.load %arg10[%c0_41, %c0_42] : memref<288x128xf32, #tpu.memory_space<vmem>>, vector<288x128xf32>
    tpu.vector_store %arg10[%c0_41, %c0_42], %54 {strides = array<i32>} : memref<288x128xf32, #tpu.memory_space<vmem>>, vector<288x128xf32>,
    %c2 = arith.constant 2 : index
    %c0_43 = arith.constant 0 : index
    %56 = vector.load %arg9[%c2, %c0_43] : memref<328x128xbf16, #tpu.memory_space<vmem>>, vector<288x128xbf16>
    %c2_44 = arith.constant 2 : index
    %c0_45 = arith.constant 0 : index
    %c0_46 = arith.constant 0 : index
    %57 = vector.load %arg4[%c2_44, %c0_45, %c0_46] : memref<9x128x128xbf16, #tpu.memory_space<vmem>>, vector<1x128x128xbf16>
    %58 = vector.shape_cast %57 : vector<1x128x128xbf16> to vector<128x128xbf16>
    %cst_47 = arith.constant dense<0.000000e+00> : vector<288x128xf32>
    %59 = tpu.matmul %56, %58, %cst_47 {dimension_numbers = #tpu.dot_dimension_numbers<[1], [0], [0], [1], [0, 0, 1, 1], [], []>} : vector<288x128xbf16>, vector<128x128xbf16>, vector<288x128xf32> -> vector<288x128xf32>
    %c0_48 = arith.constant 0 : index
    %c0_49 = arith.constant 0 : index
    %60 = vector.load %arg10[%c0_48, %c0_49] : memref<288x128xf32, #tpu.memory_space<vmem>>, vector<288x128xf32>
    %61 = arith.addf %60, %59 : vector<288x128xf32>
    %c0_50 = arith.constant 0 : index
    %c0_51 = arith.constant 0 : index
    %62 = vector.load %arg10[%c0_50, %c0_51] : memref<288x128xf32, #tpu.memory_space<vmem>>, vector<288x128xf32>
    tpu.vector_store %arg10[%c0_50, %c0_51], %61 {strides = array<i32>} : memref<288x128xf32, #tpu.memory_space<vmem>>, vector<288x128xf32>,
    %c18 = arith.constant 18 : index
    %c0_52 = arith.constant 0 : index
    %63 = vector.load %arg9[%c18, %c0_52] : memref<328x128xbf16, #tpu.memory_space<vmem>>, vector<288x128xbf16>
    %c3 = arith.constant 3 : index
    %c0_53 = arith.constant 0 : index
    %c0_54 = arith.constant 0 : index
    %64 = vector.load %arg4[%c3, %c0_53, %c0_54] : memref<9x128x128xbf16, #tpu.memory_space<vmem>>, vector<1x128x128xbf16>
    %65 = vector.shape_cast %64 : vector<1x128x128xbf16> to vector<128x128xbf16>
    %cst_55 = arith.constant dense<0.000000e+00> : vector<288x128xf32>
    %66 = tpu.matmul %63, %65, %cst_55 {dimension_numbers = #tpu.dot_dimension_numbers<[1], [0], [0], [1], [0, 0, 1, 1], [], []>} : vector<288x128xbf16>, vector<128x128xbf16>, vector<288x128xf32> -> vector<288x128xf32>
    %c0_56 = arith.constant 0 : index
    %c0_57 = arith.constant 0 : index
    %67 = vector.load %arg10[%c0_56, %c0_57] : memref<288x128xf32, #tpu.memory_space<vmem>>, vector<288x128xf32>
    %68 = arith.addf %67, %66 : vector<288x128xf32>
    %c0_58 = arith.constant 0 : index
    %c0_59 = arith.constant 0 : index
    %69 = vector.load %arg10[%c0_58, %c0_59] : memref<288x128xf32, #tpu.memory_space<vmem>>, vector<288x128xf32>
    tpu.vector_store %arg10[%c0_58, %c0_59], %68 {strides = array<i32>} : memref<288x128xf32, #tpu.memory_space<vmem>>, vector<288x128xf32>,
    %c19_60 = arith.constant 19 : index
    %c0_61 = arith.constant 0 : index
    %70 = vector.load %arg9[%c19_60, %c0_61] : memref<328x128xbf16, #tpu.memory_space<vmem>>, vector<288x128xbf16>
    %c4 = arith.constant 4 : index
    %c0_62 = arith.constant 0 : index
    %c0_63 = arith.constant 0 : index
    %71 = vector.load %arg4[%c4, %c0_62, %c0_63] : memref<9x128x128xbf16, #tpu.memory_space<vmem>>, vector<1x128x128xbf16>
    %72 = vector.shape_cast %71 : vector<1x128x128xbf16> to vector<128x128xbf16>
    %cst_64 = arith.constant dense<0.000000e+00> : vector<288x128xf32>
    %73 = tpu.matmul %70, %72, %cst_64 {dimension_numbers = #tpu.dot_dimension_numbers<[1], [0], [0], [1], [0, 0, 1, 1], [], []>} : vector<288x128xbf16>, vector<128x128xbf16>, vector<288x128xf32> -> vector<288x128xf32>
    %c0_65 = arith.constant 0 : index
    %c0_66 = arith.constant 0 : index
    %74 = vector.load %arg10[%c0_65, %c0_66] : memref<288x128xf32, #tpu.memory_space<vmem>>, vector<288x128xf32>
    %75 = arith.addf %74, %73 : vector<288x128xf32>
    %c0_67 = arith.constant 0 : index
    %c0_68 = arith.constant 0 : index
    %76 = vector.load %arg10[%c0_67, %c0_68] : memref<288x128xf32, #tpu.memory_space<vmem>>, vector<288x128xf32>
    tpu.vector_store %arg10[%c0_67, %c0_68], %75 {strides = array<i32>} : memref<288x128xf32, #tpu.memory_space<vmem>>, vector<288x128xf32>,
    %c20 = arith.constant 20 : index
    %c0_69 = arith.constant 0 : index
    %77 = vector.load %arg9[%c20, %c0_69] : memref<328x128xbf16, #tpu.memory_space<vmem>>, vector<288x128xbf16>
    %c5 = arith.constant 5 : index
    %c0_70 = arith.constant 0 : index
    %c0_71 = arith.constant 0 : index
    %78 = vector.load %arg4[%c5, %c0_70, %c0_71] : memref<9x128x128xbf16, #tpu.memory_space<vmem>>, vector<1x128x128xbf16>
    %79 = vector.shape_cast %78 : vector<1x128x128xbf16> to vector<128x128xbf16>
    %cst_72 = arith.constant dense<0.000000e+00> : vector<288x128xf32>
    %80 = tpu.matmul %77, %79, %cst_72 {dimension_numbers = #tpu.dot_dimension_numbers<[1], [0], [0], [1], [0, 0, 1, 1], [], []>} : vector<288x128xbf16>, vector<128x128xbf16>, vector<288x128xf32> -> vector<288x128xf32>
    %c0_73 = arith.constant 0 : index
    %c0_74 = arith.constant 0 : index
    %81 = vector.load %arg10[%c0_73, %c0_74] : memref<288x128xf32, #tpu.memory_space<vmem>>, vector<288x128xf32>
    %82 = arith.addf %81, %80 : vector<288x128xf32>
    %c0_75 = arith.constant 0 : index
    %c0_76 = arith.constant 0 : index
    %83 = vector.load %arg10[%c0_75, %c0_76] : memref<288x128xf32, #tpu.memory_space<vmem>>, vector<288x128xf32>
    tpu.vector_store %arg10[%c0_75, %c0_76], %82 {strides = array<i32>} : memref<288x128xf32, #tpu.memory_space<vmem>>, vector<288x128xf32>,
    %c36 = arith.constant 36 : index
    %c0_77 = arith.constant 0 : index
    %84 = vector.load %arg9[%c36, %c0_77] : memref<328x128xbf16, #tpu.memory_space<vmem>>, vector<288x128xbf16>
    %c6 = arith.constant 6 : index
    %c0_78 = arith.constant 0 : index
    %c0_79 = arith.constant 0 : index
    %85 = vector.load %arg4[%c6, %c0_78, %c0_79] : memref<9x128x128xbf16, #tpu.memory_space<vmem>>, vector<1x128x128xbf16>
    %86 = vector.shape_cast %85 : vector<1x128x128xbf16> to vector<128x128xbf16>
    %cst_80 = arith.constant dense<0.000000e+00> : vector<288x128xf32>
    %87 = tpu.matmul %84, %86, %cst_80 {dimension_numbers = #tpu.dot_dimension_numbers<[1], [0], [0], [1], [0, 0, 1, 1], [], []>} : vector<288x128xbf16>, vector<128x128xbf16>, vector<288x128xf32> -> vector<288x128xf32>
    %c0_81 = arith.constant 0 : index
    %c0_82 = arith.constant 0 : index
    %88 = vector.load %arg10[%c0_81, %c0_82] : memref<288x128xf32, #tpu.memory_space<vmem>>, vector<288x128xf32>
    %89 = arith.addf %88, %87 : vector<288x128xf32>
    %c0_83 = arith.constant 0 : index
    %c0_84 = arith.constant 0 : index
    %90 = vector.load %arg10[%c0_83, %c0_84] : memref<288x128xf32, #tpu.memory_space<vmem>>, vector<288x128xf32>
    tpu.vector_store %arg10[%c0_83, %c0_84], %89 {strides = array<i32>} : memref<288x128xf32, #tpu.memory_space<vmem>>, vector<288x128xf32>,
    %c37_85 = arith.constant 37 : index
    %c0_86 = arith.constant 0 : index
    %91 = vector.load %arg9[%c37_85, %c0_86] : memref<328x128xbf16, #tpu.memory_space<vmem>>, vector<288x128xbf16>
    %c7 = arith.constant 7 : index
    %c0_87 = arith.constant 0 : index
    %c0_88 = arith.constant 0 : index
    %92 = vector.load %arg4[%c7, %c0_87, %c0_88] : memref<9x128x128xbf16, #tpu.memory_space<vmem>>, vector<1x128x128xbf16>
    %93 = vector.shape_cast %92 : vector<1x128x128xbf16> to vector<128x128xbf16>
    %cst_89 = arith.constant dense<0.000000e+00> : vector<288x128xf32>
    %94 = tpu.matmul %91, %93, %cst_89 {dimension_numbers = #tpu.dot_dimension_numbers<[1], [0], [0], [1], [0, 0, 1, 1], [], []>} : vector<288x128xbf16>, vector<128x128xbf16>, vector<288x128xf32> -> vector<288x128xf32>
    %c0_90 = arith.constant 0 : index
    %c0_91 = arith.constant 0 : index
    %95 = vector.load %arg10[%c0_90, %c0_91] : memref<288x128xf32, #tpu.memory_space<vmem>>, vector<288x128xf32>
    %96 = arith.addf %95, %94 : vector<288x128xf32>
    %c0_92 = arith.constant 0 : index
    %c0_93 = arith.constant 0 : index
    %97 = vector.load %arg10[%c0_92, %c0_93] : memref<288x128xf32, #tpu.memory_space<vmem>>, vector<288x128xf32>
    tpu.vector_store %arg10[%c0_92, %c0_93], %96 {strides = array<i32>} : memref<288x128xf32, #tpu.memory_space<vmem>>, vector<288x128xf32>,
    %c38 = arith.constant 38 : index
    %c0_94 = arith.constant 0 : index
    %98 = vector.load %arg9[%c38, %c0_94] : memref<328x128xbf16, #tpu.memory_space<vmem>>, vector<288x128xbf16>
    %c8 = arith.constant 8 : index
    %c0_95 = arith.constant 0 : index
    %c0_96 = arith.constant 0 : index
    %99 = vector.load %arg4[%c8, %c0_95, %c0_96] : memref<9x128x128xbf16, #tpu.memory_space<vmem>>, vector<1x128x128xbf16>
    %100 = vector.shape_cast %99 : vector<1x128x128xbf16> to vector<128x128xbf16>
    %cst_97 = arith.constant dense<0.000000e+00> : vector<288x128xf32>
    %101 = tpu.matmul %98, %100, %cst_97 {dimension_numbers = #tpu.dot_dimension_numbers<[1], [0], [0], [1], [0, 0, 1, 1], [], []>} : vector<288x128xbf16>, vector<128x128xbf16>, vector<288x128xf32> -> vector<288x128xf32>
    %c0_98 = arith.constant 0 : index
    %c0_99 = arith.constant 0 : index
    %102 = vector.load %arg10[%c0_98, %c0_99] : memref<288x128xf32, #tpu.memory_space<vmem>>, vector<288x128xf32>
    %103 = arith.addf %102, %101 : vector<288x128xf32>
    %c0_100 = arith.constant 0 : index
    %c0_101 = arith.constant 0 : index
    %104 = vector.load %arg10[%c0_100, %c0_101] : memref<288x128xf32, #tpu.memory_space<vmem>>, vector<288x128xf32>
    tpu.vector_store %arg10[%c0_100, %c0_101], %103 {strides = array<i32>} : memref<288x128xf32, #tpu.memory_space<vmem>>, vector<288x128xf32>,
    %c0_102 = arith.constant 0 : index
    %c0_103 = arith.constant 0 : index
    %105 = vector.load %arg10[%c0_102, %c0_103] : memref<288x128xf32, #tpu.memory_space<vmem>>, vector<288x128xf32>
    %c0_104 = arith.constant 0 : index
    %c0_105 = arith.constant 0 : index
    %106 = vector.load %arg5[%c0_104, %c0_105] : memref<1x128xf32, #tpu.memory_space<vmem>>, vector<1x128xf32>
    %107 = vector.broadcast %106 : vector<1x128xf32> to vector<288x128xf32>
    %108 = arith.addf %105, %107 : vector<288x128xf32>
    %cst_106 = arith.constant 0.000000e+00 : f32
    %109 = vector.broadcast %cst_106 : f32 to vector<288x128xf32>
    %110 = arith.maximumf %108, %109 : vector<288x128xf32>
    %111 = arith.truncf %110 : vector<288x128xf32> to vector<288x128xbf16>
    %112 = vector.shape_cast %111 : vector<288x128xbf16> to vector<16x18x128xbf16>
    %113 = vector.extract_strided_slice %112 {offsets = [0, 0, 0], sizes = [16, 16, 128], strides = [1, 1, 1]} : vector<16x18x128xbf16> to vector<16x16x128xbf16>
    %114 = vector.shape_cast %113 : vector<16x16x128xbf16> to vector<256x128xbf16>
    %c0_107 = arith.constant 0 : index
    %c0_108 = arith.constant 0 : index
    %115 = vector.load %arg6[%c0_107, %c0_108] : memref<128x128xbf16, #tpu.memory_space<vmem>>, vector<128x128xbf16>
    %cst_109 = arith.constant dense<0.000000e+00> : vector<256x128xf32>
    %116 = tpu.matmul %114, %115, %cst_109 {dimension_numbers = #tpu.dot_dimension_numbers<[1], [0], [0], [1], [0, 0, 1, 1], [], []>} : vector<256x128xbf16>, vector<128x128xbf16>, vector<256x128xf32> -> vector<256x128xf32>
    %c0_110 = arith.constant 0 : index
    %c0_111 = arith.constant 0 : index
    %117 = vector.load %arg7[%c0_110, %c0_111] : memref<1x128xf32, #tpu.memory_space<vmem>>, vector<1x128xf32>
    %118 = vector.broadcast %117 : vector<1x128xf32> to vector<256x128xf32>
    %119 = arith.addf %116, %118 : vector<256x128xf32>
    %c0_112 = arith.constant 0 : index
    %c0_113 = arith.constant 0 : index
    %c0_114 = arith.constant 0 : index
    %120 = vector.load %arg1[%c0_112, %c0_113, %c0_114] : memref<1x256x128xbf16, #tpu.memory_space<vmem>>, vector<1x256x128xbf16>
    %121 = vector.shape_cast %120 : vector<1x256x128xbf16> to vector<256x128xbf16>
    %122 = arith.extf %121 : vector<256x128xbf16> to vector<256x128xf32>
    %123 = arith.addf %119, %122 : vector<256x128xf32>
    %cst_115 = arith.constant 0.000000e+00 : f32
    %124 = vector.broadcast %cst_115 : f32 to vector<256x128xf32>
    %125 = arith.maximumf %123, %124 : vector<256x128xf32>
    %126 = arith.truncf %125 : vector<256x128xf32> to vector<256x128xbf16>
    %c0_116 = arith.constant 0 : index
    %c0_117 = arith.constant 0 : index
    %c0_118 = arith.constant 0 : index
    %127 = vector.load %arg8[%c0_116, %c0_117, %c0_118] : memref<1x256x128xbf16, #tpu.memory_space<vmem>>, vector<1x256x128xbf16>
    %128 = vector.shape_cast %127 : vector<1x256x128xbf16> to vector<256x128xbf16>
    %129 = vector.shape_cast %126 : vector<256x128xbf16> to vector<1x256x128xbf16>
    tpu.vector_store %arg8[%c0_116, %c0_117, %c0_118], %129 {strides = array<i32>} : memref<1x256x128xbf16, #tpu.memory_space<vmem>>, vector<1x256x128xbf16>,
    return
  }
  func.func @transform_0(%arg0: i32) -> (i32, i32, i32) {
    %c0_i32 = arith.constant 0 : i32
    %c0_i32_0 = arith.constant 0 : i32
    %c0_i32_1 = arith.constant 0 : i32
    return %arg0, %c0_i32, %c0_i32_0 : i32, i32, i32
  }
  func.func @transform_1(%arg0: i32) -> (i32, i32) {
    %c0_i32 = arith.constant 0 : i32
    %c0_i32_0 = arith.constant 0 : i32
    %c0_i32_1 = arith.constant 0 : i32
    return %c0_i32, %c0_i32_0 : i32, i32
  }
  func.func @transform_2(%arg0: i32) -> (i32, i32) {
    %c0_i32 = arith.constant 0 : i32
    %c0_i32_0 = arith.constant 0 : i32
    %c0_i32_1 = arith.constant 0 : i32
    return %c0_i32, %c0_i32_0 : i32, i32
  }
  func.func @transform_3(%arg0: i32) -> (i32, i32, i32) {
    %c0_i32 = arith.constant 0 : i32
    %c0_i32_0 = arith.constant 0 : i32
    %c0_i32_1 = arith.constant 0 : i32
    %c0_i32_2 = arith.constant 0 : i32
    return %c0_i32, %c0_i32_0, %c0_i32_1 : i32, i32, i32
  }
  func.func @transform_4(%arg0: i32) -> (i32, i32) {
    %c0_i32 = arith.constant 0 : i32
    %c0_i32_0 = arith.constant 0 : i32
    %c0_i32_1 = arith.constant 0 : i32
    return %c0_i32, %c0_i32_0 : i32, i32
  }
  func.func @transform_5(%arg0: i32) -> (i32, i32) {
    %c0_i32 = arith.constant 0 : i32
    %c0_i32_0 = arith.constant 0 : i32
    %c0_i32_1 = arith.constant 0 : i32
    return %c0_i32, %c0_i32_0 : i32, i32
  }
  func.func @transform_6(%arg0: i32) -> (i32, i32) {
    %c0_i32 = arith.constant 0 : i32
    %c0_i32_0 = arith.constant 0 : i32
    %c0_i32_1 = arith.constant 0 : i32
    return %c0_i32, %c0_i32_0 : i32, i32
  }
  func.func @transform_7(%arg0: i32) -> (i32, i32, i32) {
    %c0_i32 = arith.constant 0 : i32
    %c0_i32_0 = arith.constant 0 : i32
    %c0_i32_1 = arith.constant 0 : i32
    return %arg0, %c0_i32, %c0_i32_0 : i32, i32, i32
  }
}

</mosaic_0001>

<bundles_post_ra>
// kernel: bottleneck_forward_nhwc.1
= control target key start
LH: loop header
LB: loop body
LE: loop exit
PB: predicated region body
PF: predicated region fallthrough
CT: control target
= control target key end

     0   :  { %12 = vsyncpa [#allocation5], 0  ;;  %s12914_s0 = inlined_call_operand.hbm [shape: bf16[2,256,128], index: 0, kind: input, shape index: {}]   ;;  %s12915_s1 = inlined_call_operand.hbm [shape: bf16[128,128], index: 1, kind: input, shape index: {}]   ;;  %s12916_s2 = inlined_call_operand.vmem [shape: f32[1,128], index: 2, kind: input, shape index: {}]   ;;  %s12917_s3 = inlined_call_operand.hbm [shape: bf16[9,128,128], index: 3, kind: input, shape index: {}]   ;;  %s12918_s4 = inlined_call_operand.vmem [shape: f32[1,128], index: 4, kind: input, shape index: {}]   ;;  %s12919_s5 = inlined_call_operand.hbm [shape: bf16[128,128], index: 5, kind: input, shape index: {}]   ;;  %s12920_s6 = inlined_call_operand.vmem [shape: f32[1,128], index: 6, kind: input, shape index: {}]   ;;  %s12921_s7 = inlined_call_operand.hbm [shape: bf16[2,256,128], index: 7, kind: output, shape index: {}]  }
   0x1   :  { %14 = vsyncpa [#allocation5 + $0x1], 0 }
   0x2   :  { %15 = vsyncpa [#allocation8], 0 }
   0x3   :  { %16 = vsyncpa [#allocation11], 0 }
   0x4   :  { %17 = vsyncpa [#allocation6], 0 }
   0x5   :  { %19 = vsyncpa [#allocation6 + $0x1], 0  ;;  %s11296_s24 = smov 0   ;;  %s11298_s25 = smov 0  }
   0x6   :  { %s11300_s26 = smov 0   ;;  %s11302_s27 = smov 0  }
   0x7 LB: > { %s11317_s28 = sadd.s32 4294967295, %s11243_s27   ;;  %s8903_s29 = sadd.s32 4294967294, %s11243_s27   ;;  %s11243_s27 = sphi %s11302_s27, %s13014_s27   ;;  %s11239_s26 = sphi %s11300_s26, %s13013_s26   ;;  %s11235_s25 = sphi %s11298_s25, %s13012_s25   ;;  %s11231_s24 = sphi %s11296_s24, %s13011_s24  }
   0x8   : > { %p45_p0 = scmp.ne.s32.totalorder %s11235_s25, %s11231_s24  ;;  %p12922_p1 = scmp.eq.s32.totalorder %s11317_s28, 0 }
   0x9   : > { %p201_p3 = scmp.eq.s32.totalorder %s8903_s29, 1  ;;  %p8904_p5 = scmp.ge.s32.totalorder %s11243_s27, 1 }
   0xa   : > { %p11326_p4 = por %p12922_p1, %p45_p0  ;;  %p208_p7 = scmp.lt.s32.totalorder %s11243_s27, 3 }
   0xb   : > { %p11331_p6 = por %p201_p3, %p45_p0  ;;  %s11245_s10 = smov [#allocation7]  }
   0xc   : > { %s12926_s30 = scalar_select %p11326_p4, 1, 0 }
   0xd   : > { %s12927_s8 = scalar_select %p11331_p6, 1, 0 }
   0xe   : > { %p11336_p8 = pnand %p8904_p5, %p208_p7  ;;  %s220_s11 = sshll.u32 %s11245_s10, 4  ;;  %s11340_s11 = int_to_ptr.vmem [resolvable:$true] %s220_s11 }
   0xf   : > { %12928 = sst [smem:[#allocation17_spill]] %s12927_s8  ;;  %s11246_s13 = smov [#allocation9]  }
  0x10   : > { %s12929_s9 = scalar_select %p11336_p8, 1, 0 }
  0x11   : > { %p10704_p9 = pneg %p11336_p8  ;;  %s236_s14 = sshll.u32 %s11246_s13, 4  ;;  %s11351_s14 = int_to_ptr.vmem [resolvable:$true] %s236_s14 }
  0x12   : > { %s11247_s15 = smov [#allocation10]   ;;  %s11055_s19 = scalar_lea.hbm %s12915_s1, 1024 }
  0x13   : > { %p11347_p11 = pnand %p10704_p9, %p12922_p1  ;;  %s11353_s16 = sshll.u32 %s11247_s15, 4  ;;  %s253_s16 = int_to_ptr.vmem [resolvable:$true] %s11353_s16 }
  0x14   : > { %p11056_p12 = scmp.ne.s32.totalorder %s12915_s1, %s11055_s19  ;;  %p11062_p5 = scmp.lt.u32.totalorder %s11055_s19, %s12915_s1 }
  0x15   : > { %p11363_p13 = pneg %p11347_p11 }
  0x17   : > { %p11058_p0 = pnand %p11363_p13, %p11056_p12 }
  0x19   : > { %p11059_p3 = pneg %p11058_p0 }
  0x1b   : > { %p11064_p7 = pnand %p11062_p5, %p11059_p3 }
  0x1d   : > { %11067 = shalt.err (!%p11064_p7)
}
  0x1e   : > { %s11068_s10 = scalar_lea.vmem %s11340_s11, 1024  ;;  %p11076_p2 = scmp.lt.s32.totalorder %s11340_s11, %s11340_s11 }
  0x1f   : > { %p11069_p9 = scmp.ne.s32.totalorder %s11340_s11, %s11068_s10  ;;  %p11077_p6 = scmp.lt.s32.totalorder %s11068_s10, %s11068_s10 }
  0x21   : > { %p11071_p10 = pnand %p11069_p9, %p11363_p13  ;;  %p11078_p12 = por %p11077_p6, %p11076_p2 }
  0x23   : > { %p11072_p1 = pneg %p11071_p10 }
  0x25   : > { %p11079_p0 = pnand %p11078_p12, %p11072_p1 }
  0x27   : > { %11082 = shalt.err (!%p11079_p0)
}
  0x28   : > { %s11248_s13 = smov 64   ;;  %s11249_s15 = smov 4  }
  0x29   : > { %10707 = dma.hbm_to_vmem [thread:$0]  (!%p11347_p11), %s12915_s1, 1024, %s11340_s11, [#allocation8], %s11248_s13, %s11248_s13, %s11249_s15  }
  0x2a   : > { %s11083_s21 = scalar_lea.hbm %s12917_s3, 9216 }
  0x2b   : > { %p11084_p1 = scmp.ne.s32.totalorder %s12917_s3, %s11083_s21  ;;  %p11090_p10 = scmp.lt.u32.totalorder %s11083_s21, %s12917_s3 }
  0x2d   : > { %p11086_p2 = pnand %p11084_p1, %p11363_p13 }
  0x2f   : > { %p11087_p6 = pneg %p11086_p2 }
  0x31   : > { %p11092_p3 = pnand %p11090_p10, %p11087_p6 }
  0x33   : > { %11095 = shalt.err (!%p11092_p3)
}
  0x34   : > { %s11096_s11 = scalar_lea.vmem %s11351_s14, 9216  ;;  %p11104_p12 = scmp.lt.s32.totalorder %s11351_s14, %s11351_s14 }
  0x35   : > { %p11097_p5 = scmp.ne.s32.totalorder %s11351_s14, %s11096_s11  ;;  %p11105_p0 = scmp.lt.s32.totalorder %s11096_s11, %s11096_s11 }
  0x37   : > { %p11099_p7 = pnand %p11097_p5, %p11363_p13  ;;  %p11106_p1 = por %p11105_p0, %p11104_p12 }
  0x39   : > { %p11100_p9 = pneg %p11099_p7 }
  0x3b   : > { %p11107_p2 = pnand %p11106_p1, %p11100_p9 }
  0x3d   : > { %11110 = shalt.err (!%p11107_p2)
}
  0x3e   : > { %10710 = dma.hbm_to_vmem [thread:$0]  (!%p11347_p11), %s12917_s3, 9216, %s11351_s14, [#allocation8], %s11248_s13, %s11248_s13, %s11249_s15  }
  0x3f   : > { %s11111_s20 = scalar_lea.hbm %s12919_s5, 1024 }
  0x40   : > { %p11112_p6 = scmp.ne.s32.totalorder %s12919_s5, %s11111_s20  ;;  %p11118_p5 = scmp.lt.u32.totalorder %s11111_s20, %s12919_s5 }
  0x42   : > { %p11114_p10 = pnand %p11112_p6, %p11363_p13 }
  0x44   : > { %p11115_p3 = pneg %p11114_p10 }
  0x46   : > { %p11120_p7 = pnand %p11118_p5, %p11115_p3 }
  0x48   : > { %11123 = shalt.err (!%p11120_p7)
}
  0x49   : > { %s11124_s11 = scalar_lea.vmem %s253_s16, 1024  ;;  %p11132_p1 = scmp.lt.s32.totalorder %s253_s16, %s253_s16 }
  0x4a   : > { %p11125_p9 = scmp.ne.s32.totalorder %s253_s16, %s11124_s11  ;;  %p11133_p2 = scmp.lt.s32.totalorder %s11124_s11, %s11124_s11 }
  0x4c   : > { %p11127_p12 = pnand %p11125_p9, %p11363_p13  ;;  %p11134_p4 = por %p11133_p2, %p11132_p1 }
  0x4e   : > { %p11128_p0 = pneg %p11127_p12 }
  0x50   : > { %p11135_p8 = pnand %p11134_p4, %p11128_p0 }
  0x52   : > { %11138 = shalt.err (!%p11135_p8)
}
  0x53   : > { %10713 = dma.hbm_to_vmem [thread:$0]  (!%p11347_p11), %s12919_s5, 1024, %s253_s16, [#allocation11], %s11248_s13, %s11248_s13, %s11249_s15  }
  0x54   : > { %s11436_s22 = sadd.s32 1, %s11243_s27   ;;  %s32_s17 = sadd.s32 1, %s11239_s26 }
  0x55   : > { %s29_s12 = ssub.s32 %s11243_s27, %s11436_s22  ;;  %p39_p8 = scmp.ne.s32.totalorder %s11239_s26, %s11235_s25 }
  0x56   : > { %p30_p4 = scmp.eq.s32.totalorder %s29_s12, 0  ;;  %p40_p13 = scmp.eq.s32.totalorder %s11243_s27, 0 }
  0x57   : > { %p10725_p6 = scmp.lt.s32.totalorder %s11243_s27, 2  ;;  %p12932_p3 = scmp.eq.s32.totalorder %s11317_s28, 1 }
  0x58   : > { %s11446_s18 = scalar_select %p30_p4, %s11239_s26, %s32_s17  }
  0x59   : > { %p41_p10 = por %p40_p13, %p39_p8  ;;  %p11450_p5 = por %p12932_p3, %p39_p8 }
  0x5a   : > { %s269_s20 = sand.u32 1, %s11239_s26   ;;  %s9298_s21 = sshll.u32 %s11243_s27, 11 }
  0x5b   : > { %s8909_s16 = sshll.u32 %s269_s20, 7  ;;  %s11459_s10 = scalar_lea.hbm %s12914_s0, %s9298_s21 }
  0x5c   : > { %s273_s11 = scalar_lea.vmem [#allocation4], %s8909_s16  ;;  %p11461_p11 = pnand %p10725_p6, %p41_p10 }
  0x5d   : > { %s280_s14 = sshll.u32 %s273_s11, 4  ;;  %s11467_s12 = scalar_lea.sflag [#allocation5], %s269_s20  ;;  %s11465_s14 = int_to_ptr.vmem [resolvable:$true] %s280_s14 }
  0x5e   : > { %s11139_s17 = scalar_lea.hbm %s11459_s10, 2048  ;;  %p11141_p9 = pneg %p11461_p11 }
  0x5f   : > { %p11140_p7 = scmp.ne.s32.totalorder %s11459_s10, %s11139_s17  ;;  %s11144_s23 = scalar_lea.hbm %s12914_s0, 4096 }
  0x60   : > { %p11145_p1 = scmp.lt.u32.totalorder %s11459_s10, %s12914_s0  ;;  %p11146_p2 = scmp.lt.u32.totalorder %s11144_s23, %s11139_s17 }
  0x61   : > { %p11142_p12 = pnand %p11141_p9, %p11140_p7  ;;  %p11148_p8 = scmp.lt.u32.totalorder %s11139_s17, %s11459_s10 }
  0x62   : > { %p11147_p4 = por %p11146_p2, %p11145_p1 }
  0x63   : > { %p11143_p0 = pneg %p11142_p12 }
  0x64   : > { %p11149_p13 = por %p11148_p8, %p11147_p4 }
  0x66   : > { %p11150_p6 = pnand %p11149_p13, %p11143_p0 }
  0x68   : > { %11153 = shalt.err (!%p11150_p6)
}
  0x69   : > { %s11154_s20 = scalar_lea.vmem %s11465_s14, 2048  ;;  %s11250_s21 = smov [#allocation4]  }
  0x6a   : > { %p11155_p10 = scmp.ne.s32.totalorder %s11465_s14, %s11154_s20  ;;  %s11159_s16 = sshll.u32 %s11250_s21, 4  ;;  %s11160_s16 = int_to_ptr.vmem [resolvable:$false] %s11159_s16 }
  0x6b   : > { %s11161_s29 = scalar_lea.vmem %s11160_s16, 4096  ;;  %p11162_p12 = scmp.lt.s32.totalorder %s11465_s14, %s11160_s16 }
  0x6c   : > { %p11157_p3 = pnand %p11155_p10, %p11141_p9  ;;  %p11163_p1 = scmp.lt.s32.totalorder %s11161_s29, %s11154_s20 }
  0x6e   : > { %p11158_p7 = pneg %p11157_p3  ;;  %p11164_p2 = por %p11163_p1, %p11162_p12 }
  0x70   : > { %p11165_p4 = pnand %p11164_p2, %p11158_p7 }
  0x72   : > { %11168 = shalt.err (!%p11165_p4)
}
  0x73   : > { %10717 = dma.hbm_to_vmem [thread:$0]  (!%p11461_p11), %s11459_s10, 2048, %s11465_s14, %s11467_s12, %s11248_s13, %s11248_s13, %s11249_s15  }
  0x74   : > { %p12935_p9 = scmp.ne.s32.totalorder %s12929_s9, 0 }
  0x76   : > { %292 = sbr.rel (%p12935_p9) target bundleno = 1389 (0x56d), region = 48 }
  0x7d   : > { %s11501_s17 = sand.u32 1, %s11235_s25   ;;  %p12936_p0 = scmp.ne.s32.totalorder %s12926_s30, 0 }
  0x7e   : > { %s8913_s23 = sshll.u32 %s11501_s17, 7  ;;  %s295_s11 = scalar_lea.sflag [#allocation5], %s11501_s17 }
  0x7f   : > { %s11507_s8 = scalar_lea.vmem [#allocation4], %s8913_s23 }
  0x80   : > { %11214 = dma.done.wait (%p12936_p0), %s295_s11, 2048  }
  0x81   : > { %11216 = vsyncadd (%p12936_p0), %s295_s11, 4294965248  ;;  %p12937_p11 = scmp.eq.s32.totalorder %s11317_s28, 0 }
  0x83   : > { %11218 = dma.done.wait (%p12937_p11), [#allocation8], 10240   ;;  %p12938_p8 = pmov %p12937_p11 }
  0x85   : > { %11220 = vsyncadd (%p12938_p8), [#allocation8], 4294957056  ;;  %p12939_p13 = pmov %p12938_p8 }
  0x86   : > { %p12940_p6 = pmov %p12938_p8 }
  0x87   : > { %11222 = dma.done.wait (%p12939_p13), [#allocation11], 1024  }
  0x88   : > { %11224 = vsyncadd (%p12940_p6), [#allocation11], 4294966272  ;;  %v10771_v0 = vld [vmem:[#allocation7] sm:$0xff]   ;;  %v10772_v1 = vld [vmem:[#allocation7 + $0x8] sm:$0xff]   ;;  %v11251_v27 = vmov 0   ;;  %vm863_vm0 = vcmask 1043458  }
  0x89   : > { %9820 = vmatprep.subr.bf16.mxu0 %v10771_v0  ;;  %v10773_v2 = vld [vmem:[#allocation7 + $0x10] sm:$0xff]   ;;  %v10774_v3 = vld [vmem:[#allocation7 + $0x18] sm:$0xff]   ;;  %v10779_v4 = vld [vmem:[%s11507_s8] sm:$0xff]   ;;  %754 = vst [vmem:[#allocation2 + $0x10] sm:$0xf] %v11251_v27  ;;  %vm821_vm2 = vcmask 1043457  }
  0x8a   : > { %9821 = vmatpush3.bf16.msra.mxu0 %v10771_v0  ;;  %9836 = vmatprep.mubr.bf16.mxu0 %v10779_v4  ;;  %v10775_v5 = vld [vmem:[#allocation7 + $0x20] sm:$0xff]   ;;  %v10776_v6 = vld [vmem:[#allocation7 + $0x28] sm:$0xff]   ;;  %v10777_v7 = vld [vmem:[#allocation7 + $0x30] sm:$0xff]   ;;  %750 = vst [vmem:[#allocation2] sm:$0xf] %v11251_v27  ;;  %vm870_vm7 = vcmask 1042432  }
  0x8b   : > { %9822 = vmatprep.subr.bf16.mxu0 %v10772_v1  ;;  %v10778_v8 = vld [vmem:[#allocation7 + $0x38] sm:$0xff]   ;;  %v10795_v9 = vld [vmem:[#allocation9] sm:$0xff]   ;;  %v10780_v10 = vld [vmem:[%s11507_s8 + $0x8] sm:$0xff]   ;;  %751 = vst [vmem:[#allocation2 + $0x4] sm:$0xf] %v11251_v27  ;;  %vm828_vm9 = vcmask 1041408  }
  0x8c   : > { %v10781_v11 = vld [vmem:[%s11507_s8 + $0x10] sm:$0xff]   ;;  %v10796_v12 = vld [vmem:[#allocation9 + $0x8] sm:$0xff]   ;;  %v10782_v13 = vld [vmem:[%s11507_s8 + $0x18] sm:$0xff]   ;;  %752 = vst [vmem:[#allocation2 + $0x8] sm:$0xf] %v11251_v27  ;;  %vm905_vm10 = vcmask 1043459  }
  0x8d   : > { %v10783_v14 = vld [vmem:[%s11507_s8 + $0x20] sm:$0xff]   ;;  %v10784_v15 = vld [vmem:[%s11507_s8 + $0x28] sm:$0xff]   ;;  %v10785_v16 = vld [vmem:[%s11507_s8 + $0x30] sm:$0xff]   ;;  %753 = vst [vmem:[#allocation2 + $0xc] sm:$0xf] %v11251_v27  ;;  %s12803_s21 = scalar_lea.vmem [#allocation12], %s8913_s23 }
  0x8e   : > { %9823 = vmatpush3.bf16.msra.mxu0 %v10772_v1  ;;  %v10786_v17 = vld [vmem:[%s11507_s8 + $0x38] sm:$0xff]   ;;  %v10787_v18 = vld [vmem:[%s11507_s8 + $0x40] sm:$0xff]   ;;  %v10788_v19 = vld [vmem:[%s11507_s8 + $0x48] sm:$0xff]   ;;  %755 = vst [vmem:[#allocation2 + $0x14] sm:$0xf] %v11251_v27  ;;  %s9363_s16 = sshll.u32 %s11317_s28, 11 }
  0x8f   : > { %9824 = vmatprep.subr.bf16.mxu0 %v10773_v2  ;;  %v10789_v20 = vld [vmem:[%s11507_s8 + $0x50] sm:$0xff]   ;;  %v10790_v21 = vld [vmem:[%s11507_s8 + $0x58] sm:$0xff]   ;;  %v10791_v22 = vld [vmem:[%s11507_s8 + $0x60] sm:$0xff]   ;;  %756 = vst [vmem:[#allocation2 + $0x18] sm:$0xf] %v11251_v27  ;;  %s8801_s29 = sshll.u32 %s12803_s21, 4  ;;  %s12868_s29 = int_to_ptr.vmem [resolvable:$true] %s8801_s29 }
  0x90   : > { %v10792_v23 = vld [vmem:[%s11507_s8 + $0x68] sm:$0xff]   ;;  %v10793_v24 = vld [vmem:[%s11507_s8 + $0x70] sm:$0xff]   ;;  %v10794_v25 = vld [vmem:[%s11507_s8 + $0x78] sm:$0xff]   ;;  %757 = vst [vmem:[#allocation2 + $0x1c] sm:$0xf] %v11251_v27  ;;  %s8788_s28 = scalar_lea.sflag [#allocation6], %s11501_s17 }
  0x91   : > { %v10797_v26 = vld [vmem:[#allocation9 + $0x10] sm:$0xff]   ;;  %758 = vst [vmem:[#allocation2 + $0x20] sm:$0xf] %v11251_v27  ;;  %759 = vst [vmem:[#allocation2 + $0x24] sm:$0xf] %v11251_v27  ;;  %v10798_v28 = vld [vmem:[#allocation9 + $0x18] sm:$0xff]  }
  0x92   : > { %9825 = vmatpush3.bf16.msra.mxu0 %v10773_v2  ;;  %760 = vst [vmem:[#allocation2 + $0x28] sm:$0xf] %v11251_v27  ;;  %761 = vst [vmem:[#allocation2 + $0x2c] sm:$0xf] %v11251_v27  ;;  %v10799_v29 = vld [vmem:[#allocation9 + $0x20] sm:$0xff]   ;;  %v10800_v30 = vld [vmem:[#allocation9 + $0x28] sm:$0xff]  }
  0x93   : > { %9826 = vmatprep.subr.bf16.mxu0 %v10774_v3  ;;  %762 = vst [vmem:[#allocation2 + $0x30] sm:$0xf] %v11251_v27  ;;  %763 = vst [vmem:[#allocation2 + $0x34] sm:$0xf] %v11251_v27  ;;  %v10801_v31 = vld [vmem:[#allocation9 + $0x30] sm:$0xff]   ;;  %v10802_v32 = vld [vmem:[#allocation9 + $0x38] sm:$0xff]  }
  0x94   : > { %764 = vst [vmem:[#allocation2 + $0x38] sm:$0xf] %v11251_v27  ;;  %765 = vst [vmem:[#allocation2 + $0x3c] sm:$0xf] %v11251_v27  ;;  %v10803_v33 = vld [vmem:[#allocation2] sm:$0xff]   ;;  %v10810_v35 = vld [vmem:[#allocation9 + $0xc8] sm:$0xff]  }
  0x95   : > { %766 = vst [vmem:[#allocation2 + $0x40] sm:$0xf] %v11251_v27  ;;  %767 = vst [vmem:[#allocation2 + $0x44] sm:$0xf] %v11251_v27  ;;  %v10808_v34 = vld [vmem:[#allocation9 + $0xc0] sm:$0xff]   ;;  %v10812_v36 = vld [vmem:[#allocation9 + $0xd0] sm:$0xff]  }
  0x96   : > { %9827 = vmatpush3.bf16.msra.mxu0 %v10774_v3  ;;  %768 = vst [vmem:[#allocation2 + $0x48] sm:$0xf] %v11251_v27  ;;  %769 = vst [vmem:[#allocation2 + $0x4c] sm:$0xf] %v11251_v27  ;;  %10384 = vmatprep.subr.bf16.mxu1 %v10808_v34  ;;  %v10814_v37 = vld [vmem:[#allocation9 + $0xd8] sm:$0xff]   ;;  %v10816_v38 = vld [vmem:[#allocation9 + $0xe0] sm:$0xff]  }
  0x97   : > { %9828 = vmatprep.subr.bf16.mxu0 %v10775_v5  ;;  %770 = vst [vmem:[#allocation2 + $0x50] sm:$0xf] %v11251_v27  ;;  %771 = vst [vmem:[#allocation2 + $0x54] sm:$0xf] %v11251_v27  ;;  %10392 = vmatpush3.bf16.msra.mxu1 %v10808_v34  ;;  %v10818_v39 = vld [vmem:[#allocation9 + $0xe8] sm:$0xff]   ;;  %v10820_v40 = vld [vmem:[#allocation9 + $0xf0] sm:$0xff]  }
  0x98   : > { %772 = vst [vmem:[#allocation2 + $0x58] sm:$0xf] %v11251_v27  ;;  %773 = vst [vmem:[#allocation2 + $0x5c] sm:$0xf] %v11251_v27  ;;  %10385 = vmatprep.subr.bf16.mxu1 %v10810_v35  ;;  %v11537_v41 = vld [vmem:[#allocation9 + $0x40] sm:$0xff]   ;;  %v10823_v42 = vld [vmem:[#allocation9 + $0xf8] sm:$0xff]  }
  0x99   : > { %774 = vst [vmem:[#allocation2 + $0x60] sm:$0xf] %v11251_v27  ;;  %775 = vst [vmem:[#allocation2 + $0x64] sm:$0xf] %v11251_v27  ;;  %v10828_v43 = vld [vmem:[#allocation9 + $0x100] sm:$0xff]   ;;  %s11169_s30 = scalar_lea.vmem %s12868_s29, 2048 }
  0x9a   : > { %9829 = vmatpush3.bf16.msra.mxu0 %v10775_v5  ;;  %776 = vst [vmem:[#allocation2 + $0x68] sm:$0xf] %v11251_v27  ;;  %777 = vst [vmem:[#allocation2 + $0x6c] sm:$0xf] %v11251_v27  ;;  %v11543_v44 = vld [vmem:[%s12916_s2] ss:$0 sm:$0xff]  ;;  %p11170_p10 = scmp.ne.s32.totalorder %s12868_s29, %s11169_s30 }
  0x9b   : > { %9830 = vmatprep.subr.bf16.mxu0 %v10776_v6  ;;  %778 = vst [vmem:[#allocation2 + $0x70] sm:$0xf] %v11251_v27  ;;  %779 = vst [vmem:[#allocation2 + $0x74] sm:$0xf] %v11251_v27  ;;  %10393 = vmatpush3.bf16.msra.mxu1 %v10810_v35  ;;  %vm864_vm1 = vsmask.f32 7946 }
  0x9c   : > { %780 = vst [vmem:[#allocation2 + $0x78] sm:$0xf] %v11251_v27  ;;  %781 = vst [vmem:[#allocation2 + $0x7c] sm:$0xf] %v11251_v27  ;;  %10386 = vmatprep.subr.bf16.mxu1 %v10812_v36  ;;  %vm822_vm3 = vsmask.f32 7942  ;;  %p11171_p3 = pnand %p11170_p10, %p11450_p5 }
  0x9d   : > { %782 = vst [vmem:[#allocation2 + $0x80] sm:$0xf] %v11251_v27  ;;  %783 = vst [vmem:[#allocation2 + $0x84] sm:$0xf] %v11251_v27  ;;  %vm838_vm4 = vsmask.f32 2304 }
  0x9e   : > { %9831 = vmatpush3.bf16.msra.mxu0 %v10776_v6  ;;  %784 = vst [vmem:[#allocation2 + $0x88] sm:$0xf] %v11251_v27  ;;  %785 = vst [vmem:[#allocation2 + $0x8c] sm:$0xf] %v11251_v27  ;;  %vm839_vm5 = vsmask.f32 6416  ;;  %p11172_p7 = pneg %p11171_p3 }
  0x9f   : > { %9832 = vmatprep.subr.bf16.mxu0 %v10777_v7  ;;  %786 = vst [vmem:[#allocation2 + $0x90] sm:$0xf] %v11251_v27  ;;  %787 = vst [vmem:[#allocation2 + $0x94] sm:$0xf] %v11251_v27  ;;  %10394 = vmatpush3.bf16.msra.mxu1 %v10812_v36  ;;  %vm796_vm6 = vsmask.f32 1280 }
  0xa0   : > { %788 = vst [vmem:[#allocation2 + $0x98] sm:$0xf] %v11251_v27  ;;  %789 = vst [vmem:[#allocation2 + $0x9c] sm:$0xf] %v11251_v27  ;;  %10387 = vmatprep.subr.bf16.mxu1 %v10814_v37  ;;  %vm797_vm8 = vsmask.f32 5392 }
  0xa1   : > { %790 = vst [vmem:[#allocation2 + $0xa0] sm:$0xf] %v11251_v27  ;;  %v866_v62 = vld [vmem:[#allocation2 + $0x10] sm:$0xc]  ;;  %vm906_vm11 = vsmask.f32 7950  ;;  %vm11551_vm14 = vmand %vm863_vm0, %vm864_vm1 }
  0xa2   : > { %9833 = vmatpush3.bf16.msra.mxu0 %v10777_v7  ;;  %vm945_vm13 = vsmask.f32 7938  ;;  %vm11557_vm15 = vmand %vm821_vm2, %vm822_vm3  ;;  %vm923_vm1 = vsmask.f32 4368  ;;  %vm881_vm3 = vsmask.f32 7440 }
  0xa3   : > { %9834 = vmatprep.subr.bf16.mxu0 %v10778_v8  ;;  %10395 = vmatpush3.bf16.msra.mxu1 %v10814_v37  ;;  %vm11564_vm12 = vmor %vm838_vm4, %vm839_vm5  ;;  %vm951_vm5 = vcmask 1040384   ;;  %v872_v34 = vld [vmem:[#allocation2 + $0x18] sm:$0x7]  ;;  %s11253_s9 = smov [#allocation12]  }
  0xa4   : > { %10388 = vmatprep.subr.bf16.mxu1 %v10816_v38  ;;  %vm11573_vm0 = vmor %vm796_vm6, %vm797_vm8  ;;  %s11173_s13 = sshll.u32 %s11253_s9, 4  ;;  %s11174_s13 = int_to_ptr.vmem [resolvable:$false] %s11173_s13 }
  0xa5   : > { %vm11581_vm2 = vmand %vm870_vm7, %vm838_vm4  ;;  %s11175_s15 = scalar_lea.vmem %s11174_s13, 4096  ;;  %p11176_p12 = scmp.lt.s32.totalorder %s12868_s29, %s11174_s13 }
  0xa6   : > { %9835 = vmatpush3.bf16.msra.mxu0 %v10778_v8  ;;  %vm11589_vm8 = vmand %vm828_vm9, %vm796_vm6  ;;  %vm12955_vm6 = vcmask 1043456   ;;  %vm12958_vm9 = vsmask.f32 256  ;;  %v11045_v8 = vld [vmem:[%s12916_s2] ss:$0 sm:$0xff]  ;;  %p11177_p1 = scmp.lt.s32.totalorder %s11175_s15, %s11169_s30 }
  0xa7   : > { %9868 = vmatprep.subr.bf16.mxu0 %v10795_v9  ;;  %10396 = vmatpush3.bf16.msra.mxu1 %v10816_v38  ;;  %vm11603_vm4 = vmand %vm905_vm10, %vm906_vm11  ;;  %vm12961_vm11 = vsmask.f32 3328 }
  0xa8   : > { %10389 = vmatprep.subr.bf16.mxu1 %v10818_v39  ;;  %vm11611_vm7 = vmand %vm12955_vm6, %vm945_vm13  ;;  %p11178_p2 = por %p11177_p1, %p11176_p12 }
  0xa9   : > { %9837 = vmatmul.mubr.bf16.vlgmr.msra.gmra.mrb[0].mxu0 %v10780_v10  ;;  %vm11620_vm10 = vmor %vm12958_vm9, %vm923_vm1 }
  0xaa   : > { %9840 = vmatprep.mubr.bf16.mxu0 %v10781_v11  ;;  %9869 = vmatpush3.bf16.msra.mxu0 %v10795_v9  ;;  %vm11628_vm13 = vmor %vm12961_vm11, %vm881_vm3  ;;  %p11179_p4 = pnand %p11178_p2, %p11172_p7 }
  0xab   : > { %9870 = vmatprep.subr.bf16.mxu0 %v10796_v12  ;;  %10397 = vmatpush3.bf16.msra.mxu1 %v10818_v39  ;;  %vm12964_vm1 = vmmov %vm12958_vm9 }
  0xac   : > { %10390 = vmatprep.subr.bf16.mxu1 %v10820_v40  ;;  %vm11634_vm6 = vmand %vm951_vm5, %vm12964_vm1  ;;  %vm12968_vm5 = vcmask 1043456  }
  0xad   : > { %vm12967_vm3 = vmmov %vm12961_vm11 }
  0xae   : > { %9871 = vmatpush3.bf16.msra.mxu0 %v10796_v12  ;;  %vm11647_vm9 = vmand %vm12968_vm5, %vm12967_vm3 }
  0xaf   : > { %9872 = vmatprep.subr.bf16.mxu0 %v10797_v26  ;;  %10398 = vmatpush3.bf16.msra.mxu1 %v10820_v40  ;;  %v830_v40 = vld [vmem:[#allocation2 + $0x10] sm:$0x3] }
  0xb0   : > { %10391 = vmatprep.subr.bf16.mxu1 %v10823_v42 }
  0xb1   : > { %9841 = vmatmul.mubr.bf16.gmra.mrb[4].mxu0 %v10782_v13 }
  0xb2   : > { %9844 = vmatprep.mubr.bf16.mxu0 %v10783_v14  ;;  %9873 = vmatpush3.bf16.msra.mxu0 %v10797_v26 }
  0xb3   : > { %9874 = vmatprep.subr.bf16.mxu0 %v10798_v28  ;;  %10399 = vmatpush3.bf16.msra.mxu1 %v10823_v42 }
  0xb4   : > { %10076 = vmatprep.subr.bf16.mxu1 %v10828_v43 }
  0xb6   : > { %9875 = vmatpush3.bf16.msra.mxu0 %v10798_v28 }
  0xb7   : > { %9876 = vmatprep.subr.bf16.mxu0 %v10799_v29 }
  0xb9   : > { %9845 = vmatmul.mubr.bf16.gmra.mrb[8].mxu0 %v10784_v15 }
  0xba   : > { %9848 = vmatprep.mubr.bf16.mxu0 %v10785_v16  ;;  %9877 = vmatpush3.bf16.msra.mxu0 %v10799_v29  ;;  %v824_v16 = vld [vmem:[#allocation2 + $0x8] sm:$0xe] }
  0xbb   : > { %9878 = vmatprep.subr.bf16.mxu0 %v10800_v30 }
  0xbe   : > { %9879 = vmatpush3.bf16.msra.mxu0 %v10800_v30 }
  0xbf   : > { %9880 = vmatprep.subr.bf16.mxu0 %v10801_v31 }
  0xc1   : > { %9849 = vmatmul.mubr.bf16.gmra.mrb[12].mxu0 %v10786_v17 }
  0xc2   : > { %9852 = vmatprep.mubr.bf16.mxu0 %v10787_v18  ;;  %9881 = vmatpush3.bf16.msra.mxu0 %v10801_v31 }
  0xc3   : > { %9882 = vmatprep.subr.bf16.mxu0 %v10802_v32 }
  0xc6   : > { %9883 = vmatpush3.bf16.msra.mxu0 %v10802_v32 }
  0xc7   : > { %9920 = vmatprep.subr.bf16.mxu0 %v11537_v41 }
  0xc9   : > { %9853 = vmatmul.mubr.bf16.gmra.mrb[16].mxu0 %v10788_v19 }
  0xca   : > { %9856 = vmatprep.mubr.bf16.mxu0 %v10789_v20 }
  0xd1   : > { %9857 = vmatmul.mubr.bf16.gmra.mrb[20].mxu0 %v10790_v21 }
  0xd2   : > { %9860 = vmatprep.mubr.bf16.mxu0 %v10791_v22  ;;  %v1319_v22 = vld [vmem:[#allocation2 + $0x84] sm:$0x8] }
  0xd9   : > { %9861 = vmatmul.mubr.bf16.gmra.mrb[24].mxu0 %v10792_v23 }
  0xda   : > { %9864 = vmatprep.mubr.bf16.mxu0 %v10793_v24 }
  0xe1   : > { %9865 = vmatmul.mubr.bf16.gmra.mrb[28].mxu0 %v10794_v25 }
  0xe2   : > { %9884 = vmatprep.mubr.bf16.mxu0 %v10803_v33 }
 0x17c   : > { %v9838_v45 = vpop.f32.mrb[0].mxu0 }
 0x17d   : > { %v584_v46 = vadd.f32 %v9838_v45, %v11543_v44  ;;  %v575_v47 = vpop.f32.mrb[1].mxu0 }
 0x17e   : > { %v576_v48 = vadd.f32 %v11543_v44, %v575_v47  ;;  %v9839_v49 = vpop.f32.mrb[2].mxu0 }
 0x17f   : > { %v704_v50 = vmax.f32 %v584_v46, 0.0  ;;  %v587_v51 = vadd.f32 %v9839_v49, %v11543_v44  ;;  %v578_v52 = vpop.f32.mrb[3].mxu0 }
 0x180   : > { %v702_v53 = vmax.f32 %v576_v48, 0.0  ;;  %v579_v54 = vadd.f32 %v11543_v44, %v578_v52 }
 0x181   : > { %v9301_v55 = vpack.c.bf16 %v704_v50, %v704_v50  ;;  %v705_v56 = vmax.f32 %v587_v51, 0.0 }
 0x182   : > { %v9299_v57 = vpack.c.bf16 %v702_v53, %v702_v53  ;;  %v703_v58 = vmax.f32 %v579_v54, 0.0 }
 0x183   : > { %v842_v59 = vshrl.u32 %v9301_v55, 16  ;;  %v845_v60 = vshll.u32 %v9301_v55, 16  ;;  %v9302_v61 = vpack.c.bf16 %v705_v56, %v705_v56 }
 0x184   : > { %v800_v63 = vshrl.u32 %v9299_v57, 16  ;;  %v803_v0 = vshll.u32 %v9299_v57, 16  ;;  %v9300_v1 = vpack.c.bf16 %v703_v58, %v703_v58  ;;  %v9842_v2 = vpop.f32.mrb[4].mxu0 }
 0x185   : > { %v844_v3 = vrot.slane %v842_v59, 5  ;;  %v847_v4 = vrot.slane %v845_v60, 6  ;;  %v851_v5 = vshrl.u32 %v9302_v61, 16  ;;  %v854_v6 = vshll.u32 %v9302_v61, 16  ;;  %v591_v7 = vpop.f32.mrb[5].mxu0 }
 0x186   : > { %v802_v9 = vrot.slane %v800_v63, 6  ;;  %v805_v10 = vrot.slane %v803_v0, 7  ;;  %v809_v11 = vshrl.u32 %v9300_v1, 16  ;;  %v812_v12 = vshll.u32 %v9300_v1, 16  ;;  %v9843_v13 = vpop.f32.mrb[6].mxu0 }
 0x187   : > { %v848_v14 = vor.u32 %v847_v4, %v844_v3  ;;  %v853_v17 = vrot.slane %v851_v5, 5  ;;  %v856_v18 = vrot.slane %v854_v6, 6  ;;  %v600_v19 = vadd.f32 %v9842_v2, %v11543_v44  ;;  %v594_v20 = vpop.f32.mrb[7].mxu0  ;;  %v947_v4 = vld [vmem:[#allocation2 + $0x24] sm:$0xf]  ;;  %v10832_v3 = vld [vmem:[#allocation9 + $0x108] sm:$0xff]  }
 0x188   : > { %v806_v21 = vor.u32 %v805_v10, %v802_v9  ;;  %v811_v23 = vrot.slane %v809_v11, 6  ;;  %v814_v24 = vrot.slane %v812_v12, 7  ;;  %v592_v25 = vadd.f32 %v11543_v44, %v591_v7 }
 0x189   : > { %v849_v26 = vrot.slane %v848_v14, 4  ;;  %v867_v27 = vsel %vm11551_vm14, %v848_v14, %v866_v62  ;;  %v857_v28 = vor.u32 %v856_v18, %v853_v17  ;;  %v708_v30 = vmax.f32 %v600_v19, 0.0  ;;  %v908_v62 = vld [vmem:[#allocation2 + $0x18] sm:$0x8]  ;;  %v953_v18 = vld [vmem:[#allocation2 + $0x2c] sm:$0x1] }
 0x18a   : > { %868 = vst [vmem:[#allocation2 + $0x10] sm:$0xc] %v867_v27  ;;  %v807_v31 = vrot.slane %v806_v21, 4  ;;  %v825_v32 = vsel %vm11557_vm15, %v806_v21, %v824_v16  ;;  %v815_v35 = vor.u32 %v814_v24, %v811_v23  ;;  %v706_v36 = vmax.f32 %v592_v25, 0.0  ;;  %v10827_v27 = vld [vmem:[#allocation9 + $0x48] sm:$0xff]   ;;  %v10841_v24 = vld [vmem:[#allocation9 + $0x118] sm:$0xff]  }
 0x18b   : > { %826 = vst [vmem:[#allocation2 + $0x8] sm:$0xe] %v825_v32  ;;  %v858_v37 = vsel %vm11564_vm12, %v849_v26, %v857_v28  ;;  %v859_v38 = vrot.slane %v857_v28, 4  ;;  %v9305_v42 = vpack.c.bf16 %v708_v30, %v708_v30  ;;  %v603_v43 = vadd.f32 %v9843_v13, %v11543_v44 }
 0x18c   : > { %869 = vst [vmem:[#allocation2 + $0x14] sm:$0xf] %v858_v37  ;;  %v816_v45 = vsel %vm11573_vm0, %v807_v31, %v815_v35  ;;  %v817_v46 = vrot.slane %v815_v35, 4  ;;  %v9303_v47 = vpack.c.bf16 %v706_v36, %v706_v36  ;;  %v595_v48 = vadd.f32 %v11543_v44, %v594_v20  ;;  %v9846_v49 = vpop.f32.mrb[8].mxu0 }
 0x18d   : > { %v873_v50 = vsel %vm11581_vm2, %v859_v38, %v872_v34  ;;  %827 = vst [vmem:[#allocation2 + $0xc] sm:$0xf] %v816_v45  ;;  %v926_v51 = vshrl.u32 %v9305_v42, 16  ;;  %v929_v52 = vshll.u32 %v9305_v42, 16  ;;  %v709_v53 = vmax.f32 %v603_v43, 0.0  ;;  %v607_v54 = vpop.f32.mrb[9].mxu0 }
 0x18e   : > { %874 = vst [vmem:[#allocation2 + $0x18] sm:$0x7] %v873_v50  ;;  %v831_v55 = vsel %vm11589_vm8, %v817_v46, %v830_v40  ;;  %v884_v56 = vshll.u32 %v9303_v47, 16  ;;  %v887_v57 = vshrl.u32 %v9303_v47, 16  ;;  %v707_v58 = vmax.f32 %v595_v48, 0.0  ;;  %v9847_v59 = vpop.f32.mrb[10].mxu0 }
 0x18f   : > { %832 = vst [vmem:[#allocation2 + $0x10] sm:$0x3] %v831_v55  ;;  %v928_v60 = vrot.slane %v926_v51, 7  ;;  %v9306_v63 = vpack.c.bf16 %v709_v53, %v709_v53  ;;  %v616_v0 = vadd.f32 %v9846_v49, %v11543_v44  ;;  %v608_v1 = vadd.f32 %v11543_v44, %v607_v54  ;;  %v610_v2 = vpop.f32.mrb[11].mxu0  ;;  %v914_v47 = vld [vmem:[#allocation2 + $0x20] sm:$0xf] }
 0x190   : > { %v886_v5 = vrot.slane %v884_v56, 5  ;;  %v889_v6 = vrot.slane %v887_v57, 4  ;;  %v9304_v7 = vpack.c.bf16 %v707_v58, %v707_v58  ;;  %v619_v9 = vadd.f32 %v9847_v59, %v11543_v44  ;;  %v10831_v58 = vld [vmem:[#allocation9 + $0x50] sm:$0xff]  }
 0x191   : > { %v931_v10 = vor.u32 %v929_v52, %v928_v60  ;;  %v932_v11 = vrot.slane %v928_v60, 4  ;;  %v934_v12 = vshrl.u32 %v9306_v63, 16  ;;  %v937_v13 = vshll.u32 %v9306_v63, 16  ;;  %v1017_v60 = vld [vmem:[#allocation2 + $0x34] sm:$0xc] }
 0x192   : > { %v890_v14 = vor.u32 %v889_v6, %v886_v5  ;;  %v909_v16 = vsel %vm11603_vm4, %v886_v5, %v908_v62  ;;  %v893_v19 = vshll.u32 %v9304_v7, 16  ;;  %v897_v20 = vshrl.u32 %v9304_v7, 16 }
 0x193   : > { %v948_v21 = vsel %vm11611_vm7, %v931_v10, %v947_v4  ;;  %910 = vst [vmem:[#allocation2 + $0x18] sm:$0x8] %v909_v16  ;;  %v936_v23 = vrot.slane %v934_v12, 7  ;;  %v712_v25 = vmax.f32 %v616_v0, 0.0  ;;  %v710_v26 = vmax.f32 %v608_v1, 0.0 }
 0x194   : > { %949 = vst [vmem:[#allocation2 + $0x24] sm:$0xf] %v948_v21  ;;  %v891_v28 = vrot.slane %v890_v14, 4  ;;  %v895_v31 = vrot.slane %v893_v19, 5  ;;  %v899_v32 = vrot.slane %v897_v20, 4  ;;  %v713_v34 = vmax.f32 %v619_v9, 0.0 }
 0x195   : > { %v9850_v35 = vpop.f32.mrb[12].mxu0  ;;  %v10804_v36 = vld [vmem:[#allocation2 + $0x8] sm:$0xff]   ;;  %v939_v37 = vor.u32 %v937_v13, %v936_v23  ;;  %v941_v38 = vrot.slane %v936_v23, 4  ;;  %v9309_v40 = vpack.c.bf16 %v712_v25, %v712_v25  ;;  %v9307_v42 = vpack.c.bf16 %v710_v26, %v710_v26  ;;  %v10835_v25 = vld [vmem:[#allocation9 + $0x58] sm:$0xff]  }
 0x196   : > { %v623_v43 = vpop.f32.mrb[13].mxu0  ;;  %v896_v45 = vsel %vm11628_vm13, %v891_v28, %v895_v31  ;;  %v900_v46 = vor.u32 %v899_v32, %v895_v31  ;;  %v9310_v48 = vpack.c.bf16 %v713_v34, %v713_v34  ;;  %v611_v49 = vadd.f32 %v11543_v44, %v610_v2  ;;  %9885 = vmatmul.mubr.bf16.vlgmr.msra.gmra.mrb[32].mxu0 %v10804_v36  ;;  %v10805_v51 = vld [vmem:[#allocation2 + $0x10] sm:$0xff]   ;;  %v983_v4 = vld [vmem:[#allocation2 + $0x2c] sm:$0xe] }
 0x197   : > { %v9851_v50 = vpop.f32.mrb[14].mxu0  ;;  %v940_v52 = vsel %vm11620_vm10, %v932_v11, %v939_v37  ;;  %v954_v53 = vsel %vm11634_vm6, %v941_v38, %v953_v18  ;;  %911 = vst [vmem:[#allocation2 + $0x1c] sm:$0xf] %v896_v45  ;;  %v996_v55 = vshrl.u32 %v9309_v40, 16  ;;  %v999_v56 = vshll.u32 %v9309_v40, 16  ;;  %9921 = vmatpush3.bf16.msra.mxu0 %v11537_v41  ;;  %9888 = vmatprep.mubr.bf16.mxu0 %v10805_v51  ;;  %v10856_v54 = vld [vmem:[#allocation2 + $0x10] sm:$0xff]  }
 0x198   : > { %v626_v57 = vpop.f32.mrb[15].mxu0  ;;  %950 = vst [vmem:[#allocation2 + $0x28] sm:$0xf] %v940_v52  ;;  %955 = vst [vmem:[#allocation2 + $0x2c] sm:$0x1] %v954_v53  ;;  %v901_v59 = vrot.slane %v900_v46, 4  ;;  %9922 = vmatprep.subr.bf16.mxu0 %v10827_v27  ;;  %v632_v14 = vadd.f32 %v9850_v35, %v11543_v44  ;;  %v624_v19 = vadd.f32 %v11543_v44, %v623_v43 }
 0x199   : > { %v962_v62 = vshrl.u32 %v9307_v42, 16  ;;  %v965_v63 = vshll.u32 %v9307_v42, 16  ;;  %v1005_v0 = vshrl.u32 %v9310_v48, 16  ;;  %v998_v1 = vrot.slane %v996_v55, 5  ;;  %v1021_v18 = vld [vmem:[#allocation2 + $0x3c] sm:$0x7] }
 0x19a   : > { %v1001_v2 = vrot.slane %v999_v56, 6  ;;  %v1008_v5 = vshll.u32 %v9310_v48, 16  ;;  %v711_v6 = vmax.f32 %v611_v49, 0.0  ;;  %v915_v7 = vsel %vm11647_vm9, %v901_v59, %v914_v47  ;;  %v10840_v52 = vld [vmem:[#allocation9 + $0x60] sm:$0xff]   ;;  %v987_v55 = vld [vmem:[#allocation2 + $0x34] sm:$0x3] }
 0x19b   : > { %v964_v9 = vrot.slane %v962_v62, 6  ;;  %v967_v41 = vrot.slane %v965_v63, 7  ;;  %v1007_v10 = vrot.slane %v1005_v0, 5  ;;  %916 = vst [vmem:[#allocation2 + $0x20] sm:$0xf] %v915_v7  ;;  %9923 = vmatpush3.bf16.msra.mxu0 %v10827_v27  ;;  %v635_v20 = vadd.f32 %v9851_v50, %v11543_v44 }
 0x19c   : > { %v1002_v11 = vor.u32 %v1001_v2, %v998_v1  ;;  %v1010_v12 = vrot.slane %v1008_v5, 6  ;;  %v9308_v13 = vpack.c.bf16 %v711_v6, %v711_v6  ;;  %v627_v21 = vadd.f32 %v11543_v44, %v626_v57  ;;  %v9854_v23 = vpop.f32.mrb[16].mxu0  ;;  %9924 = vmatprep.subr.bf16.mxu0 %v10831_v58  ;;  %v1051_v63 = vld [vmem:[#allocation2 + $0x3c] sm:$0x8]  ;;  %v1083_v2 = vld [vmem:[#allocation2 + $0x48] sm:$0xf] }
 0x19d   : > { %v968_v16 = vor.u32 %v967_v41, %v964_v9  ;;  %v639_v34 = vpop.f32.mrb[17].mxu0  ;;  %v716_v37 = vmax.f32 %v632_v14, 0.0  ;;  %v714_v45 = vmax.f32 %v624_v19, 0.0  ;;  %v717_v50 = vmax.f32 %v635_v20, 0.0  ;;  %v10843_v9 = vld [vmem:[#allocation9 + $0x68] sm:$0xff]  }
 0x19e   : > { %v1003_v26 = vrot.slane %v1002_v11, 4  ;;  %v1018_v28 = vsel %vm11551_vm14, %v1002_v11, %v1017_v60  ;;  %v1011_v31 = vor.u32 %v1010_v12, %v1007_v10  ;;  %v971_v32 = vshrl.u32 %v9308_v13, 16  ;;  %v11662_v38 = vpop.f32.mrb[18].mxu0  ;;  %v10806_v47 = vld [vmem:[#allocation2 + $0x18] sm:$0xff]   ;;  %v1087_v19 = vld [vmem:[#allocation2 + $0x50] sm:$0x1] }
 0x19f   : > { %1019 = vst [vmem:[#allocation2 + $0x34] sm:$0xc] %v1018_v28  ;;  %v969_v27 = vrot.slane %v968_v16, 4  ;;  %v984_v35 = vsel %vm11557_vm15, %v968_v16, %v983_v4  ;;  %v974_v36 = vshll.u32 %v9308_v13, 16  ;;  %v11666_v46 = vpop.f32.mrb[19].mxu0  ;;  %9925 = vmatpush3.bf16.msra.mxu0 %v10831_v58  ;;  %v9313_v49 = vpack.c.bf16 %v716_v37, %v716_v37 }
 0x1a0   : > { %985 = vst [vmem:[#allocation2 + $0x2c] sm:$0xe] %v984_v35  ;;  %v1012_v40 = vsel %vm11564_vm12, %v1003_v26, %v1011_v31  ;;  %v1013_v42 = vrot.slane %v1011_v31, 4  ;;  %v973_v43 = vrot.slane %v971_v32, 6  ;;  %v715_v51 = vmax.f32 %v627_v21, 0.0  ;;  %9926 = vmatprep.subr.bf16.mxu0 %v10835_v25  ;;  %9889 = vmatmul.mubr.bf16.gmra.mrb[36].mxu0 %v10806_v47  ;;  %v10848_v47 = vld [vmem:[#allocation9 + $0x70] sm:$0xff]  }
 0x1a1   : > { %1020 = vst [vmem:[#allocation2 + $0x38] sm:$0xf] %v1012_v40  ;;  %v976_v48 = vrot.slane %v974_v36, 7  ;;  %v9311_v56 = vpack.c.bf16 %v714_v45, %v714_v45  ;;  %v648_v57 = vadd.f32 %v9854_v23, %v11543_v44  ;;  %v11672_v59 = vadd.f32 %v11543_v44, %v639_v34 }
 0x1a2   : > { %v1022_v53 = vsel %vm11581_vm2, %v1013_v42, %v1021_v18  ;;  %v1064_v60 = vshrl.u32 %v9313_v49, 16  ;;  %v1067_v62 = vshll.u32 %v9313_v49, 16  ;;  %v9314_v0 = vpack.c.bf16 %v717_v50, %v717_v50  ;;  %v10807_v1 = vld [vmem:[#allocation2 + $0x20] sm:$0xff]  }
 0x1a3   : > { %1023 = vst [vmem:[#allocation2 + $0x3c] sm:$0x7] %v1022_v53  ;;  %v977_v58 = vor.u32 %v976_v48, %v973_v43  ;;  %v1030_v4 = vshll.u32 %v9311_v56, 16  ;;  %v1033_v5 = vshrl.u32 %v9311_v56, 16  ;;  %v9312_v6 = vpack.c.bf16 %v715_v51, %v715_v51  ;;  %9927 = vmatpush3.bf16.msra.mxu0 %v10835_v25  ;;  %9892 = vmatprep.mubr.bf16.mxu0 %v10807_v1 }
 0x1a4   : > { %v720_v7 = vmax.f32 %v648_v57, 0.0  ;;  %v1066_v11 = vrot.slane %v1064_v60, 7  ;;  %v1072_v12 = vshrl.u32 %v9314_v0, 16  ;;  %v9858_v13 = vpop.f32.mrb[20].mxu0  ;;  %9928 = vmatprep.subr.bf16.mxu0 %v10840_v52  ;;  %v1075_v18 = vshll.u32 %v9314_v0, 16 }
 0x1a5   : > { %v978_v41 = vsel %vm11573_vm0, %v969_v27, %v977_v58  ;;  %v979_v10 = vrot.slane %v977_v58, 4  ;;  %v1032_v14 = vrot.slane %v1030_v4, 5  ;;  %v1035_v16 = vrot.slane %v1033_v5, 4  ;;  %v655_v21 = vpop.f32.mrb[21].mxu0  ;;  %v10852_v5 = vld [vmem:[#allocation9 + $0x78] sm:$0xff]  }
 0x1a6   : > { %986 = vst [vmem:[#allocation2 + $0x30] sm:$0xf] %v978_v41  ;;  %v1039_v20 = vshll.u32 %v9312_v6, 16  ;;  %v1069_v25 = vor.u32 %v1067_v62, %v1066_v11  ;;  %v1070_v26 = vrot.slane %v1066_v11, 4  ;;  %v1074_v28 = vrot.slane %v1072_v12, 7  ;;  %v11678_v31 = vpop.f32.mrb[22].mxu0 }
 0x1a7   : > { %v988_v23 = vsel %vm11589_vm8, %v979_v10, %v987_v55  ;;  %v1036_v32 = vor.u32 %v1035_v16, %v1032_v14  ;;  %v1052_v34 = vsel %vm11603_vm4, %v1032_v14, %v1051_v63  ;;  %v1043_v35 = vshrl.u32 %v9312_v6, 16  ;;  %v11682_v36 = vpop.f32.mrb[23].mxu0  ;;  %v10809_v37 = vld [vmem:[#allocation2 + $0x28] sm:$0xff]   ;;  %9929 = vmatpush3.bf16.msra.mxu0 %v10840_v52  ;;  %v1055_v55 = vld [vmem:[#allocation2 + $0x44] sm:$0xf] }
 0x1a8   : > { %989 = vst [vmem:[#allocation2 + $0x34] sm:$0x3] %v988_v23  ;;  %v1041_v27 = vrot.slane %v1039_v20, 5  ;;  %v1084_v40 = vsel %vm11611_vm7, %v1069_v25, %v1083_v2  ;;  %1053 = vst [vmem:[#allocation2 + $0x3c] sm:$0x8] %v1052_v34  ;;  %v1077_v42 = vor.u32 %v1075_v18, %v1074_v28  ;;  %v1079_v43 = vrot.slane %v1074_v28, 4  ;;  %9930 = vmatprep.subr.bf16.mxu0 %v10843_v9 }
 0x1a9   : > { %v9317_v45 = vpack.c.bf16 %v720_v7, %v720_v7  ;;  %1085 = vst [vmem:[#allocation2 + $0x48] sm:$0xf] %v1084_v40  ;;  %v1037_v48 = vrot.slane %v1036_v32, 4  ;;  %v1045_v49 = vrot.slane %v1043_v35, 4  ;;  %v718_v50 = vmax.f32 %v11672_v59, 0.0  ;;  %9893 = vmatmul.mubr.bf16.gmra.mrb[40].mxu0 %v10809_v37  ;;  %v11709_v35 = vld [vmem:[#allocation9 + $0x80] sm:$0xff]  }
 0x1aa   : > { %v651_v51 = vadd.f32 %v11662_v38, %v11543_v44  ;;  %v1078_v52 = vsel %vm11620_vm10, %v1070_v26, %v1077_v42  ;;  %v1088_v53 = vsel %vm11634_vm6, %v1079_v43, %v1087_v19  ;;  %v1151_v59 = vld [vmem:[#allocation2 + $0x58] sm:$0xc]  ;;  %v643_v1 = vadd.f32 %v11543_v44, %v11666_v46  ;;  %v1117_v14 = vld [vmem:[#allocation2 + $0x50] sm:$0xe] }
 0x1ab   : > { %v1130_v56 = vshrl.u32 %v9317_v45, 16  ;;  %v1133_v57 = vshll.u32 %v9317_v45, 16  ;;  %1086 = vst [vmem:[#allocation2 + $0x4c] sm:$0xf] %v1078_v52  ;;  %1089 = vst [vmem:[#allocation2 + $0x50] sm:$0x1] %v1088_v53  ;;  %v1042_v58 = vsel %vm11628_vm13, %v1037_v48, %v1041_v27  ;;  %v1046_v60 = vor.u32 %v1045_v49, %v1041_v27  ;;  %9931 = vmatpush3.bf16.msra.mxu0 %v10843_v9 }
 0x1ac   : > { %v9315_v62 = vpack.c.bf16 %v718_v50, %v718_v50  ;;  %v721_v63 = vmax.f32 %v651_v51, 0.0  ;;  %1054 = vst [vmem:[#allocation2 + $0x40] sm:$0xf] %v1042_v58  ;;  %v664_v2 = vadd.f32 %v9858_v13, %v11543_v44  ;;  %v9862_v4 = vpop.f32.mrb[24].mxu0  ;;  %9932 = vmatprep.subr.bf16.mxu0 %v10848_v47  ;;  %v719_v9 = vmax.f32 %v643_v1, 0.0 }
 0x1ad   : > { %v1132_v38 = vrot.slane %v1130_v56, 5  ;;  %v1135_v0 = vrot.slane %v1133_v57, 6  ;;  %v1047_v6 = vrot.slane %v1046_v60, 4  ;;  %v11698_v11 = vpop.f32.mrb[25].mxu0  ;;  %v656_v18 = vadd.f32 %v11543_v44, %v655_v21  ;;  %v1155_v52 = vld [vmem:[#allocation2 + $0x60] sm:$0x7] }
 0x1ae   : > { %v1096_v7 = vshrl.u32 %v9315_v62, 16  ;;  %v1099_v41 = vshll.u32 %v9315_v62, 16  ;;  %v9318_v10 = vpack.c.bf16 %v721_v63, %v721_v63  ;;  %v724_v16 = vmax.f32 %v664_v2, 0.0  ;;  %v11701_v20 = vpop.f32.mrb[26].mxu0  ;;  %v1217_v60 = vld [vmem:[#allocation2 + $0x6c] sm:$0xf] }
 0x1af   : > { %v1136_v12 = vor.u32 %v1135_v0, %v1132_v38  ;;  %v10811_v19 = vld [vmem:[#allocation2 + $0x30] sm:$0xff]   ;;  %v1056_v46 = vsel %vm11647_vm9, %v1047_v6, %v1055_v55  ;;  %v11705_v26 = vpop.f32.mrb[27].mxu0  ;;  %9933 = vmatpush3.bf16.msra.mxu0 %v10848_v47  ;;  %v9316_v27 = vpack.c.bf16 %v719_v9, %v719_v9  ;;  %v10813_v21 = vld [vmem:[#allocation2 + $0x38] sm:$0xff]   ;;  %v722_v43 = vmax.f32 %v656_v18, 0.0  ;;  %v1185_v38 = vld [vmem:[#allocation2 + $0x60] sm:$0x8] }
 0x1b0   : > { %v1098_v13 = vrot.slane %v1096_v7, 6  ;;  %v1101_v23 = vrot.slane %v1099_v41, 7  ;;  %v1139_v25 = vshrl.u32 %v9318_v10, 16  ;;  %1057 = vst [vmem:[#allocation2 + $0x44] sm:$0xf] %v1056_v46  ;;  %v1142_v34 = vshll.u32 %v9318_v10, 16  ;;  %9896 = vmatprep.mubr.bf16.mxu0 %v10811_v19  ;;  %9934 = vmatprep.subr.bf16.mxu0 %v10852_v5 }
 0x1b1   : > { %v1137_v28 = vrot.slane %v1136_v12, 4  ;;  %v1152_v32 = vsel %vm11551_vm14, %v1136_v12, %v1151_v59  ;;  %v9321_v42 = vpack.c.bf16 %v724_v16, %v724_v16  ;;  %v1105_v48 = vshrl.u32 %v9316_v27, 16  ;;  %9897 = vmatmul.mubr.bf16.gmra.mrb[44].mxu0 %v10813_v21  ;;  %v1121_v63 = vld [vmem:[#allocation2 + $0x58] sm:$0x3] }
 0x1b2   : > { %1153 = vst [vmem:[#allocation2 + $0x58] sm:$0xc] %v1152_v32  ;;  %v1102_v37 = vor.u32 %v1101_v23, %v1098_v13  ;;  %v1141_v40 = vrot.slane %v1139_v25, 5  ;;  %v1144_v45 = vrot.slane %v1142_v34, 6  ;;  %v1108_v47 = vshll.u32 %v9316_v27, 16 }
 0x1b3   : > { %v667_v49 = vadd.f32 %v11678_v31, %v11543_v44  ;;  %v1198_v53 = vshrl.u32 %v9321_v42, 16  ;;  %v1201_v55 = vshll.u32 %v9321_v42, 16  ;;  %9935 = vmatpush3.bf16.msra.mxu0 %v10852_v5  ;;  %v1107_v57 = vrot.slane %v1105_v48, 6 }
 0x1b4   : > { %v1103_v50 = vrot.slane %v1102_v37, 4  ;;  %v1118_v51 = vsel %vm11557_vm15, %v1102_v37, %v1117_v14  ;;  %v1145_v56 = vor.u32 %v1144_v45, %v1141_v40  ;;  %v1110_v58 = vrot.slane %v1108_v47, 7  ;;  %v9866_v62 = vpop.f32.mrb[28].mxu0  ;;  %9972 = vmatprep.subr.bf16.mxu0 %v11709_v35  ;;  %v10817_v14 = vld [vmem:[#allocation2 + $0x48] sm:$0xff]   ;;  %v1221_v40 = vld [vmem:[#allocation2 + $0x74] sm:$0x1] }
 0x1b5   : > { %1119 = vst [vmem:[#allocation2 + $0x50] sm:$0xe] %v1118_v51  ;;  %v9319_v59 = vpack.c.bf16 %v722_v43, %v722_v43  ;;  %v1200_v31 = vrot.slane %v1198_v53, 7  ;;  %v725_v0 = vmax.f32 %v667_v49, 0.0  ;;  %v659_v1 = vadd.f32 %v11543_v44, %v11682_v36  ;;  %v11719_v6 = vpop.f32.mrb[29].mxu0 }
 0x1b6   : > { %v680_v2 = vadd.f32 %v9862_v4, %v11543_v44  ;;  %v1146_v5 = vsel %vm11564_vm12, %v1137_v28, %v1145_v56  ;;  %v1147_v7 = vrot.slane %v1145_v56, 4  ;;  %v1111_v41 = vor.u32 %v1110_v58, %v1107_v57  ;;  %v11723_v12 = vpop.f32.mrb[30].mxu0 }
 0x1b7   : > { %v1164_v10 = vshll.u32 %v9319_v59, 16  ;;  %1154 = vst [vmem:[#allocation2 + $0x5c] sm:$0xf] %v1146_v5  ;;  %v1203_v9 = vor.u32 %v1201_v55, %v1200_v31  ;;  %v1204_v16 = vrot.slane %v1200_v31, 4  ;;  %v1167_v18 = vshrl.u32 %v9319_v59, 16  ;;  %v10815_v46 = vld [vmem:[#allocation2 + $0x40] sm:$0xff]  }
 0x1b8   : > { %v9322_v19 = vpack.c.bf16 %v725_v0, %v725_v0  ;;  %v11725_v36 = vpop.f32.mrb[31].mxu0  ;;  %v1156_v4 = vsel %vm11581_vm2, %v1147_v7, %v1155_v52  ;;  %v1112_v13 = vsel %vm11573_vm0, %v1103_v50, %v1111_v41  ;;  %v1113_v23 = vrot.slane %v1111_v41, 4  ;;  %9900 = vmatprep.mubr.bf16.mxu0 %v10815_v46  ;;  %v1189_v5 = vld [vmem:[#allocation2 + $0x68] sm:$0xf] }
 0x1b9   : > { %v1166_v25 = vrot.slane %v1164_v10, 5  ;;  %1157 = vst [vmem:[#allocation2 + $0x60] sm:$0x7] %v1156_v4  ;;  %1120 = vst [vmem:[#allocation2 + $0x54] sm:$0xf] %v1112_v13  ;;  %v1218_v28 = vsel %vm11611_vm7, %v1203_v9, %v1217_v60  ;;  %v1169_v32 = vrot.slane %v1167_v18, 4  ;;  %9901 = vmatmul.mubr.bf16.gmra.mrb[48].mxu0 %v10817_v14  ;;  %v672_v47 = vadd.f32 %v11543_v44, %v11698_v11 }
 0x1ba   : > { %v1206_v34 = vshrl.u32 %v9322_v19, 16  ;;  %v1209_v27 = vshll.u32 %v9322_v19, 16  ;;  %v1122_v21 = vsel %vm11589_vm8, %v1113_v23, %v1121_v63  ;;  %1219 = vst [vmem:[#allocation2 + $0x6c] sm:$0xf] %v1218_v28  ;;  %v723_v42 = vmax.f32 %v659_v1, 0.0 }
 0x1bb   : > { %v1186_v37 = vsel %vm11603_vm4, %v1166_v25, %v1185_v38  ;;  %v728_v43 = vmax.f32 %v680_v2, 0.0  ;;  %1123 = vst [vmem:[#allocation2 + $0x58] sm:$0x3] %v1122_v21  ;;  %v1170_v45 = vor.u32 %v1169_v32, %v1166_v25  ;;  %v683_v49 = vadd.f32 %v11701_v20, %v11543_v44  ;;  %v1285_v38 = vld [vmem:[#allocation2 + $0x7c] sm:$0xc] }
 0x1bc   : > { %1187 = vst [vmem:[#allocation2 + $0x60] sm:$0x8] %v1186_v37  ;;  %v1208_v48 = vrot.slane %v1206_v34, 7  ;;  %v9320_v50 = vpack.c.bf16 %v723_v42, %v723_v42  ;;  %v675_v52 = vadd.f32 %v11543_v44, %v11705_v26  ;;  %v696_v53 = vadd.f32 %v9866_v62, %v11543_v44  ;;  %v1251_v21 = vld [vmem:[#allocation2 + $0x74] sm:$0xe] }
 0x1bd   : > { %v9325_v51 = vpack.c.bf16 %v728_v43, %v728_v43  ;;  %v1171_v55 = vrot.slane %v1170_v45, 4  ;;  %v726_v58 = vmax.f32 %v672_v47, 0.0  ;;  %v729_v1 = vmax.f32 %v683_v49, 0.0  ;;  %v1289_v49 = vld [vmem:[#allocation2 + $0x84] sm:$0x7] }
 0x1be   : > { %v1211_v56 = vor.u32 %v1209_v27, %v1208_v48  ;;  %v1213_v57 = vrot.slane %v1208_v48, 4  ;;  %v1173_v60 = vshll.u32 %v9320_v50, 16  ;;  %v1177_v59 = vshrl.u32 %v9320_v50, 16 }
 0x1bf   : > { %v1264_v63 = vshrl.u32 %v9325_v51, 16  ;;  %v1267_v31 = vshll.u32 %v9325_v51, 16  ;;  %v9323_v0 = vpack.c.bf16 %v726_v58, %v726_v58  ;;  %v9326_v10 = vpack.c.bf16 %v729_v1, %v729_v1 }
 0x1c0   : > { %v1212_v11 = vsel %vm11620_vm10, %v1204_v16, %v1211_v56  ;;  %v1222_v20 = vsel %vm11634_vm6, %v1213_v57, %v1221_v40  ;;  %v1175_v44 = vrot.slane %v1173_v60, 5  ;;  %v1179_v26 = vrot.slane %v1177_v59, 4  ;;  %v10819_v9 = vld [vmem:[#allocation2 + $0x50] sm:$0xff]  }
 0x1c1   : > { %1220 = vst [vmem:[#allocation2 + $0x70] sm:$0xf] %v1212_v11  ;;  %1223 = vst [vmem:[#allocation2 + $0x74] sm:$0x1] %v1222_v20  ;;  %v1266_v62 = vrot.slane %v1264_v63, 5  ;;  %v1269_v2 = vrot.slane %v1267_v31, 6  ;;  %9904 = vmatprep.mubr.bf16.mxu0 %v10819_v9 }
 0x1c2   : > { %v1230_v7 = vshrl.u32 %v9323_v0, 16  ;;  %v1233_v41 = vshll.u32 %v9323_v0, 16  ;;  %v727_v14 = vmax.f32 %v675_v52, 0.0  ;;  %v1176_v16 = vsel %vm11628_vm13, %v1171_v55, %v1175_v44  ;;  %v10821_v4 = vld [vmem:[#allocation2 + $0x58] sm:$0xff]   ;;  %v1351_v63 = vld [vmem:[#allocation2 + $0x90] sm:$0xf] }
 0x1c3   : > { %v1180_v18 = vor.u32 %v1179_v26, %v1175_v44  ;;  %v1270_v19 = vor.u32 %v1269_v2, %v1266_v62  ;;  %v732_v46 = vmax.f32 %v696_v53, 0.0  ;;  %1188 = vst [vmem:[#allocation2 + $0x64] sm:$0xf] %v1176_v16  ;;  %v1273_v25 = vshrl.u32 %v9326_v10, 16  ;;  %9905 = vmatmul.mubr.bf16.gmra.mrb[52].mxu0 %v10821_v4  ;;  %v11752_v48 = vld [vmem:[#allocation2 + $0x58] sm:$0xff]  }
 0x1c4   : > { %v1232_v13 = vrot.slane %v1230_v7, 6  ;;  %v1235_v23 = vrot.slane %v1233_v41, 7  ;;  %v1276_v28 = vshll.u32 %v9326_v10, 16  ;;  %v9324_v37 = vpack.c.bf16 %v727_v14, %v727_v14 }
 0x1c5   : > { %v1181_v32 = vrot.slane %v1180_v18, 4  ;;  %v1271_v34 = vrot.slane %v1270_v19, 4  ;;  %v1286_v27 = vsel %vm11551_vm14, %v1270_v19, %v1285_v38  ;;  %v1275_v42 = vrot.slane %v1273_v25, 5  ;;  %v1255_v38 = vld [vmem:[#allocation2 + $0x7c] sm:$0x3] }
 0x1c6   : > { %1287 = vst [vmem:[#allocation2 + $0x7c] sm:$0xc] %v1286_v27  ;;  %v1236_v40 = vor.u32 %v1235_v23, %v1232_v13  ;;  %v1278_v43 = vrot.slane %v1276_v28, 6  ;;  %v9329_v45 = vpack.c.bf16 %v732_v46, %v732_v46  ;;  %v1239_v50 = vshrl.u32 %v9324_v37, 16  ;;  %v1355_v27 = vld [vmem:[#allocation2 + $0x98] sm:$0x1] }
 0x1c7   : > { %v1190_v47 = vsel %vm11647_vm9, %v1181_v32, %v1189_v5  ;;  %v1242_v51 = vshll.u32 %v9324_v37, 16  ;;  %v688_v52 = vadd.f32 %v11045_v8, %v11719_v6  ;;  %v699_v6 = vadd.f32 %v11045_v8, %v11723_v12 }
 0x1c8   : > { %1191 = vst [vmem:[#allocation2 + $0x68] sm:$0xf] %v1190_v47  ;;  %v1237_v53 = vrot.slane %v1236_v40, 4  ;;  %v1252_v55 = vsel %vm11557_vm15, %v1236_v40, %v1251_v21  ;;  %v1279_v56 = vor.u32 %v1278_v43, %v1275_v42  ;;  %v1332_v57 = vshrl.u32 %v9329_v45, 16 }
 0x1c9   : > { %1253 = vst [vmem:[#allocation2 + $0x74] sm:$0xe] %v1252_v55  ;;  %v1241_v58 = vrot.slane %v1239_v50, 6  ;;  %v1244_v60 = vrot.slane %v1242_v51, 7  ;;  %v1335_v59 = vshll.u32 %v9329_v45, 16  ;;  %v730_v31 = vmax.f32 %v688_v52, 0.0 }
 0x1ca   : > { %v1280_v11 = vsel %vm11564_vm12, %v1271_v34, %v1279_v56  ;;  %v1281_v20 = vrot.slane %v1279_v56, 4  ;;  %v11764_v0 = vrot.slane %v1332_v57, 7  ;;  %v691_v44 = vadd.f32 %v11045_v8, %v11725_v36  ;;  %v10824_v26 = vld [vmem:[#allocation2 + $0x60] sm:$0xff]   ;;  %v1323_v56 = vld [vmem:[#allocation2 + $0x8c] sm:$0xf] }
 0x1cb   : > { %1288 = vst [vmem:[#allocation2 + $0x80] sm:$0xf] %v1280_v11  ;;  %v1245_v15 = vor.u32 %v1244_v60, %v1241_v58  ;;  %v9327_v1 = vpack.c.bf16 %v730_v31, %v730_v31  ;;  %vm2573_vm14 = vcmask 1046528   ;;  %v733_v5 = vmax.f32 %v699_v6, 0.0  ;;  %v10826_v7 = vld [vmem:[#allocation2 + $0x60] sm:$0xff]   ;;  %9908 = vmatprep.mubr.bf16.mxu0 %v10824_v26  ;;  %v10836_v60 = vld [vmem:[#allocation9 + $0x110] sm:$0xff]  }
 0x1cc   : > { %v1290_v62 = vsel %vm11581_vm2, %v1281_v20, %v1289_v49  ;;  %v1337_v2 = vor.u32 %v1335_v59, %v11764_v0  ;;  %v3128_v41 = vrot.slane %v11752_v48, 1  ;;  %v731_v16 = vmax.f32 %v691_v44, 0.0  ;;  %v10850_v55 = vld [vmem:[#allocation2] sm:$0xff]   ;;  %v11792_v6 = vld [vmem:[#allocation2 + $0x8] sm:$0xff]  }
 0x1cd   : > { %1291 = vst [vmem:[#allocation2 + $0x84] sm:$0x7] %v1290_v62  ;;  %v1246_v12 = vsel %vm11573_vm0, %v1237_v53, %v1245_v15  ;;  %v1247_v10 = vrot.slane %v1245_v15, 4  ;;  %v1298_v14 = vshll.u32 %v9327_v1, 16  ;;  %v1301_v9 = vshrl.u32 %v9327_v1, 16  ;;  %v11046_v57 = vld [vmem:[#allocation9 + $0x100] sm:$0xff]  }
 0x1ce   : > { %1254 = vst [vmem:[#allocation2 + $0x78] sm:$0xf] %v1246_v12  ;;  %v1352_v33 = vsel %vm11611_vm7, %v1337_v2, %v1351_v63  ;;  %v9330_v36 = vpack.c.bf16 %v733_v5, %v733_v5  ;;  %v3130_v18 = vrot.slane %v10826_v7, 1  ;;  %v9328_v25 = vpack.c.bf16 %v731_v16, %v731_v16  ;;  %v10844_v2 = vld [vmem:[#allocation9 + $0x120] sm:$0xff]   ;;  %v11802_v16 = vld [vmem:[#allocation2 + $0x18] sm:$0xff]  }
 0x1cf   : > { %v1256_v19 = vsel %vm11589_vm8, %v1247_v10, %v1255_v38  ;;  %1353 = vst [vmem:[#allocation2 + $0x90] sm:$0xf] %v1352_v33  ;;  %v1300_v46 = vrot.slane %v1298_v14, 5  ;;  %v1303_v4 = vrot.slane %v1301_v9, 4  ;;  %v10829_v13 = vld [vmem:[#allocation2 + $0x68] sm:$0xff]   ;;  %v1338_v47 = vrot.slane %v11764_v0, 4 }
 0x1d0   : > { %v10830_v29 = vld [vmem:[#allocation2 + $0x68] sm:$0xff]   ;;  %1257 = vst [vmem:[#allocation2 + $0x7c] sm:$0x3] %v1256_v19  ;;  %v1340_v23 = vshrl.u32 %v9330_v36, 16  ;;  %v3131_v28 = vsel %vm2573_vm14, %v3128_v41, %v3130_v18  ;;  %v3132_v39 = vrot.slane %v10829_v13, 1  ;;  %v10833_v21 = vld [vmem:[#allocation2 + $0x70] sm:$0xff]  }
 0x1d1   : > { %v1304_v32 = vor.u32 %v1303_v4, %v1300_v46  ;;  %v1320_v34 = vsel %vm11603_vm4, %v1300_v46, %v1319_v22  ;;  %10060 = vmatprep.mubr.bf16.mxu1 %v3131_v28  ;;  %9909 = vmatmul.mubr.bf16.gmra.mrb[56].mxu0 %v10830_v29  ;;  %v10834_v37 = vld [vmem:[#allocation2 + $0x70] sm:$0xff]   ;;  %v1343_v42 = vshll.u32 %v9330_v36, 16  ;;  %v1307_v43 = vshll.u32 %v9328_v25, 16  ;;  %v10855_v14 = vld [vmem:[#allocation2 + $0x8] sm:$0xfe]  }
 0x1d2   : > { %1321 = vst [vmem:[#allocation2 + $0x84] sm:$0x8] %v1320_v34  ;;  %v1342_v40 = vrot.slane %v1340_v23, 7  ;;  %v1311_v45 = vshrl.u32 %v9328_v25, 16  ;;  %v3133_v50 = vsel %vm2573_vm14, %v3130_v18, %v3132_v39  ;;  %9912 = vmatprep.mubr.bf16.mxu0 %v10833_v21  ;;  %v3134_v51 = vrot.slane %v10834_v37, 1  ;;  %v10857_v10 = vld [vmem:[#allocation2 + $0x10] sm:$0xff]  }
 0x1d3   : > { %v1305_v49 = vrot.slane %v1304_v32, 4  ;;  %v1309_v52 = vrot.slane %v1307_v43, 5  ;;  %10061 = vmatmul.mubr.bf16.vlgmr.msra.gmra.mrb[0].mxu1 %v3133_v50  ;;  %v1930_v15 = vshll.u32 %v10850_v55, 16  ;;  %v1928_v22 = vshrl.u32 %v10850_v55, 16  ;;  %v10849_v33 = vld [vmem:[#allocation9 + $0x128] sm:$0xff]   ;;  %v10853_v34 = vld [vmem:[#allocation9 + $0x130] sm:$0xff]  }
 0x1d4   : > { %v1345_v61 = vor.u32 %v1343_v42, %v1342_v40  ;;  %v1347_v8 = vrot.slane %v1342_v40, 4  ;;  %v1313_v53 = vrot.slane %v1311_v45, 4  ;;  %10077 = vmatpush3.bf16.msra.mxu1 %v11046_v57  ;;  %v3135_v58 = vsel %vm2573_vm14, %v3132_v39, %v3134_v51  ;;  %v10863_v50 = vld [vmem:[#allocation2 + $0x20] sm:$0xff]  }
 0x1d5   : > { %v1310_v31 = vsel %vm11628_vm13, %v1305_v49, %v1309_v52  ;;  %10078 = vmatprep.subr.bf16.mxu1 %v10832_v3  ;;  %10064 = vmatprep.mubr.bf16.mxu1 %v3135_v58  ;;  %v1932_v7 = vrot.slane %v1930_v15, 1  ;;  %v1935_v12 = vshll.u32 %v11792_v6, 16  ;;  %vm1926_vm12 = vsmask.f32 7424  ;;  %v10862_v49 = vld [vmem:[#allocation2 + $0x20] sm:$0xff]  }
 0x1d6   : > { %v1346_v59 = vsel %vm11620_vm10, %v1338_v47, %v1345_v61  ;;  %v1356_v63 = vsel %vm11634_vm6, %v1347_v8, %v1355_v27  ;;  %v1314_v11 = vor.u32 %v1313_v53, %v1309_v52  ;;  %1322 = vst [vmem:[#allocation2 + $0x88] sm:$0xf] %v1310_v31  ;;  %v1939_v36 = vshrl.u32 %v11792_v6, 16  ;;  %v11809_v8 = vld [vmem:[#allocation2 + $0x28] sm:$0xff]  }
 0x1d7   : > { %1354 = vst [vmem:[#allocation2 + $0x94] sm:$0xf] %v1346_v59  ;;  %1357 = vst [vmem:[#allocation2 + $0x98] sm:$0x1] %v1356_v63  ;;  %v10837_v20 = vld [vmem:[#allocation2 + $0x78] sm:$0xff]   ;;  %v1933_v18 = vor.u32 %v1932_v7, %v1928_v22  ;;  %v1937_v19 = vrot.slane %v1935_v12, 1 }
 0x1d8   : > { %v1315_v38 = vrot.slane %v1314_v11, 4  ;;  %v10839_v0 = vld [vmem:[#allocation2 + $0x78] sm:$0xff]   ;;  %10079 = vmatpush3.bf16.msra.mxu1 %v10832_v3  ;;  %v3136_v17 = vrot.slane %v10837_v20, 1  ;;  %v3654_v46 = vshrl.u32 %v10856_v54, 16  ;;  %v3657_v13 = vshll.u32 %v10856_v54, 16  ;;  %v10865_v6 = vld [vmem:[#allocation2 + $0x28] sm:$0xff]  }
 0x1d9   : > { %v10838_v1 = vld [vmem:[#allocation2 + $0x80] sm:$0xff]   ;;  %10080 = vmatprep.subr.bf16.mxu1 %v10836_v60  ;;  %9913 = vmatmul.mubr.bf16.gmra.mrb[60].mxu0 %v10839_v0  ;;  %v3646_v25 = vshrl.u32 %v10855_v14, 16  ;;  %v1943_v28 = vshll.u32 %v10857_v10, 16  ;;  %v10861_v3 = vld [vmem:[#allocation2 + $0x18] sm:$0xff]   ;;  %v1938_v39 = vsel %vm1926_vm12, %v1933_v18, %v1937_v19  ;;  %v3649_v21 = vshll.u32 %v10855_v14, 16  ;;  %v10867_v54 = vld [vmem:[#allocation2 + $0x30] sm:$0xff]  }
 0x1da   : > { %v1324_v30 = vsel %vm11647_vm9, %v1315_v38, %v1323_v56  ;;  %v10842_v44 = vld [vmem:[#allocation2 + $0x80] sm:$0xff]   ;;  %v3137_v26 = vsel %vm2573_vm14, %v3134_v51, %v3136_v17  ;;  %v3138_v62 = vrot.slane %v10838_v1, 1  ;;  %v1951_v37 = vshll.u32 %v11802_v16, 16  ;;  %v10886_v38 = vld [vmem:[#allocation9 + $0x88] sm:$0xff]  }
 0x1db   : > { %1325 = vst [vmem:[#allocation2 + $0x8c] sm:$0xf] %v1324_v30  ;;  %10065 = vmatmul.mubr.bf16.gmra.mrb[4].mxu1 %v3137_v26  ;;  %9916 = vmatprep.mubr.bf16.mxu0 %v10842_v44  ;;  %v3656_v43 = vrot.slane %v3654_v46, 1  ;;  %v3659_v45 = vrot.slane %v3657_v13, 2  ;;  %v1945_v47 = vrot.slane %v1943_v28, 1  ;;  %v1941_v51 = vor.u32 %v1939_v36, %v1937_v19  ;;  %v10860_v1 = vld [vmem:[#allocation9 + $0x140] sm:$0xff]  }
 0x1dc   : > { %10081 = vmatpush3.bf16.msra.mxu1 %v10836_v60  ;;  %v3139_v5 = vsel %vm2573_vm14, %v3136_v17, %v3138_v62  ;;  %vm3644_vm15 = vsmask.f32 6400  ;;  %v3648_v61 = vrot.slane %v3646_v25, 1  ;;  %v3651_v52 = vrot.slane %v3649_v21, 2  ;;  %v10858_v60 = vld [vmem:[#allocation9 + $0x138] sm:$0xff]   ;;  %v10868_v44 = vld [vmem:[#allocation2 + $0x30] sm:$0xff]  }
 0x1dd   : > { %10068 = vmatprep.mubr.bf16.mxu1 %v3139_v5  ;;  %10082 = vmatprep.subr.bf16.mxu1 %v10841_v24  ;;  %v1947_v53 = vshrl.u32 %v10857_v10, 16  ;;  %v1953_v55 = vrot.slane %v1951_v37, 1  ;;  %v3663_v56 = vshrl.u32 %v10861_v3, 16  ;;  %v3660_v58 = vor.u32 %v3659_v45, %v3656_v43  ;;  %v10870_v21 = vld [vmem:[#allocation2 + $0x38] sm:$0xff]   ;;  %v10873_v37 = vld [vmem:[#allocation2 + $0x40] sm:$0xff]  }
 0x1de   : > { %v11799_v9 = vld [vmem:[#allocation2 + $0x90] sm:$0xff]   ;;  %v10854_v27 = vld [vmem:[#allocation2 + $0x98] ss:$0 sps:$4 sm:$0x11]   ;;  %v3666_v59 = vshll.u32 %v10861_v3, 16  ;;  %v3672_v31 = vshrl.u32 %v10862_v49, 16  ;;  %v1946_v0 = vsel %vm1926_vm12, %v1941_v51, %v1945_v47  ;;  %v3652_v15 = vor.u32 %v3651_v52, %v3648_v61 }
 0x1df   : > { %v3142_v29 = vrot.slane %v11799_v9, 1  ;;  %v3144_v57 = vrot.slane %v10854_v27, 1  ;;  %v1949_v63 = vor.u32 %v1947_v53, %v1945_v47  ;;  %v3675_v11 = vshll.u32 %v10862_v49, 16  ;;  %v10897_v61 = vld [vmem:[#allocation9 + $0xa0] sm:$0xff]  }
 0x1e0   : > { %10083 = vmatpush3.bf16.msra.mxu1 %v10841_v24  ;;  %v1959_v20 = vshll.u32 %v10863_v50, 16  ;;  %v3665_v30 = vrot.slane %v3663_v56, 1  ;;  %v1967_v24 = vshll.u32 %v11809_v8, 16  ;;  %v3661_v22 = vsel %vm3644_vm15, %v3652_v15, %v3660_v58  ;;  %v10872_v56 = vld [vmem:[#allocation9 + $0x150] sm:$0xff]  }
 0x1e1   : > { %10084 = vmatprep.subr.bf16.mxu1 %v10844_v2  ;;  %v1954_v17 = vsel %vm1926_vm12, %v1949_v63, %v1953_v55  ;;  %v3145_v26 = vsel %vm2573_vm14, %v3142_v29, %v3144_v57  ;;  %v3674_v5 = vrot.slane %v3672_v31, 1  ;;  %v3677_v7 = vrot.slane %v3675_v11, 2  ;;  %v11826_v11 = vld [vmem:[#allocation2 + $0x48] sm:$0xff]  }
 0x1e2   : > { %v10845_v4 = vld [vmem:[#allocation2 + $0x88] sm:$0xff]   ;;  %v1961_v12 = vrot.slane %v1959_v20, 1  ;;  %v3681_v14 = vshrl.u32 %v10865_v6, 16  ;;  %v3684_v9 = vshll.u32 %v10865_v6, 16  ;;  %v1963_v36 = vshrl.u32 %v10863_v50, 16  ;;  %v10877_v20 = vld [vmem:[#allocation9 + $0x158] sm:$0xff]  }
 0x1e3   : > { %v10847_v23 = vld [vmem:[#allocation2 + $0x88] sm:$0xff]   ;;  %v3140_v32 = vrot.slane %v10845_v4, 1  ;;  %v1969_v18 = vrot.slane %v1967_v24, 1  ;;  %v1975_v19 = vshll.u32 %v10868_v44, 16  ;;  %v3678_v4 = vor.u32 %v3677_v7, %v3674_v5 }
 0x1e4   : > { %10085 = vmatpush3.bf16.msra.mxu1 %v10844_v2  ;;  %9917 = vmatmul.mubr.bf16.gmra.mrb[64].mxu0 %v10847_v23  ;;  %v1955_v2 = vshrl.u32 %v11802_v16, 16  ;;  %v11818_v16 = vld [vmem:[#allocation2 + $0x38] sm:$0xff]   ;;  %v1965_v13 = vor.u32 %v1963_v36, %v1961_v12  ;;  %v3690_v23 = vshrl.u32 %v10867_v54, 16  ;;  %v3693_v25 = vshll.u32 %v10867_v54, 16 }
 0x1e5   : > { %v3141_v40 = vsel %vm2573_vm14, %v3138_v62, %v3140_v32  ;;  %v3143_v42 = vsel %vm2573_vm14, %v3140_v32, %v3142_v29  ;;  %10086 = vmatprep.subr.bf16.mxu1 %v10849_v33  ;;  %9936 = vmatprep.mubr.bf16.mxu0 %v1938_v39  ;;  %v3668_v62 = vrot.slane %v3666_v59, 2  ;;  %v10866_v29 = vld [vmem:[#allocation9 + $0x148] sm:$0xff]   ;;  %v3683_v3 = vrot.slane %v3681_v14, 1  ;;  %v11837_v14 = vld [vmem:[#allocation2 + $0x58] sm:$0xff]  }
 0x1e6   : > { %10069 = vmatmul.mubr.bf16.gmra.mrb[8].mxu1 %v3141_v40  ;;  %v1957_v10 = vor.u32 %v1955_v2, %v1953_v55  ;;  %v3686_v32 = vrot.slane %v3684_v9, 2  ;;  %v1977_v27 = vrot.slane %v1975_v19, 1  ;;  %v1983_v39 = vshll.u32 %v11818_v16, 16  ;;  %v10884_v9 = vld [vmem:[#allocation9 + $0x160] sm:$0xff]  }
 0x1e7   : > { %10072 = vmatprep.mubr.bf16.mxu1 %v3143_v42  ;;  %v3669_v46 = vor.u32 %v3668_v62, %v3665_v30  ;;  %v10871_v42 = vld [vmem:[#allocation2 + $0x40] sm:$0xff]   ;;  %v3692_v45 = vrot.slane %v3690_v23, 1  ;;  %v3695_v47 = vrot.slane %v3693_v25, 2  ;;  %v1979_v49 = vshrl.u32 %v10868_v44, 16  ;;  %v10900_v30 = vld [vmem:[#allocation9 + $0xa8] sm:$0xff]   ;;  %v10880_v23 = vld [vmem:[#allocation2 + $0x58] sm:$0xff]  }
 0x1e8   : > { %10087 = vmatpush3.bf16.msra.mxu1 %v10849_v33  ;;  %v10890_v33 = vld [vmem:[#allocation9 + $0x90] sm:$0xff]   ;;  %v1962_v28 = vsel %vm1926_vm12, %v1957_v10, %v1961_v12  ;;  %v3687_v50 = vor.u32 %v3686_v32, %v3683_v3  ;;  %v1971_v51 = vshrl.u32 %v11809_v8, 16  ;;  %v1985_v53 = vrot.slane %v1983_v39, 1  ;;  %v10892_v25 = vld [vmem:[#allocation9 + $0x168] sm:$0xff]  }
 0x1e9   : > { %10088 = vmatprep.subr.bf16.mxu1 %v10853_v34  ;;  %v3670_v40 = vsel %vm3644_vm15, %v3660_v58, %v3669_v46  ;;  %v3679_v43 = vsel %vm3644_vm15, %v3669_v46, %v3678_v4  ;;  %v1981_v52 = vor.u32 %v1979_v49, %v1977_v27  ;;  %v3699_v55 = vshrl.u32 %v10870_v21, 16  ;;  %v10904_v12 = vld [vmem:[#allocation9 + $0xb0] sm:$0xff]  }
 0x1ea   : > { %v1991_v57 = vshll.u32 %v10873_v37, 16  ;;  %v1973_v58 = vor.u32 %v1971_v51, %v1969_v18  ;;  %v3708_v59 = vshrl.u32 %v10871_v42, 16  ;;  %v3696_v63 = vor.u32 %v3695_v47, %v3692_v45  ;;  %v11847_v47 = vld [vmem:[#allocation2 + $0x68] sm:$0xff]  }
 0x1eb   : > { %v3711_v31 = vshll.u32 %v10871_v42, 16  ;;  %v3688_v6 = vsel %vm3644_vm15, %v3678_v4, %v3687_v50  ;;  %v1986_v15 = vsel %vm1926_vm12, %v1981_v52, %v1985_v53  ;;  %v3701_v24 = vrot.slane %v3699_v55, 1  ;;  %v10899_v55 = vld [vmem:[#allocation9 + $0x170] sm:$0xff]  }
 0x1ec   : > { %10089 = vmatpush3.bf16.msra.mxu1 %v10853_v34  ;;  %9937 = vmatmul.mubr.bf16.vlgmr.msra.gmra.mrb[32].mxu0 %v1946_v0  ;;  %v1970_v34 = vsel %vm1926_vm12, %v1965_v13, %v1969_v18  ;;  %v1978_v8 = vsel %vm1926_vm12, %v1973_v58, %v1977_v27  ;;  %v11829_v0 = vld [vmem:[#allocation2 + $0x50] sm:$0xff]   ;;  %v1995_v62 = vshrl.u32 %v10873_v37, 16  ;;  %v3697_v2 = vsel %vm3644_vm15, %v3687_v50, %v3696_v63  ;;  %v10881_v37 = vld [vmem:[#allocation2 + $0x60] sm:$0xff]  }
 0x1ed   : > { %10090 = vmatprep.subr.bf16.mxu1 %v10858_v60  ;;  %9940 = vmatprep.mubr.bf16.mxu0 %v1954_v17  ;;  %v1993_v17 = vrot.slane %v1991_v57, 1  ;;  %v1999_v5 = vshll.u32 %v11826_v11, 16  ;;  %v1987_v7 = vshrl.u32 %v11818_v16, 16  ;;  %v2007_v10 = vshll.u32 %v11829_v0, 16 }
 0x1ee   : > { %10073 = vmatmul.mubr.bf16.gmra.mrb[12].mxu1 %v3145_v26  ;;  %9973 = vmatpush3.bf16.msra.mxu0 %v11709_v35  ;;  %v10893_v35 = vld [vmem:[#allocation9 + $0x98] sm:$0xff]   ;;  %v3710_v26 = vrot.slane %v3708_v59, 1  ;;  %v2011_v45 = vshrl.u32 %v11829_v0, 16  ;;  %v2003_v49 = vshrl.u32 %v11826_v11, 16  ;;  %v3735_v50 = vshrl.u32 %v10880_v23, 16  ;;  %v11853_v11 = vld [vmem:[#allocation9 + $0xc0] sm:$0xff]  }
 0x1ef   : > { %10092 = vmatprep.mubr.bf16.mxu1 %v3661_v22  ;;  %9974 = vmatprep.subr.bf16.mxu0 %v10886_v38  ;;  %v3713_v22 = vrot.slane %v3711_v31, 2  ;;  %v1997_v54 = vor.u32 %v1995_v62, %v1993_v17  ;;  %v1989_v36 = vor.u32 %v1987_v7, %v1985_v53  ;;  %v2001_v4 = vrot.slane %v1999_v5, 1 }
 0x1f0   : > { %10091 = vmatpush3.bf16.msra.mxu1 %v10858_v60  ;;  %v3702_v60 = vshll.u32 %v10870_v21, 16  ;;  %v2009_v32 = vrot.slane %v2007_v10, 1  ;;  %v3738_v52 = vshll.u32 %v10880_v23, 16  ;;  %v3744_v57 = vshrl.u32 %v10881_v37, 16 }
 0x1f1   : > { %10128 = vmatprep.subr.bf16.mxu1 %v10860_v1  ;;  %v3714_v46 = vor.u32 %v3713_v22, %v3710_v26  ;;  %v1994_v16 = vsel %vm1926_vm12, %v1989_v36, %v1993_v17  ;;  %v2002_v3 = vsel %vm1926_vm12, %v1997_v54, %v2001_v4  ;;  %v3747_v58 = vshll.u32 %v10881_v37, 16  ;;  %v11862_v22 = vld [vmem:[#allocation9 + $0x180] sm:$0xff]  }
 0x1f2   : > { %9975 = vmatpush3.bf16.msra.mxu0 %v10886_v38  ;;  %v10875_v38 = vld [vmem:[#allocation2 + $0x48] sm:$0xff]   ;;  %v3704_v44 = vrot.slane %v3702_v60, 2  ;;  %v2013_v51 = vor.u32 %v2011_v45, %v2009_v32  ;;  %v2031_v31 = vshll.u32 %v11847_v47, 16  ;;  %v2019_v5 = vshrl.u32 %v11837_v14, 16 }
 0x1f3   : > { %9976 = vmatprep.subr.bf16.mxu0 %v10890_v33  ;;  %v3717_v18 = vshrl.u32 %v10875_v38, 16  ;;  %v3720_v19 = vshll.u32 %v10875_v38, 16  ;;  %v3740_v38 = vrot.slane %v3738_v52, 2  ;;  %vm4313_vm0 = vcmask 1045504  }
 0x1f4   : > { %9941 = vmatmul.mubr.bf16.gmra.mrb[36].mxu0 %v1962_v28  ;;  %v10908_v28 = vld [vmem:[#allocation9 + $0xb8] sm:$0xff]   ;;  %v2033_v7 = vrot.slane %v2031_v31, 1  ;;  %vm5384_vm2 = vsmask.f32 5376  ;;  %vm6053_vm8 = vcmask 1044480  }
 0x1f5   : > { %9944 = vmatprep.mubr.bf16.mxu0 %v1970_v34  ;;  %v2015_v34 = vshll.u32 %v11837_v14, 16  ;;  %v3719_v39 = vrot.slane %v3717_v18, 1  ;;  %v3722_v21 = vrot.slane %v3720_v19, 2 }
 0x1f6   : > { %10093 = vmatmul.mubr.bf16.vlgmr.msra.gmra.mrb[16].mxu1 %v3670_v40  ;;  %9977 = vmatpush3.bf16.msra.mxu0 %v10890_v33  ;;  %v3705_v33 = vor.u32 %v3704_v44, %v3701_v24  ;;  %v10888_v24 = vld [vmem:[#allocation2 + $0x70] sm:$0xff]  }
 0x1f7   : > { %10129 = vmatpush3.bf16.msra.mxu1 %v10860_v1  ;;  %10096 = vmatprep.mubr.bf16.mxu1 %v3679_v43  ;;  %v10876_v1 = vld [vmem:[#allocation2 + $0x50] sm:$0xff]   ;;  %v3723_v59 = vor.u32 %v3722_v21, %v3719_v39  ;;  %v3762_v18 = vshrl.u32 %v10888_v24, 16  ;;  %v3765_v19 = vshll.u32 %v10888_v24, 16  ;;  %v10898_v21 = vld [vmem:[#allocation2 + $0x88] sm:$0xff]  }
 0x1f8   : > { %10130 = vmatprep.subr.bf16.mxu1 %v10866_v29  ;;  %9978 = vmatprep.subr.bf16.mxu0 %v10893_v35  ;;  %v3726_v13 = vshrl.u32 %v10876_v1, 16  ;;  %v3706_v27 = vsel %vm3644_vm15, %v3696_v63, %v3705_v33  ;;  %v3715_v40 = vsel %vm3644_vm15, %v3705_v33, %v3714_v46  ;;  %v10889_v44 = vld [vmem:[#allocation2 + $0x70] sm:$0xff]  }
 0x1f9   : > { %v3724_v17 = vsel %vm3644_vm15, %v3714_v46, %v3723_v59  ;;  %v2039_v46 = vshll.u32 %v10889_v44, 16  ;;  %v2043_v37 = vshrl.u32 %v10889_v44, 16 }
 0x1fa   : > { %9979 = vmatpush3.bf16.msra.mxu0 %v10893_v35  ;;  %v11840_v35 = vld [vmem:[#allocation2 + $0x60] sm:$0xff]   ;;  %v3728_v42 = vrot.slane %v3726_v13, 1  ;;  %v10894_v13 = vld [vmem:[#allocation2 + $0x78] sm:$0xff]  }
 0x1fb   : > { %10131 = vmatpush3.bf16.msra.mxu1 %v10866_v29  ;;  %9980 = vmatprep.subr.bf16.mxu0 %v10897_v61  ;;  %v3729_v29 = vshll.u32 %v10876_v1, 16  ;;  %v2023_v53 = vshll.u32 %v11840_v35, 16  ;;  %v3746_v1 = vrot.slane %v3744_v57, 1  ;;  %v2027_v62 = vshrl.u32 %v11840_v35, 16  ;;  %v10901_v57 = vld [vmem:[#allocation2 + $0x88] sm:$0xff]  }
 0x1fc   : > { %9945 = vmatmul.mubr.bf16.gmra.mrb[40].mxu0 %v1978_v8  ;;  %10132 = vmatprep.subr.bf16.mxu1 %v10872_v56  ;;  %v3737_v8 = vrot.slane %v3735_v50, 1  ;;  %v2041_v39 = vrot.slane %v2039_v46, 1  ;;  %v3792_v24 = vshll.u32 %v10901_v57, 16 }
 0x1fd   : > { %9948 = vmatprep.mubr.bf16.mxu0 %v1986_v15  ;;  %v3731_v43 = vrot.slane %v3729_v29, 2  ;;  %v2025_v0 = vrot.slane %v2023_v53, 1  ;;  %v10907_v15 = vld [vmem:[#allocation9 + $0x178] sm:$0xff]  }
 0x1fe   : > { %10097 = vmatmul.mubr.bf16.gmra.mrb[20].mxu1 %v3688_v6  ;;  %9981 = vmatpush3.bf16.msra.mxu0 %v10897_v61  ;;  %v2017_v61 = vrot.slane %v2015_v34, 1  ;;  %v10887_v6 = vld [vmem:[#allocation2 + $0x68] sm:$0xff]   ;;  %v3767_v34 = vrot.slane %v3765_v19, 2  ;;  %v2067_v19 = vshrl.u32 %v10898_v21, 16 }
 0x1ff   : > { %10100 = vmatprep.mubr.bf16.mxu1 %v3697_v2  ;;  %10133 = vmatpush3.bf16.msra.mxu1 %v10872_v56  ;;  %v2005_v56 = vor.u32 %v2003_v49, %v2001_v4  ;;  %v3732_v60 = vor.u32 %v3731_v43, %v3728_v42  ;;  %v11860_v2 = vld [vmem:[#allocation2 + $0x78] sm:$0xff]   ;;  %v2029_v54 = vor.u32 %v2027_v62, %v2025_v0  ;;  %v3753_v33 = vshrl.u32 %v10887_v6, 16 }
 0x200   : > { %10134 = vmatprep.subr.bf16.mxu1 %v10877_v20  ;;  %9982 = vmatprep.subr.bf16.mxu0 %v10900_v30  ;;  %v3756_v36 = vshll.u32 %v10887_v6, 16  ;;  %v2047_v14 = vshll.u32 %v11860_v2, 16  ;;  %v3774_v43 = vshll.u32 %v10894_v13, 16  ;;  %v2051_v31 = vshrl.u32 %v11860_v2, 16  ;;  %v10902_v6 = vld [vmem:[#allocation2 + $0x90] sm:$0xff]  }
 0x201   : > { %v2010_v63 = vsel %vm1926_vm12, %v2005_v56, %v2009_v32  ;;  %v3733_v26 = vsel %vm3644_vm15, %v3723_v59, %v3732_v60  ;;  %v2034_v29 = vsel %vm1926_vm12, %v2029_v54, %v2033_v7  ;;  %v3764_v32 = vrot.slane %v3762_v18, 1 }
 0x202   : > { %9983 = vmatpush3.bf16.msra.mxu0 %v10900_v30  ;;  %v3749_v30 = vrot.slane %v3747_v58, 2  ;;  %v3758_v35 = vrot.slane %v3756_v36, 2  ;;  %v2049_v42 = vrot.slane %v2047_v14, 1  ;;  %v3776_v58 = vrot.slane %v3774_v43, 2  ;;  %v10906_v36 = vld [vmem:[#allocation2 + $0x8] sm:$0xff]   ;;  %v10911_v43 = vld [vmem:[#allocation2 + $0x10] sm:$0xff]  }
 0x203   : > { %10135 = vmatpush3.bf16.msra.mxu1 %v10877_v20  ;;  %9984 = vmatprep.subr.bf16.mxu0 %v10904_v12  ;;  %v2018_v20 = vsel %vm1926_vm12, %v2013_v51, %v2017_v61  ;;  %v3768_v51 = vor.u32 %v3767_v34, %v3764_v32  ;;  %v3798_v2 = vshrl.u32 %v10902_v6, 16  ;;  %v10912_v34 = vld [vmem:[#allocation2 + $0x10] sm:$0xff]  }
 0x204   : > { %9949 = vmatmul.mubr.bf16.gmra.mrb[44].mxu0 %v1994_v16  ;;  %10136 = vmatprep.subr.bf16.mxu1 %v10884_v9  ;;  %v3750_v10 = vor.u32 %v3749_v30, %v3746_v1  ;;  %v3755_v16 = vrot.slane %v3753_v33, 1  ;;  %v3789_v30 = vshrl.u32 %v10901_v57, 16  ;;  %v3801_v33 = vshll.u32 %v10902_v6, 16  ;;  %v10920_v6 = vld [vmem:[#allocation9 + $0x188] sm:$0xff]  }
 0x205   : > { %9952 = vmatprep.mubr.bf16.mxu0 %v2002_v3  ;;  %v10896_v3 = vld [vmem:[#allocation2 + $0x80] sm:$0xff]   ;;  %v3800_v14 = vrot.slane %v3798_v2, 1 }
 0x206   : > { %10101 = vmatmul.mubr.bf16.gmra.mrb[24].mxu1 %v3706_v27  ;;  %9985 = vmatpush3.bf16.msra.mxu0 %v10904_v12  ;;  %v3741_v12 = vor.u32 %v3740_v38, %v3737_v8  ;;  %v2035_v27 = vshrl.u32 %v11847_v47, 16  ;;  %v3759_v45 = vor.u32 %v3758_v35, %v3755_v16  ;;  %v2055_v53 = vshll.u32 %v10896_v3, 16 }
 0x207   : > { %10104 = vmatprep.mubr.bf16.mxu1 %v3715_v40  ;;  %10137 = vmatpush3.bf16.msra.mxu1 %v10884_v9  ;;  %v2021_v9 = vor.u32 %v2019_v5, %v2017_v61  ;;  %v3771_v40 = vshrl.u32 %v10894_v13, 16  ;;  %v2045_v61 = vor.u32 %v2043_v37, %v2041_v39  ;;  %v10905_v5 = vld [vmem:[#allocation2] sm:$0xfe]  }
 0x208   : > { %10138 = vmatprep.subr.bf16.mxu1 %v10892_v25  ;;  %9986 = vmatprep.subr.bf16.mxu0 %v10908_v28  ;;  %v3742_v23 = vsel %vm3644_vm15, %v3732_v60, %v3741_v12  ;;  %v2037_v49 = vor.u32 %v2035_v27, %v2033_v7  ;;  %v2063_v60 = vshll.u32 %v10898_v21, 16  ;;  %v3760_v59 = vsel %vm3644_vm15, %v3750_v10, %v3759_v45  ;;  %v10913_v21 = vld [vmem:[#allocation2 + $0x18] sm:$0xff]  }
 0x209   : > { %v2026_v4 = vsel %vm1926_vm12, %v2021_v9, %v2025_v0  ;;  %v3773_v56 = vrot.slane %v3771_v40, 1  ;;  %v2050_v47 = vsel %vm1926_vm12, %v2045_v61, %v2049_v42  ;;  %v2057_v38 = vrot.slane %v2055_v53, 1 }
 0x20a   : > { %9987 = vmatpush3.bf16.msra.mxu0 %v10908_v28  ;;  %v10895_v28 = vld [vmem:[#allocation2 + $0x80] sm:$0xff]   ;;  %v2053_v0 = vor.u32 %v2051_v31, %v2049_v42  ;;  %v2065_v1 = vrot.slane %v2063_v60, 1  ;;  %v3794_v9 = vrot.slane %v3792_v24, 2  ;;  %v2574_v13 = vrot.slane %v10905_v5, 1  ;;  %v10915_v60 = vld [vmem:[#allocation2 + $0x18] sm:$0xff]   ;;  %v11048_v31 = vld [vmem:[#allocation9 + $0xc8] sm:$0xff]  }
 0x20b   : > { %10139 = vmatpush3.bf16.msra.mxu1 %v10892_v25  ;;  %10024 = vmatprep.subr.bf16.mxu0 %v11853_v11  ;;  %v3751_v25 = vsel %vm3644_vm15, %v3741_v12, %v3750_v10  ;;  %v3780_v50 = vshrl.u32 %v10895_v28, 16  ;;  %v3783_v52 = vshll.u32 %v10895_v28, 16  ;;  %v3777_v44 = vor.u32 %v3776_v58, %v3773_v56  ;;  %v10909_v12 = vld [vmem:[#allocation2 + $0x98] ss:$0 sps:$4 sm:$0x33]   ;;  %v11050_v5 = vld [vmem:[#allocation9 + $0xd8] sm:$0xff]  }
 0x20c   : > { %9953 = vmatmul.mubr.bf16.gmra.mrb[48].mxu0 %v2010_v63  ;;  %10140 = vmatprep.subr.bf16.mxu1 %v10899_v55  ;;  %v2058_v7 = vsel %vm1926_vm12, %v2053_v0, %v2057_v38  ;;  %v3791_v10 = vrot.slane %v3789_v30, 1  ;;  %v3807_v16 = vshrl.u32 %v10909_v12, 16  ;;  %v10923_v30 = vld [vmem:[#allocation2 + $0x38] sm:$0xff]  }
 0x20d   : > { %9956 = vmatprep.mubr.bf16.mxu0 %v2018_v20  ;;  %v3782_v63 = vrot.slane %v3780_v50, 1  ;;  %v3769_v20 = vsel %vm3644_vm15, %v3759_v45, %v3768_v51  ;;  %v3785_v8 = vrot.slane %v3783_v52, 2  ;;  %v3778_v18 = vsel %vm3644_vm15, %v3768_v51, %v3777_v44 }
 0x20e   : > { %10105 = vmatmul.mubr.bf16.gmra.mrb[28].mxu1 %v3724_v17  ;;  %v2059_v17 = vshrl.u32 %v10896_v3, 16  ;;  %v3795_v35 = vor.u32 %v3794_v9, %v3791_v10  ;;  %v3810_v3 = vshll.u32 %v10909_v12, 16  ;;  %v3809_v40 = vrot.slane %v3807_v16, 1  ;;  %v10926_v12 = vld [vmem:[#allocation9 + $0x190] sm:$0xff]   ;;  %v11051_v9 = vld [vmem:[#allocation9 + $0xe0] sm:$0xff]  }
 0x20f   : > { %10108 = vmatprep.mubr.bf16.mxu1 %v3733_v26  ;;  %10141 = vmatpush3.bf16.msra.mxu1 %v10899_v55  ;;  %v2042_v55 = vsel %vm1926_vm12, %v2037_v49, %v2041_v39  ;;  %v3786_v26 = vor.u32 %v3785_v8, %v3782_v63  ;;  %v10910_v49 = vld [vmem:[#allocation2 + $0x8] sm:$0xfc]   ;;  %v2577_v50 = vrot.slane %v10912_v34, 1  ;;  %v2579_v51 = vrot.slane %v10913_v21, 1  ;;  %v10916_v63 = vld [vmem:[#allocation2 + $0x20] sm:$0xff]   ;;  %v10932_v34 = vld [vmem:[#allocation2 + $0x50] sm:$0xff]  }
 0x210   : > { %10142 = vmatprep.subr.bf16.mxu1 %v10907_v15  ;;  %v2061_v62 = vor.u32 %v2059_v17, %v2057_v38  ;;  %v3812_v42 = vrot.slane %v3810_v3, 2  ;;  %v4315_v52 = vrot.slane %v10911_v43, 2  ;;  %v4314_v56 = vrot.slane %v10910_v49, 2  ;;  %v11053_v3 = vld [vmem:[#allocation9 + $0xf0] sm:$0xff]   ;;  %v10943_v21 = vld [vmem:[#allocation9 + $0x1a8] sm:$0xff]   ;;  %v11054_v43 = vld [vmem:[#allocation9 + $0xf8] sm:$0xff]  }
 0x211   : > { %v3796_v37 = vsel %vm3644_vm15, %v3786_v26, %v3795_v35  ;;  %v2580_v57 = vsel %vm2573_vm14, %v2577_v50, %v2579_v51  ;;  %v4317_v38 = vrot.slane %v10915_v60, 2  ;;  %v4319_v0 = vrot.slane %v10916_v63, 2  ;;  %v10934_v60 = vld [vmem:[#allocation2 + $0x58] sm:$0xff]   ;;  %v10935_v63 = vld [vmem:[#allocation2 + $0x60] sm:$0xff]  }
 0x212   : > { %v2066_v54 = vsel %vm1926_vm12, %v2061_v62, %v2065_v1  ;;  %v3813_v61 = vor.u32 %v3812_v42, %v3809_v40  ;;  %v10921_v62 = vld [vmem:[#allocation2 + $0x30] sm:$0xff]   ;;  %v2587_v2 = vrot.slane %v10923_v30, 1  ;;  %v2593_v49 = vrot.slane %v10932_v34, 1  ;;  %v10939_v30 = vld [vmem:[#allocation2 + $0x68] sm:$0xff]  }
 0x213   : > { %10143 = vmatpush3.bf16.msra.mxu1 %v10907_v15  ;;  %v10903_v15 = vld [vmem:[#allocation2 + $0x90] ss:$0 sps:$4 sm:$0x11]   ;;  %v4318_v24 = vsel %vm4313_vm0, %v4315_v52, %v4317_v38  ;;  %v4323_v10 = vrot.slane %v10921_v62, 2 }
 0x214   : > { %9957 = vmatmul.mubr.bf16.gmra.mrb[52].mxu0 %v2026_v4  ;;  %10180 = vmatprep.subr.bf16.mxu1 %v11862_v22  ;;  %v2071_v46 = vshll.u32 %v10903_v15, 16  ;;  %v3787_v4 = vsel %vm3644_vm15, %v3777_v44, %v3786_v26  ;;  %v11049_v15 = vld [vmem:[#allocation9 + $0xd0] sm:$0xff]   ;;  %v10919_v44 = vld [vmem:[#allocation2 + $0x28] sm:$0xff]   ;;  %v4320_v26 = vsel %vm4313_vm0, %v4317_v38, %v4319_v0  ;;  %v4333_v38 = vrot.slane %v10934_v60, 2 }
 0x215   : > { %9960 = vmatprep.mubr.bf16.mxu0 %v2034_v29  ;;  %v2069_v29 = vor.u32 %v2067_v19, %v2065_v1  ;;  %v10922_v1 = vld [vmem:[#allocation2 + $0x30] sm:$0xff]   ;;  %v10931_v19 = vld [vmem:[#allocation9 + $0x198] sm:$0xff]  }
 0x216   : > { %10109 = vmatmul.mubr.bf16.gmra.mrb[32].mxu1 %v3742_v23  ;;  %v3803_v23 = vrot.slane %v3801_v33, 2  ;;  %v2073_v28 = vrot.slane %v2071_v46, 1  ;;  %v10924_v46 = vld [vmem:[#allocation2 + $0x38] sm:$0xff]   ;;  %v10930_v42 = vld [vmem:[#allocation2 + $0x50] sm:$0xff]  }
 0x217   : > { %10112 = vmatprep.mubr.bf16.mxu1 %v3751_v25  ;;  %v2575_v25 = vrot.slane %v10906_v36, 1  ;;  %v10927_v36 = vld [vmem:[#allocation2 + $0x40] sm:$0xff]   ;;  %v4325_v16 = vrot.slane %v10924_v46, 2 }
 0x218   : > { %v2074_v32 = vsel %vm1926_vm12, %v2069_v29, %v2073_v28  ;;  %v3804_v27 = vor.u32 %v3803_v23, %v3800_v14  ;;  %v10928_v29 = vld [vmem:[#allocation2 + $0x48] sm:$0xff]   ;;  %v2589_v23 = vrot.slane %v10927_v36, 1 }
 0x219   : > { %v2576_v39 = vsel %vm2573_vm14, %v2574_v13, %v2575_v25  ;;  %v2578_v53 = vsel %vm2573_vm14, %v2575_v25, %v2577_v50  ;;  %v10925_v13 = vld [vmem:[#allocation2 + $0x40] sm:$0xff]   ;;  %v11052_v14 = vld [vmem:[#allocation9 + $0xe8] sm:$0xff]   ;;  %v2591_v28 = vrot.slane %v10928_v29, 1 }
 0x21a   : > { %v3805_v45 = vsel %vm3644_vm15, %v3795_v35, %v3804_v27  ;;  %v3814_v58 = vsel %vm3644_vm15, %v3804_v27, %v3813_v61  ;;  %v10937_v25 = vld [vmem:[#allocation9 + $0x1a0] sm:$0xff]   ;;  %v4327_v35 = vrot.slane %v10925_v13, 2  ;;  %v10933_v27 = vld [vmem:[#allocation2 + $0x58] sm:$0xff]   ;;  %v4331_v61 = vrot.slane %v10930_v42, 2 }
 0x21b   : > { %v2595_v50 = vrot.slane %v10933_v27, 1  ;;  %v10951_v29 = vld [vmem:[#allocation2 + $0x90] ss:$0 sps:$4 sm:$0x11]  }
 0x21c   : > { %9961 = vmatmul.mubr.bf16.gmra.mrb[56].mxu0 %v2042_v55  ;;  %v10917_v55 = vld [vmem:[#allocation2 + $0x20] sm:$0xff]   ;;  %v4328_v40 = vsel %vm4313_vm0, %v4325_v16, %v4327_v35  ;;  %v2609_v27 = vrot.slane %v10951_v29, 1 }
 0x21d   : > { %9964 = vmatprep.mubr.bf16.mxu0 %v2050_v47  ;;  %v10918_v47 = vld [vmem:[#allocation2 + $0x28] sm:$0xff]  }
 0x21e   : > { %10113 = vmatmul.mubr.bf16.gmra.mrb[0].mxu1 %v3760_v59  ;;  %v4316_v59 = vsel %vm4313_vm0, %v4314_v56, %v4315_v52  ;;  %v2583_v8 = vrot.slane %v10918_v47, 1  ;;  %v2596_v56 = vsel %vm2573_vm14, %v2593_v49, %v2595_v50  ;;  %v10954_v47 = vld [vmem:[#allocation9 + $0x1b8] sm:$0xff]  }
 0x21f   : > { %10116 = vmatprep.mubr.bf16.mxu1 %v3769_v20  ;;  %v2581_v20 = vrot.slane %v10917_v55, 1  ;;  %v10936_v55 = vld [vmem:[#allocation2 + $0x60] sm:$0xff]  }
 0x221   : > { %v2582_v17 = vsel %vm2573_vm14, %v2579_v51, %v2581_v20  ;;  %v10948_v51 = vld [vmem:[#allocation9 + $0x1b0] sm:$0xff]  }
 0x224   : > { %9965 = vmatmul.mubr.bf16.gmra.mrb[60].mxu0 %v2058_v7  ;;  %v2585_v7 = vrot.slane %v10922_v1, 1  ;;  %v10942_v1 = vld [vmem:[#allocation2 + $0x78] sm:$0xff]  }
 0x225   : > { %9968 = vmatprep.mubr.bf16.mxu0 %v2066_v54  ;;  %v4321_v54 = vrot.slane %v10919_v44, 2  ;;  %v10940_v44 = vld [vmem:[#allocation2 + $0x70] sm:$0xff]   ;;  %v2603_v62 = vrot.slane %v10942_v1, 1 }
 0x226   : > { %10117 = vmatmul.mubr.bf16.gmra.mrb[4].mxu1 %v3778_v18  ;;  %v2586_v33 = vsel %vm2573_vm14, %v2583_v8, %v2585_v7  ;;  %v2588_v18 = vsel %vm2573_vm14, %v2585_v7, %v2587_v2  ;;  %v4339_v7 = vrot.slane %v10940_v44, 2  ;;  %v10969_v44 = vld [vmem:[#allocation2 + $0x40] sm:$0xff]  }
 0x227   : > { %10120 = vmatprep.mubr.bf16.mxu1 %v3787_v4  ;;  %v4324_v4 = vsel %vm4313_vm0, %v4321_v54, %v4323_v10 }
 0x22c   : > { %9969 = vmatmul.mubr.bf16.gmra.mrb[64].mxu0 %v2074_v32  ;;  %v2590_v32 = vsel %vm2573_vm14, %v2587_v2, %v2589_v23  ;;  %v10946_v2 = vld [vmem:[#allocation2 + $0x80] sm:$0xff]  }
 0x22d   : > { %9988 = vmatprep.mubr.bf16.mxu0 %v2576_v39  ;;  %v2592_v39 = vsel %vm2573_vm14, %v2589_v23, %v2591_v28  ;;  %v10953_v23 = vld [vmem:[#allocation2 + $0x10] sm:$0xff]  }
 0x22e   : > { %10121 = vmatmul.mubr.bf16.gmra.mrb[8].mxu1 %v3796_v37  ;;  %v4326_v37 = vsel %vm4313_vm0, %v4323_v10, %v4325_v16  ;;  %v10947_v10 = vld [vmem:[#allocation2 + $0x88] sm:$0xff]  }
 0x22f   : > { %10124 = vmatprep.mubr.bf16.mxu1 %v3805_v45  ;;  %v10929_v45 = vld [vmem:[#allocation2 + $0x48] sm:$0xff]  }
 0x230   : > { %v4329_v52 = vrot.slane %v10929_v45, 2  ;;  %v10949_v16 = vld [vmem:[#allocation2 + $0x88] sm:$0xff]  }
 0x231   : > { %v4345_v34 = vrot.slane %v10949_v16, 2 }
 0x234   : > { %9989 = vmatmul.mubr.bf16.vlgmr.msra.gmra.mrb[32].mxu0 %v2578_v53  ;;  %v2594_v53 = vsel %vm2573_vm14, %v2591_v28, %v2593_v49  ;;  %v10952_v28 = vld [vmem:[#allocation2 + $0x8] sm:$0xfe]   ;;  %v10955_v49 = vld [vmem:[#allocation2 + $0x98] ss:$0 sps:$4 sm:$0x33]  }
 0x235   : > { %9992 = vmatprep.mubr.bf16.mxu0 %v2580_v57  ;;  %10025 = vmatpush3.bf16.msra.mxu0 %v11853_v11  ;;  %v2584_v11 = vsel %vm2573_vm14, %v2581_v20, %v2583_v8  ;;  %v10938_v57 = vld [vmem:[#allocation2 + $0x68] sm:$0xff]  }
 0x236   : > { %10125 = vmatmul.mubr.bf16.gmra.mrb[12].mxu1 %v3814_v58  ;;  %10026 = vmatprep.subr.bf16.mxu0 %v11048_v31  ;;  %v4330_v58 = vsel %vm4313_vm0, %v4327_v35, %v4329_v52  ;;  %v2599_v20 = vrot.slane %v10938_v57, 1  ;;  %v11907_v8 = vld [vmem:[#allocation9 + $0x1c0] sm:$0xff]  }
 0x237   : > { %10144 = vmatprep.mubr.bf16.mxu1 %v4316_v59  ;;  %v4332_v59 = vsel %vm4313_vm0, %v4329_v52, %v4331_v61  ;;  %v10956_v52 = vld [vmem:[#allocation2 + $0x10] sm:$0xfc]  }
 0x239   : > { %10027 = vmatpush3.bf16.msra.mxu0 %v11048_v31  ;;  %v2597_v31 = vrot.slane %v10936_v55, 1  ;;  %v4349_v55 = vrot.slane %v10955_v49, 2  ;;  %v10978_v49 = vld [vmem:[#allocation2 + $0x60] sm:$0xff]  }
 0x23a   : > { %10028 = vmatprep.subr.bf16.mxu0 %v11049_v15 }
 0x23c   : > { %9993 = vmatmul.mubr.bf16.gmra.mrb[36].mxu0 %v2582_v17  ;;  %v2600_v17 = vsel %vm2573_vm14, %v2597_v31, %v2599_v20 }
 0x23d   : > { %9996 = vmatprep.mubr.bf16.mxu0 %v2584_v11  ;;  %10029 = vmatpush3.bf16.msra.mxu0 %v11049_v15  ;;  %v10941_v15 = vld [vmem:[#allocation2 + $0x70] sm:$0xff]   ;;  %v4334_v11 = vsel %vm4313_vm0, %v4331_v61, %v4333_v38 }
 0x23e   : > { %10145 = vmatmul.mubr.bf16.vlgmr.msra.gmra.mrb[16].mxu1 %v4318_v24  ;;  %10030 = vmatprep.subr.bf16.mxu0 %v11050_v5 }
 0x23f   : > { %10181 = vmatpush3.bf16.msra.mxu1 %v11862_v22  ;;  %10148 = vmatprep.mubr.bf16.mxu1 %v4320_v26  ;;  %v4322_v22 = vsel %vm4313_vm0, %v4319_v0, %v4321_v54  ;;  %v4335_v0 = vrot.slane %v10935_v63, 2  ;;  %v2601_v26 = vrot.slane %v10941_v15, 1 }
 0x240   : > { %10182 = vmatprep.subr.bf16.mxu1 %v10920_v6 }
 0x241   : > { %10031 = vmatpush3.bf16.msra.mxu0 %v11050_v5  ;;  %v4336_v24 = vsel %vm4313_vm0, %v4333_v38, %v4335_v0  ;;  %v4337_v5 = vrot.slane %v10939_v30, 2  ;;  %v2604_v54 = vsel %vm2573_vm14, %v2601_v26, %v2603_v62  ;;  %v10962_v38 = vld [vmem:[#allocation2 + $0x28] sm:$0xff]  }
 0x242   : > { %10032 = vmatprep.subr.bf16.mxu0 %v11051_v9 }
 0x243   : > { %10183 = vmatpush3.bf16.msra.mxu1 %v10920_v6  ;;  %v2598_v6 = vsel %vm2573_vm14, %v2595_v50, %v2597_v31  ;;  %v4340_v36 = vsel %vm4313_vm0, %v4337_v5, %v4339_v7  ;;  %v10961_v31 = vld [vmem:[#allocation2 + $0x20] sm:$0xff]  }
 0x244   : > { %9997 = vmatmul.mubr.bf16.gmra.mrb[40].mxu0 %v2586_v33  ;;  %10184 = vmatprep.subr.bf16.mxu1 %v10926_v12  ;;  %v10944_v33 = vld [vmem:[#allocation2 + $0x78] sm:$0xff]   ;;  %v4852_v15 = vrot.slane %v10961_v31, 2 }
 0x245   : > { %10000 = vmatprep.mubr.bf16.mxu0 %v2588_v18  ;;  %10033 = vmatpush3.bf16.msra.mxu0 %v11051_v9  ;;  %v4338_v9 = vsel %vm4313_vm0, %v4335_v0, %v4337_v5  ;;  %v10945_v18 = vld [vmem:[#allocation2 + $0x80] sm:$0xff]   ;;  %v4341_v46 = vrot.slane %v10944_v33, 2 }
 0x246   : > { %10149 = vmatmul.mubr.bf16.gmra.mrb[20].mxu1 %v4322_v22  ;;  %10034 = vmatprep.subr.bf16.mxu0 %v11052_v14  ;;  %v2607_v22 = vrot.slane %v10947_v10, 1 }
 0x247   : > { %10152 = vmatprep.mubr.bf16.mxu1 %v4324_v4  ;;  %10185 = vmatpush3.bf16.msra.mxu1 %v10926_v12  ;;  %v2602_v12 = vsel %vm2573_vm14, %v2599_v20, %v2601_v26  ;;  %v4343_v4 = vrot.slane %v10945_v18, 2  ;;  %v10974_v18 = vld [vmem:[#allocation2 + $0x50] sm:$0xff]  }
 0x248   : > { %10186 = vmatprep.subr.bf16.mxu1 %v10931_v19  ;;  %v3126_v29 = vrot.slane %v10974_v18, 1 }
 0x249   : > { %10035 = vmatpush3.bf16.msra.mxu0 %v11052_v14  ;;  %v4344_v35 = vsel %vm4313_vm0, %v4341_v46, %v4343_v4  ;;  %v4346_v45 = vsel %vm4313_vm0, %v4343_v4, %v4345_v34 }
 0x24a   : > { %10036 = vmatprep.subr.bf16.mxu0 %v11053_v3 }
 0x24b   : > { %10187 = vmatpush3.bf16.msra.mxu1 %v10931_v19  ;;  %v2605_v19 = vrot.slane %v10946_v2, 1 }
 0x24c   : > { %10001 = vmatmul.mubr.bf16.gmra.mrb[44].mxu0 %v2590_v32  ;;  %10188 = vmatprep.subr.bf16.mxu1 %v10937_v25  ;;  %v3110_v32 = vrot.slane %v10953_v23, 1 }
 0x24d   : > { %10004 = vmatprep.mubr.bf16.mxu0 %v2592_v39  ;;  %10037 = vmatpush3.bf16.msra.mxu0 %v11053_v3  ;;  %v2606_v13 = vsel %vm2573_vm14, %v2603_v62, %v2605_v19  ;;  %v2608_v14 = vsel %vm2573_vm14, %v2605_v19, %v2607_v22  ;;  %v10950_v3 = vld [vmem:[#allocation2 + $0x90] sm:$0xff]   ;;  %v3109_v39 = vrot.slane %v10952_v28, 1  ;;  %v10977_v19 = vld [vmem:[#allocation9 + $0x1d8] sm:$0xff]  }
 0x24e   : > { %10153 = vmatmul.mubr.bf16.gmra.mrb[24].mxu1 %v4326_v37  ;;  %10038 = vmatprep.subr.bf16.mxu0 %v11054_v43  ;;  %v10958_v37 = vld [vmem:[#allocation2 + $0x18] sm:$0xff]   ;;  %v10965_v62 = vld [vmem:[#allocation2 + $0x30] sm:$0xff]  }
 0x24f   : > { %10156 = vmatprep.mubr.bf16.mxu1 %v4328_v40  ;;  %10189 = vmatpush3.bf16.msra.mxu1 %v10937_v25  ;;  %v4342_v25 = vsel %vm4313_vm0, %v4339_v7, %v4341_v46  ;;  %v4347_v40 = vrot.slane %v10950_v3, 2  ;;  %v3111_v42 = vsel %vm2573_vm14, %v3109_v39, %v3110_v32  ;;  %v3112_v61 = vrot.slane %v10958_v37, 1  ;;  %v10967_v7 = vld [vmem:[#allocation2 + $0x38] sm:$0xff]   ;;  %v10973_v46 = vld [vmem:[#allocation2 + $0x48] sm:$0xff]  }
 0x250   : > { %10190 = vmatprep.subr.bf16.mxu1 %v10943_v21  ;;  %v4856_v10 = vrot.slane %v10965_v62, 2  ;;  %v10983_v3 = vld [vmem:[#allocation9 + $0x1e8] sm:$0xff]   ;;  %v10976_v39 = vld [vmem:[#allocation2 + $0x58] sm:$0xff]  }
 0x251   : > { %10039 = vmatpush3.bf16.msra.mxu0 %v11054_v43  ;;  %v10959_v43 = vld [vmem:[#allocation2 + $0x20] sm:$0xff]   ;;  %v4348_v50 = vsel %vm4313_vm0, %v4345_v34, %v4347_v40  ;;  %v3113_v57 = vsel %vm2573_vm14, %v3110_v32, %v3112_v61  ;;  %v4350_v63 = vsel %vm4313_vm0, %v4347_v40, %v4349_v55  ;;  %v10975_v34 = vld [vmem:[#allocation2 + $0x50] sm:$0xff]   ;;  %v4866_v40 = vrot.slane %v10976_v39, 2 }
 0x252   : > { %v4864_v37 = vrot.slane %v10975_v34, 2 }
 0x253   : > { %10191 = vmatpush3.bf16.msra.mxu1 %v10943_v21  ;;  %v2610_v21 = vsel %vm2573_vm14, %v2607_v22, %v2609_v27 }
 0x254   : > { %10005 = vmatmul.mubr.bf16.gmra.mrb[48].mxu0 %v2594_v53  ;;  %10192 = vmatprep.subr.bf16.mxu1 %v10948_v51  ;;  %v3114_v53 = vrot.slane %v10959_v43, 1  ;;  %v10989_v43 = vld [vmem:[#allocation9 + $0x1f8] sm:$0xff]  }
 0x255   : > { %10008 = vmatprep.mubr.bf16.mxu0 %v2596_v56 }
 0x256   : > { %10157 = vmatmul.mubr.bf16.gmra.mrb[28].mxu1 %v4330_v58  ;;  %v4849_v58 = vrot.slane %v10956_v52, 2  ;;  %v3115_v60 = vsel %vm2573_vm14, %v3112_v61, %v3114_v53  ;;  %v11948_v61 = vld [vmem:[#allocation9 + $0x200] sm:$0xff]   ;;  %v4868_v52 = vrot.slane %v10978_v49, 2 }
 0x257   : > { %10160 = vmatprep.mubr.bf16.mxu1 %v4332_v59  ;;  %10193 = vmatpush3.bf16.msra.mxu1 %v10948_v51  ;;  %v10957_v51 = vld [vmem:[#allocation2 + $0x18] sm:$0xff]   ;;  %v10964_v59 = vld [vmem:[#allocation2 + $0x30] sm:$0xff]   ;;  %v10999_v49 = vld [vmem:[#allocation2 + $0x40] sm:$0xff]  }
 0x258   : > { %10194 = vmatprep.subr.bf16.mxu1 %v10954_v47  ;;  %v4850_v56 = vrot.slane %v10957_v51, 2  ;;  %v10979_v51 = vld [vmem:[#allocation2 + $0x68] sm:$0xff]  }
 0x259   : > { %v4870_v48 = vrot.slane %v10979_v51, 2 }
 0x25a   : > { %v4851_v20 = vsel %vm4313_vm0, %v4849_v58, %v4850_v56  ;;  %v4853_v26 = vsel %vm4313_vm0, %v4850_v56, %v4852_v15  ;;  %v10982_v56 = vld [vmem:[#allocation2 + $0x78] sm:$0xff]  }
 0x25b   : > { %10195 = vmatpush3.bf16.msra.mxu1 %v10954_v47  ;;  %v10963_v47 = vld [vmem:[#allocation2 + $0x28] sm:$0xff]   ;;  %v4871_v55 = vsel %vm4313_vm0, %v4868_v52, %v4870_v48 }
 0x25c   : > { %10009 = vmatmul.mubr.bf16.gmra.mrb[52].mxu0 %v2598_v6  ;;  %10232 = vmatprep.subr.bf16.mxu1 %v11907_v8  ;;  %v3116_v0 = vrot.slane %v10963_v47, 1  ;;  %v3118_v6 = vrot.slane %v10964_v59, 1  ;;  %v4874_v47 = vrot.slane %v10982_v56, 2  ;;  %v5442_v56 = vshll.u32 %v10999_v49, 16 }
 0x25d   : > { %10012 = vmatprep.mubr.bf16.mxu0 %v2600_v17  ;;  %v4854_v17 = vrot.slane %v10962_v38, 2 }
 0x25e   : > { %10161 = vmatmul.mubr.bf16.gmra.mrb[32].mxu1 %v4334_v11  ;;  %v3117_v1 = vsel %vm2573_vm14, %v3114_v53, %v3116_v0  ;;  %v10968_v11 = vld [vmem:[#allocation2 + $0x38] sm:$0xff]   ;;  %v3119_v30 = vsel %vm2573_vm14, %v3116_v0, %v3118_v6  ;;  %v10981_v53 = vld [vmem:[#allocation2 + $0x70] sm:$0xff]  }
 0x25f   : > { %10164 = vmatprep.mubr.bf16.mxu1 %v4336_v24  ;;  %v10966_v24 = vld [vmem:[#allocation9 + $0x1c8] sm:$0xff]   ;;  %v4855_v5 = vsel %vm4313_vm0, %v4852_v15, %v4854_v17  ;;  %v3120_v2 = vrot.slane %v10968_v11, 1  ;;  %v4857_v22 = vsel %vm4313_vm0, %v4854_v17, %v4856_v10  ;;  %v10988_v15 = vld [vmem:[#allocation2 + $0x98] sm:$0xff]  }
 0x260   : > { %v10992_v17 = vld [vmem:[#allocation2 + $0x18] sm:$0xff]  }
 0x261   : > { %v3121_v33 = vsel %vm2573_vm14, %v3118_v6, %v3120_v2  ;;  %v10987_v6 = vld [vmem:[#allocation2 + $0x90] sm:$0xff]  }
 0x262   : > { %v4880_v11 = vrot.slane %v10987_v6, 2 }
 0x264   : > { %10013 = vmatmul.mubr.bf16.gmra.mrb[56].mxu0 %v2602_v12  ;;  %v3122_v12 = vrot.slane %v10969_v44, 1  ;;  %v5397_v44 = vshll.u32 %v10992_v17, 16 }
 0x265   : > { %10016 = vmatprep.mubr.bf16.mxu0 %v2604_v54  ;;  %v10972_v54 = vld [vmem:[#allocation9 + $0x1d0] sm:$0xff]  }
 0x266   : > { %10165 = vmatmul.mubr.bf16.gmra.mrb[0].mxu1 %v4338_v9  ;;  %v4858_v9 = vrot.slane %v10967_v7, 2  ;;  %v10990_v7 = vld [vmem:[#allocation2 + $0xa0] ss:$0 sps:$4 sm:$0x33]  }
 0x267   : > { %10168 = vmatprep.mubr.bf16.mxu1 %v4340_v36  ;;  %v3123_v36 = vsel %vm2573_vm14, %v3120_v2, %v3122_v12  ;;  %v10994_v2 = vld [vmem:[#allocation2 + $0x20] sm:$0xff]   ;;  %v4884_v18 = vrot.slane %v10990_v7, 2 }
 0x268   : > { %v4859_v4 = vsel %vm4313_vm0, %v4856_v10, %v4858_v9  ;;  %v5399_v10 = vrot.slane %v5397_v44, 3 }
 0x26c   : > { %10017 = vmatmul.mubr.bf16.gmra.mrb[60].mxu0 %v2606_v13  ;;  %v10971_v13 = vld [vmem:[#allocation2 + $0x48] sm:$0xff]  }
 0x26d   : > { %10020 = vmatprep.mubr.bf16.mxu0 %v2608_v14  ;;  %v10980_v14 = vld [vmem:[#allocation9 + $0x1e0] sm:$0xff]  }
 0x26e   : > { %10169 = vmatmul.mubr.bf16.gmra.mrb[4].mxu1 %v4342_v25  ;;  %v3124_v25 = vrot.slane %v10973_v46, 1 }
 0x26f   : > { %10172 = vmatprep.mubr.bf16.mxu1 %v4344_v35  ;;  %v4862_v35 = vrot.slane %v10971_v13, 2 }
 0x270   : > { %v3125_v16 = vsel %vm2573_vm14, %v3122_v12, %v3124_v25  ;;  %v3127_v28 = vsel %vm2573_vm14, %v3124_v25, %v3126_v29  ;;  %v10996_v25 = vld [vmem:[#allocation2 + $0x30] sm:$0xff]  }
 0x271   : > { %v5421_v34 = vshrl.u32 %v10996_v25, 16 }
 0x274   : > { %10021 = vmatmul.mubr.bf16.gmra.mrb[64].mxu0 %v2610_v21  ;;  %v10986_v21 = vld [vmem:[#allocation9 + $0x1f0] sm:$0xff]  }
 0x275   : > { %10040 = vmatprep.mubr.bf16.mxu0 %v3111_v42  ;;  %v3129_v42 = vsel %vm2573_vm14, %v3126_v29, %v3128_v41  ;;  %v4869_v41 = vsel %vm4313_vm0, %v4866_v40, %v4868_v52 }
 0x276   : > { %10173 = vmatmul.mubr.bf16.gmra.mrb[8].mxu1 %v4346_v45  ;;  %v4865_v45 = vsel %vm4313_vm0, %v4862_v35, %v4864_v37 }
 0x277   : > { %10176 = vmatprep.mubr.bf16.mxu1 %v4348_v50  ;;  %v4867_v50 = vsel %vm4313_vm0, %v4864_v37, %v4866_v40  ;;  %v10997_v40 = vld [vmem:[#allocation9 + $0x208] sm:$0xff]  }
 0x27c   : > { %10041 = vmatmul.mubr.bf16.vlgmr.msra.gmra.mrb[32].mxu0 %v3113_v57  ;;  %v4872_v57 = vrot.slane %v10981_v53, 2 }
 0x27d   : > { %10044 = vmatprep.mubr.bf16.mxu0 %v3115_v60  ;;  %v10984_v60 = vld [vmem:[#allocation2 + $0x80] sm:$0xff]  }
 0x27e   : > { %10177 = vmatmul.mubr.bf16.gmra.mrb[12].mxu1 %v4350_v63  ;;  %v4873_v58 = vsel %vm4313_vm0, %v4870_v48, %v4872_v57  ;;  %v4875_v59 = vsel %vm4313_vm0, %v4872_v57, %v4874_v47  ;;  %v10985_v63 = vld [vmem:[#allocation2 + $0x88] sm:$0xff]   ;;  %v4876_v31 = vrot.slane %v10984_v60, 2  ;;  %v11004_v60 = vld [vmem:[#allocation9 + $0x218] sm:$0xff]  }
 0x27f   : > { %10196 = vmatprep.mubr.bf16.mxu1 %v4851_v20  ;;  %v4878_v20 = vrot.slane %v10985_v63, 2  ;;  %v11000_v48 = vld [vmem:[#allocation2 + $0x48] sm:$0xff]  }
 0x280   : > { %v4877_v38 = vsel %vm4313_vm0, %v4874_v47, %v4876_v31  ;;  %v5448_v47 = vshrl.u32 %v11000_v48, 16 }
 0x281   : > { %v4879_v0 = vsel %vm4313_vm0, %v4876_v31, %v4878_v20  ;;  %v5444_v31 = vrot.slane %v5442_v56, 3 }
 0x284   : > { %10045 = vmatmul.mubr.bf16.gmra.mrb[36].mxu0 %v3117_v1  ;;  %v10991_v1 = vld [vmem:[#allocation2 + $0x10] sm:$0xfc]  }
 0x285   : > { %10048 = vmatprep.mubr.bf16.mxu0 %v3119_v30  ;;  %v4882_v30 = vrot.slane %v10988_v15, 2  ;;  %v5389_v62 = vshll.u32 %v10991_v1, 16  ;;  %v11007_v15 = vld [vmem:[#allocation9 + $0x220] sm:$0xff]  }
 0x286   : > { %10197 = vmatmul.mubr.bf16.vlgmr.msra.gmra.mrb[16].mxu1 %v4853_v26  ;;  %v5386_v26 = vshrl.u32 %v10991_v1, 16 }
 0x287   : > { %10233 = vmatpush3.bf16.msra.mxu1 %v11907_v8  ;;  %10200 = vmatprep.mubr.bf16.mxu1 %v4855_v5  ;;  %v10970_v8 = vld [vmem:[#allocation2 + $0x40] sm:$0xff]   ;;  %v4881_v5 = vsel %vm4313_vm0, %v4878_v20, %v4880_v11  ;;  %v4883_v12 = vsel %vm4313_vm0, %v4880_v11, %v4882_v30  ;;  %v4885_v29 = vsel %vm4313_vm0, %v4882_v30, %v4884_v18  ;;  %v11002_v20 = vld [vmem:[#allocation2 + $0x50] sm:$0xff]  }
 0x288   : > { %10234 = vmatprep.subr.bf16.mxu1 %v10966_v24  ;;  %v4860_v23 = vrot.slane %v10970_v8, 2  ;;  %v5457_v1 = vshrl.u32 %v11002_v20, 16  ;;  %v5460_v11 = vshll.u32 %v11002_v20, 16 }
 0x28a   : > { %v4861_v32 = vsel %vm4313_vm0, %v4858_v9, %v4860_v23  ;;  %v4863_v27 = vsel %vm4313_vm0, %v4860_v23, %v4862_v35  ;;  %v10995_v9 = vld [vmem:[#allocation2 + $0x28] sm:$0xff]   ;;  %v5462_v7 = vrot.slane %v5460_v11, 3 }
 0x28b   : > { %10235 = vmatpush3.bf16.msra.mxu1 %v10966_v24  ;;  %v5394_v24 = vshrl.u32 %v10992_v17, 16  ;;  %v5412_v46 = vshrl.u32 %v10995_v9, 16 }
 0x28c   : > { %10049 = vmatmul.mubr.bf16.gmra.mrb[40].mxu0 %v3121_v33  ;;  %10236 = vmatprep.subr.bf16.mxu1 %v10972_v54  ;;  %v5388_v33 = vrot.slane %v5386_v26, 2  ;;  %v11010_v26 = vld [vmem:[#allocation9 + $0x228] sm:$0xff]  }
 0x28d   : > { %10052 = vmatprep.mubr.bf16.mxu0 %v3123_v36  ;;  %v5391_v36 = vrot.slane %v5389_v62, 3  ;;  %v5414_v35 = vrot.slane %v5412_v46, 2 }
 0x28e   : > { %10201 = vmatmul.mubr.bf16.gmra.mrb[20].mxu1 %v4857_v22  ;;  %v5406_v22 = vshll.u32 %v10994_v2, 16 }
 0x28f   : > { %10204 = vmatprep.mubr.bf16.mxu1 %v4859_v4  ;;  %10237 = vmatpush3.bf16.msra.mxu1 %v10972_v54  ;;  %v5396_v54 = vrot.slane %v5394_v24, 2  ;;  %v5415_v4 = vshll.u32 %v10995_v9, 16  ;;  %v5392_v13 = vor.u32 %v5391_v36, %v5388_v33  ;;  %v11006_v9 = vld [vmem:[#allocation2 + $0x68] sm:$0xff]   ;;  %v11013_v33 = vld [vmem:[#allocation9 + $0x230] sm:$0xff]  }
 0x290   : > { %10238 = vmatprep.subr.bf16.mxu1 %v10977_v19  ;;  %v5408_v23 = vrot.slane %v5406_v22, 3  ;;  %v5487_v46 = vshll.u32 %v11006_v9, 16 }
 0x291   : > { %v5400_v8 = vor.u32 %v5399_v10, %v5396_v54 }
 0x293   : > { %10239 = vmatpush3.bf16.msra.mxu1 %v10977_v19  ;;  %v5403_v19 = vshrl.u32 %v10994_v2, 16  ;;  %v11005_v2 = vld [vmem:[#allocation2 + $0x60] sm:$0xff]  }
 0x294   : > { %10053 = vmatmul.mubr.bf16.gmra.mrb[44].mxu0 %v3125_v16  ;;  %10240 = vmatprep.subr.bf16.mxu1 %v10980_v14  ;;  %v5401_v16 = vsel %vm5384_vm2, %v5392_v13, %v5400_v8  ;;  %v5475_v18 = vshrl.u32 %v11005_v2, 16 }
 0x295   : > { %10056 = vmatprep.mubr.bf16.mxu0 %v3127_v28  ;;  %v5417_v28 = vrot.slane %v5415_v4, 3  ;;  %v11016_v4 = vld [vmem:[#allocation9 + $0x238] sm:$0xff]  }
 0x296   : > { %10205 = vmatmul.mubr.bf16.gmra.mrb[24].mxu1 %v4861_v32 }
 0x297   : > { %10208 = vmatprep.mubr.bf16.mxu1 %v4863_v27  ;;  %10241 = vmatpush3.bf16.msra.mxu1 %v10980_v14  ;;  %v5405_v14 = vrot.slane %v5403_v19, 2  ;;  %v5424_v27 = vshll.u32 %v10996_v25, 16  ;;  %v5418_v39 = vor.u32 %v5417_v28, %v5414_v35  ;;  %v5478_v19 = vshll.u32 %v11005_v2, 16  ;;  %v11009_v28 = vld [vmem:[#allocation2 + $0x78] sm:$0xff]  }
 0x298   : > { %10242 = vmatprep.subr.bf16.mxu1 %v10983_v3  ;;  %v5489_v35 = vrot.slane %v5487_v46, 3 }
 0x299   : > { %v5409_v32 = vor.u32 %v5408_v23, %v5405_v14  ;;  %v5480_v14 = vrot.slane %v5478_v19, 3  ;;  %v11008_v23 = vld [vmem:[#allocation2 + $0x70] sm:$0xff]  }
 0x29a   : > { %v11018_v19 = vld [vmem:[#allocation2 + $0x10] sm:$0xf8]  }
 0x29b   : > { %10243 = vmatpush3.bf16.msra.mxu1 %v10983_v3  ;;  %v10998_v3 = vld [vmem:[#allocation2 + $0x38] sm:$0xff]   ;;  %v6054_v46 = vrot.slane %v11018_v19, 3 }
 0x29c   : > { %10057 = vmatmul.mubr.bf16.gmra.mrb[48].mxu0 %v3129_v42  ;;  %10244 = vmatprep.subr.bf16.mxu1 %v10986_v21  ;;  %v5433_v37 = vshll.u32 %v10998_v3, 16  ;;  %v5410_v42 = vsel %vm5384_vm2, %v5400_v8, %v5409_v32  ;;  %v5484_v8 = vshrl.u32 %v11006_v9, 16 }
 0x29e   : > { %10209 = vmatmul.mubr.bf16.gmra.mrb[28].mxu1 %v4865_v45  ;;  %v5426_v45 = vrot.slane %v5424_v27, 3  ;;  %v5435_v52 = vrot.slane %v5433_v37, 3 }
 0x29f   : > { %10212 = vmatprep.mubr.bf16.mxu1 %v4867_v50  ;;  %10245 = vmatpush3.bf16.msra.mxu1 %v10986_v21  ;;  %v5430_v21 = vshrl.u32 %v10998_v3, 16  ;;  %v5419_v50 = vsel %vm5384_vm2, %v5409_v32, %v5418_v39  ;;  %v5493_v32 = vshrl.u32 %v11008_v23, 16 }
 0x2a0   : > { %10246 = vmatprep.subr.bf16.mxu1 %v10989_v43 }
 0x2a1   : > { %v5432_v51 = vrot.slane %v5430_v21, 2  ;;  %v5505_v21 = vshll.u32 %v11009_v28, 16 }
 0x2a3   : > { %10247 = vmatpush3.bf16.msra.mxu1 %v10989_v43  ;;  %v5423_v43 = vrot.slane %v5421_v34, 2  ;;  %v5436_v57 = vor.u32 %v5435_v52, %v5432_v51  ;;  %v5496_v34 = vshll.u32 %v11008_v23, 16  ;;  %v11012_v51 = vld [vmem:[#allocation2 + $0x88] sm:$0xff]  }
 0x2a4   : > { %10284 = vmatprep.subr.bf16.mxu1 %v11948_v61  ;;  %v5523_v56 = vshll.u32 %v11012_v51, 16 }
 0x2a5   : > { %v5427_v53 = vor.u32 %v5426_v45, %v5423_v43  ;;  %v11011_v43 = vld [vmem:[#allocation2 + $0x80] sm:$0xff]  }
 0x2a6   : > { %10213 = vmatmul.mubr.bf16.gmra.mrb[32].mxu1 %v4869_v41  ;;  %v11001_v41 = vld [vmem:[#allocation9 + $0x210] sm:$0xff]   ;;  %v5525_v20 = vrot.slane %v5523_v56, 3 }
 0x2a7   : > { %10216 = vmatprep.mubr.bf16.mxu1 %v4871_v55  ;;  %v5439_v55 = vshrl.u32 %v10999_v49, 16 }
 0x2a9   : > { %v5441_v63 = vrot.slane %v5439_v55, 2  ;;  %v5520_v55 = vshrl.u32 %v11012_v51, 16 }
 0x2ab   : > { %v5445_v17 = vor.u32 %v5444_v31, %v5441_v63  ;;  %v5522_v31 = vrot.slane %v5520_v55, 2  ;;  %v11029_v55 = vld [vmem:[#allocation2 + $0x68] sm:$0xff]  }
 0x2ad   : > { %v5446_v62 = vsel %vm5384_vm2, %v5436_v57, %v5445_v17 }
 0x2ae   : > { %10217 = vmatmul.mubr.bf16.gmra.mrb[0].mxu1 %v4873_v58  ;;  %v5451_v58 = vshll.u32 %v11000_v48, 16  ;;  %v5511_v48 = vshrl.u32 %v11011_v43, 16 }
 0x2af   : > { %10220 = vmatprep.mubr.bf16.mxu1 %v4875_v59  ;;  %v5428_v59 = vsel %vm5384_vm2, %v5418_v39, %v5427_v53  ;;  %v5502_v39 = vshrl.u32 %v11009_v28, 16 }
 0x2b0   : > { %v5453_v6 = vrot.slane %v5451_v58, 3  ;;  %v5513_v58 = vrot.slane %v5511_v48, 2 }
 0x2b1   : > { %v5504_v49 = vrot.slane %v5502_v39, 2  ;;  %v11024_v39 = vld [vmem:[#allocation2 + $0x40] sm:$0xff]  }
 0x2b6   : > { %10221 = vmatmul.mubr.bf16.gmra.mrb[4].mxu1 %v4877_v38  ;;  %v11003_v38 = vld [vmem:[#allocation2 + $0x58] sm:$0xff]  }
 0x2b7   : > { %10224 = vmatprep.mubr.bf16.mxu1 %v4879_v0  ;;  %v5450_v0 = vrot.slane %v5448_v47, 2  ;;  %v5466_v30 = vshrl.u32 %v11003_v38, 16  ;;  %v5469_v24 = vshll.u32 %v11003_v38, 16 }
 0x2b9   : > { %v5454_v44 = vor.u32 %v5453_v6, %v5450_v0  ;;  %v5468_v54 = vrot.slane %v5466_v30, 2  ;;  %v5471_v10 = vrot.slane %v5469_v24, 3  ;;  %v5526_v6 = vor.u32 %v5525_v20, %v5522_v31  ;;  %v11017_v24 = vld [vmem:[#allocation2 + $0xa0] ss:$0 sps:$4 sm:$0x77]   ;;  %v11030_v31 = vld [vmem:[#allocation2 + $0x70] sm:$0xff]  }
 0x2ba   : > { %v5550_v2 = vshll.u32 %v11017_v24, 16 }
 0x2bb   : > { %v5472_v22 = vor.u32 %v5471_v10, %v5468_v54 }
 0x2be   : > { %10225 = vmatmul.mubr.bf16.gmra.mrb[8].mxu1 %v4881_v5  ;;  %v5459_v5 = vrot.slane %v5457_v1, 2 }
 0x2bf   : > { %10228 = vmatprep.mubr.bf16.mxu1 %v4883_v12  ;;  %v5455_v12 = vsel %vm5384_vm2, %v5445_v17, %v5454_v44 }
 0x2c0   : > { %v5463_v36 = vor.u32 %v5462_v7, %v5459_v5  ;;  %v5547_v7 = vshrl.u32 %v11017_v24, 16 }
 0x2c2   : > { %v5464_v13 = vsel %vm5384_vm2, %v5454_v44, %v5463_v36  ;;  %v5473_v25 = vsel %vm5384_vm2, %v5463_v36, %v5472_v22  ;;  %v5549_v9 = vrot.slane %v5547_v7, 2 }
 0x2c6   : > { %10229 = vmatmul.mubr.bf16.gmra.mrb[12].mxu1 %v4885_v29  ;;  %v5477_v29 = vrot.slane %v5475_v18, 2  ;;  %v11019_v18 = vld [vmem:[#allocation2 + $0x18] sm:$0xff]  }
 0x2c7   : > { %10248 = vmatprep.mubr.bf16.mxu1 %v5401_v16  ;;  %v5486_v16 = vrot.slane %v5484_v8, 2  ;;  %v6055_v8 = vrot.slane %v11019_v18, 3 }
 0x2c8   : > { %v5481_v3 = vor.u32 %v5480_v14, %v5477_v29  ;;  %v11021_v14 = vld [vmem:[#allocation2 + $0x28] sm:$0xff]  }
 0x2c9   : > { %v5490_v27 = vor.u32 %v5489_v35, %v5486_v16  ;;  %v6056_v29 = vsel %vm6053_vm8, %v6054_v46, %v6055_v8  ;;  %v11022_v35 = vld [vmem:[#allocation2 + $0x30] sm:$0xff]  }
 0x2ca   : > { %v5482_v37 = vsel %vm5384_vm2, %v5472_v22, %v5481_v3 }
 0x2cb   : > { %v5491_v45 = vsel %vm5384_vm2, %v5481_v3, %v5490_v27  ;;  %v11023_v3 = vld [vmem:[#allocation2 + $0x38] sm:$0xff]  }
 0x2ce   : > { %10249 = vmatmul.mubr.bf16.vlgmr.msra.gmra.mrb[16].mxu1 %v5410_v42  ;;  %v5498_v42 = vrot.slane %v5496_v34, 3  ;;  %v6063_v34 = vrot.slane %v11023_v3, 3 }
 0x2cf   : > { %10285 = vmatpush3.bf16.msra.mxu1 %v11948_v61  ;;  %10252 = vmatprep.mubr.bf16.mxu1 %v5419_v50  ;;  %v5437_v61 = vsel %vm5384_vm2, %v5427_v53, %v5436_v57  ;;  %v5507_v50 = vrot.slane %v5505_v21, 3  ;;  %v11037_v57 = vld [vmem:[#allocation10] sm:$0xff]  }
 0x2d0   : > { %10286 = vmatprep.subr.bf16.mxu1 %v10997_v40  ;;  %10336 = vmatprep.subr.bf16.mxu0 %v11037_v57 }
 0x2d1   : > { %v5508_v53 = vor.u32 %v5507_v50, %v5504_v49  ;;  %10337 = vmatpush3.bf16.msra.mxu0 %v11037_v57  ;;  %v11027_v50 = vld [vmem:[#allocation2 + $0x58] sm:$0xff]  }
 0x2d3   : > { %10287 = vmatpush3.bf16.msra.mxu1 %v10997_v40  ;;  %v5495_v40 = vrot.slane %v5493_v32, 2  ;;  %v6061_v32 = vrot.slane %v11022_v35, 3 }
 0x2d4   : > { %10288 = vmatprep.subr.bf16.mxu1 %v11001_v41 }
 0x2d5   : > { %v5499_v52 = vor.u32 %v5498_v42, %v5495_v40  ;;  %v6064_v21 = vsel %vm6053_vm8, %v6061_v32, %v6063_v34  ;;  %v6065_v40 = vrot.slane %v11024_v39, 3 }
 0x2d6   : > { %10253 = vmatmul.mubr.bf16.gmra.mrb[20].mxu1 %v5428_v59  ;;  %v11014_v59 = vld [vmem:[#allocation2 + $0x90] sm:$0xff]  }
 0x2d7   : > { %10256 = vmatprep.mubr.bf16.mxu1 %v5437_v61  ;;  %10289 = vmatpush3.bf16.msra.mxu1 %v11001_v41  ;;  %v5514_v41 = vshll.u32 %v11011_v43, 16  ;;  %v5500_v47 = vsel %vm5384_vm2, %v5490_v27, %v5499_v52  ;;  %v5509_v63 = vsel %vm5384_vm2, %v5499_v52, %v5508_v53  ;;  %v11015_v61 = vld [vmem:[#allocation2 + $0x98] sm:$0xff]   ;;  %v5529_v0 = vshrl.u32 %v11014_v59, 16 }
 0x2d8   : > { %10290 = vmatprep.subr.bf16.mxu1 %v11004_v60  ;;  %v5538_v17 = vshrl.u32 %v11015_v61, 16  ;;  %v5541_v1 = vshll.u32 %v11015_v61, 16  ;;  %v6066_v43 = vsel %vm6053_vm8, %v6063_v34, %v6065_v40  ;;  %v6071_v52 = vrot.slane %v11027_v50, 3  ;;  %v11031_v61 = vld [vmem:[#allocation2 + $0x78] sm:$0xff]  }
 0x2d9   : > { %v5531_v30 = vrot.slane %v5529_v0, 2 }
 0x2da   : > { %v5543_v5 = vrot.slane %v5541_v1, 3  ;;  %v6079_v1 = vrot.slane %v11031_v61, 3 }
 0x2db   : > { %10291 = vmatpush3.bf16.msra.mxu1 %v11004_v60  ;;  %v5516_v60 = vrot.slane %v5514_v41, 3  ;;  %v11028_v41 = vld [vmem:[#allocation2 + $0x60] sm:$0xff]  }
 0x2dc   : > { %10292 = vmatprep.subr.bf16.mxu1 %v11007_v15 }
 0x2dd   : > { %v5517_v38 = vor.u32 %v5516_v60, %v5513_v58  ;;  %v6073_v58 = vrot.slane %v11028_v41, 3  ;;  %v11038_v41 = vld [vmem:[#allocation10 + $0x8] sm:$0xff]  }
 0x2de   : > { %10257 = vmatmul.mubr.bf16.gmra.mrb[24].mxu1 %v5446_v62  ;;  %v5540_v62 = vrot.slane %v5538_v17, 2  ;;  %10338 = vmatprep.subr.bf16.mxu0 %v11038_v41 }
 0x2df   : > { %10260 = vmatprep.mubr.bf16.mxu1 %v5455_v12  ;;  %10293 = vmatpush3.bf16.msra.mxu1 %v11007_v15  ;;  %v5532_v15 = vshll.u32 %v11014_v59, 16  ;;  %v5518_v11 = vsel %vm5384_vm2, %v5508_v53, %v5517_v38  ;;  %v5527_v44 = vsel %vm5384_vm2, %v5517_v38, %v5526_v6  ;;  %v6075_v59 = vrot.slane %v11029_v55, 3  ;;  %v11040_v55 = vld [vmem:[#allocation10 + $0x18] sm:$0xff]  }
 0x2e0   : > { %10294 = vmatprep.subr.bf16.mxu1 %v11010_v26  ;;  %v5544_v54 = vor.u32 %v5543_v5, %v5540_v62  ;;  %10339 = vmatpush3.bf16.msra.mxu0 %v11038_v41 }
 0x2e1   : > { %v6076_v20 = vsel %vm6053_vm8, %v6073_v58, %v6075_v59 }
 0x2e3   : > { %10295 = vmatpush3.bf16.msra.mxu1 %v11010_v26  ;;  %v5534_v26 = vrot.slane %v5532_v15, 3  ;;  %v6077_v15 = vrot.slane %v11030_v31, 3  ;;  %v11044_v31 = vld [vmem:[#allocation10 + $0x38] sm:$0xff]  }
 0x2e4   : > { %10296 = vmatprep.subr.bf16.mxu1 %v11013_v33 }
 0x2e5   : > { %v5535_v12 = vor.u32 %v5534_v26, %v5531_v30  ;;  %v11032_v30 = vld [vmem:[#allocation2 + $0x80] sm:$0xff]   ;;  %v6080_v24 = vsel %vm6053_vm8, %v6077_v15, %v6079_v1 }
 0x2e6   : > { %10261 = vmatmul.mubr.bf16.gmra.mrb[28].mxu1 %v5464_v13  ;;  %v11020_v13 = vld [vmem:[#allocation2 + $0x20] sm:$0xff]   ;;  %v6081_v7 = vrot.slane %v11032_v30, 3 }
 0x2e7   : > { %10264 = vmatprep.mubr.bf16.mxu1 %v5473_v25  ;;  %10297 = vmatpush3.bf16.msra.mxu1 %v11013_v33  ;;  %v5536_v10 = vsel %vm5384_vm2, %v5526_v6, %v5535_v12  ;;  %v5552_v33 = vrot.slane %v5550_v2, 3  ;;  %v5545_v36 = vsel %vm5384_vm2, %v5535_v12, %v5544_v54  ;;  %v6057_v23 = vrot.slane %v11020_v13, 3  ;;  %v11036_v13 = vld [vmem:[#allocation2 + $0xa0] ss:$0 sps:$4 sm:$0x77]  }
 0x2e8   : > { %10298 = vmatprep.subr.bf16.mxu1 %v11016_v4  ;;  %v6059_v25 = vrot.slane %v11021_v14, 3 }
 0x2e9   : > { %v5553_v22 = vor.u32 %v5552_v33, %v5549_v9  ;;  %v6058_v16 = vsel %vm6053_vm8, %v6055_v8, %v6057_v23  ;;  %v11034_v9 = vld [vmem:[#allocation2 + $0x90] sm:$0xff]   ;;  %v11035_v33 = vld [vmem:[#allocation2 + $0x98] sm:$0xff]  }
 0x2ea   : > { %v6060_v28 = vsel %vm6053_vm8, %v6057_v23, %v6059_v25  ;;  %v6062_v27 = vsel %vm6053_vm8, %v6059_v25, %v6061_v32  ;;  %v6087_v46 = vrot.slane %v11035_v33, 3 }
 0x2eb   : > { %10299 = vmatpush3.bf16.msra.mxu1 %v11016_v4  ;;  %v5554_v4 = vsel %vm5384_vm2, %v5544_v54, %v5553_v22  ;;  %v6082_v54 = vsel %vm6053_vm8, %v6079_v1, %v6081_v7  ;;  %v6085_v22 = vrot.slane %v11034_v9, 3 }
 0x2ee   : > { %10265 = vmatmul.mubr.bf16.gmra.mrb[32].mxu1 %v5482_v37  ;;  %v11025_v37 = vld [vmem:[#allocation2 + $0x48] sm:$0xff]  }
 0x2ef   : > { %10268 = vmatprep.mubr.bf16.mxu1 %v5491_v45  ;;  %v6067_v42 = vrot.slane %v11025_v37, 3  ;;  %v11026_v45 = vld [vmem:[#allocation2 + $0x50] sm:$0xff]  }
 0x2f0   : > { %v6069_v51 = vrot.slane %v11026_v45, 3 }
 0x2f1   : > { %v6068_v49 = vsel %vm6053_vm8, %v6065_v40, %v6067_v42 }
 0x2f2   : > { %v6070_v48 = vsel %vm6053_vm8, %v6067_v42, %v6069_v51  ;;  %v6072_v53 = vsel %vm6053_vm8, %v6069_v51, %v6071_v52 }
 0x2f6   : > { %10269 = vmatmul.mubr.bf16.gmra.mrb[0].mxu1 %v5500_v47 }
 0x2f7   : > { %10272 = vmatprep.mubr.bf16.mxu1 %v5509_v63  ;;  %v6074_v63 = vsel %vm6053_vm8, %v6071_v52, %v6073_v58  ;;  %v11041_v58 = vld [vmem:[#allocation10 + $0x20] sm:$0xff]  }
 0x2fe   : > { %10273 = vmatmul.mubr.bf16.gmra.mrb[4].mxu1 %v5518_v11  ;;  %v6078_v11 = vsel %vm6053_vm8, %v6075_v59, %v6077_v15  ;;  %v11042_v59 = vld [vmem:[#allocation10 + $0x28] sm:$0xff]   ;;  %v6597_v15 = vlaneseq }
 0x2ff   : > { %10276 = vmatprep.mubr.bf16.mxu1 %v5527_v44  ;;  %v11033_v44 = vld [vmem:[#allocation2 + $0x88] sm:$0xff]  }
 0x300   : > { %v6083_v12 = vrot.slane %v11033_v44, 3  ;;  %v6598_v9 = vshrl.u32 %v6597_v15, 7 }
 0x306   : > { %10277 = vmatmul.mubr.bf16.gmra.mrb[8].mxu1 %v5536_v10  ;;  %v6084_v10 = vsel %vm6053_vm8, %v6081_v7, %v6083_v12 }
 0x307   : > { %10280 = vmatprep.mubr.bf16.mxu1 %v5545_v36 }
 0x30e   : > { %10281 = vmatmul.mubr.bf16.gmra.mrb[12].mxu1 %v5554_v4  ;;  %v6086_v4 = vsel %vm6053_vm8, %v6083_v12, %v6085_v22 }
 0x30f   : > { %10300 = vmatprep.mubr.bf16.mxu1 %v6056_v29  ;;  %v6088_v29 = vsel %vm6053_vm8, %v6085_v22, %v6087_v46 }
 0x316   : > { %10301 = vmatmul.mubr.bf16.vlgmr.msra.gmra.mrb[16].mxu1 %v6058_v16  ;;  %v6089_v16 = vrot.slane %v11036_v13, 3 }
 0x317   : > { %10304 = vmatprep.mubr.bf16.mxu1 %v6060_v28 }
 0x318   : > { %v6090_v28 = vsel %vm6053_vm8, %v6087_v46, %v6089_v16 }
 0x31e   : > { %10305 = vmatmul.mubr.bf16.gmra.mrb[20].mxu1 %v6062_v27 }
 0x31f   : > { %10308 = vmatprep.mubr.bf16.mxu1 %v6064_v21 }
 0x326   : > { %10309 = vmatmul.mubr.bf16.gmra.mrb[24].mxu1 %v6066_v43 }
 0x327   : > { %10312 = vmatprep.mubr.bf16.mxu1 %v6068_v49 }
 0x32e   : > { %10313 = vmatmul.mubr.bf16.gmra.mrb[28].mxu1 %v6070_v48 }
 0x32f   : > { %10316 = vmatprep.mubr.bf16.mxu1 %v6072_v53  ;;  %v11988_v56 = vpop.f32.mrb[52].mxu0  ;;  %v11039_v53 = vld [vmem:[#allocation10 + $0x10] sm:$0xff]  }
 0x330   : > { %v11990_v57 = vpop.f32.mrb[53].mxu0  ;;  %10340 = vmatprep.subr.bf16.mxu0 %v11039_v53 }
 0x331   : > { %v11992_v47 = vpop.f32.mrb[54].mxu0  ;;  %10341 = vmatpush3.bf16.msra.mxu0 %v11039_v53 }
 0x332   : > { %v11994_v60 = vpop.f32.mrb[55].mxu0  ;;  %10342 = vmatprep.subr.bf16.mxu0 %v11040_v55 }
 0x335   : > { %10343 = vmatpush3.bf16.msra.mxu0 %v11040_v55 }
 0x336   : > { %10317 = vmatmul.mubr.bf16.gmra.mrb[32].mxu1 %v6074_v63  ;;  %10344 = vmatprep.subr.bf16.mxu0 %v11041_v58  ;;  %v11043_v63 = vld [vmem:[#allocation10 + $0x30] sm:$0xff]  }
 0x337   : > { %10320 = vmatprep.mubr.bf16.mxu1 %v6076_v20  ;;  %v11998_v38 = vpop.f32.mrb[56].mxu0  ;;  %v11252_v20 = vmov 1966171168  }
 0x338   : > { %v12000_v0 = vpop.f32.mrb[57].mxu0  ;;  %v6595_v61 = vunpack.c.l.s4 %v11252_v20 }
 0x339   : > { %v12002_v6 = vpop.f32.mrb[58].mxu0  ;;  %10345 = vmatpush3.bf16.msra.mxu0 %v11041_v58 }
 0x33a   : > { %v12004_v17 = vpop.f32.mrb[59].mxu0  ;;  %10346 = vmatprep.subr.bf16.mxu0 %v11042_v59 }
 0x33d   : > { %10347 = vmatpush3.bf16.msra.mxu0 %v11042_v59 }
 0x33e   : > { %10321 = vmatmul.mubr.bf16.gmra.mrb[0].mxu1 %v6078_v11  ;;  %10348 = vmatprep.subr.bf16.mxu0 %v11043_v63  ;;  %v12064_v11 = vld [vmem:[%s12918_s4] ss:$0 sm:$0xff] }
 0x33f   : > { %10324 = vmatprep.mubr.bf16.mxu1 %v6080_v24  ;;  %v12008_v26 = vpop.f32.mrb[60].mxu0 }
 0x340   : > { %v12010_v62 = vpop.f32.mrb[61].mxu0 }
 0x341   : > { %v12012_v5 = vpop.f32.mrb[62].mxu0  ;;  %10349 = vmatpush3.bf16.msra.mxu0 %v11043_v63 }
 0x342   : > { %v12014_v2 = vpop.f32.mrb[63].mxu0  ;;  %10350 = vmatprep.subr.bf16.mxu0 %v11044_v31 }
 0x343   : > { %12971 = vst [vmem:[#allocation18_spill] sm:$0xff] %v12014_v2 }
 0x345   : > { %10351 = vmatpush3.bf16.msra.mxu0 %v11044_v31 }
 0x346   : > { %10325 = vmatmul.mubr.bf16.gmra.mrb[4].mxu1 %v6082_v54 }
 0x347   : > { %10328 = vmatprep.mubr.bf16.mxu1 %v6084_v10  ;;  %v12018_v36 = vpop.f32.mrb[64].mxu0  ;;  %v6596_v10 = vunpack.c.0.s8 %v6595_v61 }
 0x348   : > { %12972 = vst [vmem:[#allocation19_spill] sm:$0xff] %v12018_v36  ;;  %v12020_v18 = vpop.f32.mrb[65].mxu0 }
 0x349   : > { %12973 = vst [vmem:[#allocation20_spill] sm:$0xff] %v12020_v18  ;;  %v12022_v19 = vpop.f32.mrb[66].mxu0 }
 0x34a   : > { %12974 = vst [vmem:[#allocation21_spill] sm:$0xff] %v12022_v19  ;;  %v12024_v8 = vpop.f32.mrb[67].mxu0 }
 0x34b   : > { %12975 = vst [vmem:[#allocation22_spill] sm:$0xff] %v12024_v8 }
 0x34e   : > { %10329 = vmatmul.mubr.bf16.gmra.mrb[8].mxu1 %v6086_v4 }
 0x34f   : > { %10332 = vmatprep.mubr.bf16.mxu1 %v6088_v29  ;;  %v10042_v14 = vpop.f32.mrb[32].mxu0 }
 0x350   : > { %v3246_v23 = vpop.f32.mrb[33].mxu0 }
 0x351   : > { %v10043_v25 = vpop.f32.mrb[34].mxu0 }
 0x352   : > { %v3249_v35 = vpop.f32.mrb[35].mxu0 }
 0x356   : > { %10333 = vmatmul.mubr.bf16.gmra.mrb[12].mxu1 %v6090_v28  ;;  %v12070_v28 = vsub.s32 %v6596_v10, %v6598_v9 }
 0x357   : > { %v12029_v3 = vpop.f32.mrb[36].mxu0 }
 0x358   : > { %v12031_v32 = vpop.f32.mrb[37].mxu0 }
 0x359   : > { %v12033_v34 = vpop.f32.mrb[38].mxu0 }
 0x35a   : > { %v12035_v27 = vpop.f32.mrb[39].mxu0 }
 0x35f   : > { %v12037_v39 = vpop.f32.mrb[40].mxu0 }
 0x360   : > { %v12039_v21 = vpop.f32.mrb[41].mxu0 }
 0x361   : > { %v12041_v37 = vpop.f32.mrb[42].mxu0 }
 0x362   : > { %v12043_v40 = vpop.f32.mrb[43].mxu0 }
 0x367   : > { %v12045_v42 = vpop.f32.mrb[44].mxu0 }
 0x368   : > { %v12047_v43 = vpop.f32.mrb[45].mxu0 }
 0x369   : > { %v12049_v45 = vpop.f32.mrb[46].mxu0 }
 0x36a   : > { %v12051_v49 = vpop.f32.mrb[47].mxu0 }
 0x36f   : > { %v12053_v50 = vpop.f32.mrb[48].mxu0 }
 0x370   : > { %v12055_v51 = vpop.f32.mrb[49].mxu0 }
 0x371   : > { %v12057_v52 = vpop.f32.mrb[50].mxu0 }
 0x372   : > { %v12059_v48 = vpop.f32.mrb[51].mxu0 }
 0x3e9   : > { %v10302_v1 = vpop.f32.mrb[16].mxu1 }
 0x3ea   : > { %v10400_v30 = vadd.f32 %v10302_v1, %v10042_v14  ;;  %v6191_v24 = vpop.f32.mrb[17].mxu1 }
 0x3eb   : > { %v10401_v44 = vadd.f32 %v6191_v24, %v3246_v23  ;;  %v10303_v7 = vpop.f32.mrb[18].mxu1 }
 0x3ec   : > { %v6487_v12 = vadd.f32 %v10400_v30, %v12064_v11  ;;  %v10402_v54 = vadd.f32 %v10303_v7, %v10043_v25  ;;  %v6194_v33 = vpop.f32.mrb[19].mxu1 }
 0x3ed   : > { %v6485_v22 = vadd.f32 %v10401_v44, %v12064_v11  ;;  %v10403_v46 = vadd.f32 %v6194_v33, %v3249_v35 }
 0x3ee   : > { %v6488_v4 = vadd.f32 %v10402_v54, %v12064_v11  ;;  %v6523_v29 = vmax.f32 %v6487_v12, 0.0 }
 0x3ef   : > { %v6486_v13 = vadd.f32 %v10403_v46, %v12064_v11  ;;  %v6521_v14 = vmax.f32 %v6485_v22, 0.0 }
 0x3f0   : > { %v6524_v16 = vmax.f32 %v6488_v4, 0.0 }
 0x3f1   : > { %v6522_v23 = vmax.f32 %v6486_v13, 0.0  ;;  %v10306_v41 = vpop.f32.mrb[20].mxu1 }
 0x3f2   : > { %v6558_v53 = vpack.c.bf16 %v6524_v16, %v6523_v29  ;;  %v9219_v55 = vpack.c.bf16 %v6524_v16, %v6524_v16  ;;  %v10404_v25 = vadd.f32 %v10306_v41, %v12029_v3  ;;  %v6207_v58 = vpop.f32.mrb[21].mxu1 }
 0x3f3   : > { %v6557_v59 = vpack.c.bf16 %v6522_v23, %v6521_v14  ;;  %v9218_v63 = vpack.c.bf16 %v6522_v23, %v6522_v23  ;;  %v10405_v35 = vadd.f32 %v6207_v58, %v12031_v32  ;;  %v10307_v31 = vpop.f32.mrb[22].mxu1 }
 0x3f4   : > { %v6649_v20 = vrot.slane %v6558_v53, %v12070_v28  ;;  %v6656_v61 = vrot.slane %v9219_v55, %v12070_v28  ;;  %v6491_v15 = vadd.f32 %v10404_v25, %v12064_v11  ;;  %v10406_v1 = vadd.f32 %v10307_v31, %v12033_v34  ;;  %v6210_v30 = vpop.f32.mrb[23].mxu1 }
 0x3f5   : > { %v6600_v24 = vrot.slane %v6557_v59, %v12070_v28  ;;  %v6607_v44 = vrot.slane %v9218_v63, %v12070_v28  ;;  %v6489_v3 = vadd.f32 %v10405_v35, %v12064_v11  ;;  %v10407_v7 = vadd.f32 %v6210_v30, %v12035_v27 }
 0x3f6   : > { %v6657_v12 = vcombine.high %v6649_v20, %v6649_v20  ;;  %v6658_v32 = vcombine.high %v6656_v61, %v6656_v61  ;;  %v6665_v54 = vrot.slane %v6649_v20, %v12070_v28  ;;  %v6672_v10 = vrot.slane %v6656_v61, %v12070_v28 }
 0x3f7   : > { %v6608_v9 = vcombine.high %v6600_v24, %v6600_v24  ;;  %v6609_v33 = vcombine.high %v6607_v44, %v6607_v44  ;;  %v12085_v22 = vrot.slane %v6600_v24, %v12070_v28  ;;  %v12088_v34 = vrot.slane %v6607_v44, %v12070_v28 }
 0x3f8   : > { %v6679_v46 = vrot.slane %v6657_v12, %v12070_v28  ;;  %v12092_v4 = vrot.slane %v6658_v32, %v12070_v28  ;;  %v6687_v27 = vcombine.high %v6665_v54, %v6665_v54  ;;  %v6688_v13 = vcombine.high %v6672_v10, %v6672_v10 }
 0x3f9   : > { %v12095_v29 = vrot.slane %v6608_v9, %v12070_v28  ;;  %v12098_v16 = vrot.slane %v6609_v33, %v12070_v28  ;;  %v6527_v14 = vmax.f32 %v6491_v15, 0.0  ;;  %v6525_v23 = vmax.f32 %v6489_v3, 0.0  ;;  %v10310_v41 = vpop.f32.mrb[24].mxu1 }
 0x3fa   : > { %v6689_v53 = vcombine.high %v6679_v46, %v6679_v46  ;;  %v7539_v55 = vcombine.low %v6679_v46, %v6687_v27  ;;  %v12101_v25 = vcombine.low %v12092_v4, %v6688_v13  ;;  %v6492_v58 = vadd.f32 %v10406_v1, %v12064_v11  ;;  %v6223_v59 = vpop.f32.mrb[25].mxu1 }
 0x3fb   : > { %v10311_v61 = vpop.f32.mrb[26].mxu1  ;;  %v6490_v3 = vadd.f32 %v10407_v7, %v12064_v11  ;;  %v6690_v12 = vcombine.high %v12092_v4, %v12092_v4  ;;  %v10408_v32 = vadd.f32 %v10310_v41, %v12037_v39  ;;  %v10409_v54 = vadd.f32 %v6223_v59, %v12039_v21 }
 0x3fc   : > { %v7540_v15 = vcombine.low %v6689_v53, %v6672_v10  ;;  %v7549_v30 = vrot.slane %v7539_v55, %v12070_v28  ;;  %v7563_v1 = vrot.slane %v12101_v25, %v12070_v28  ;;  %v6528_v24 = vmax.f32 %v6492_v58, 0.0  ;;  %v6226_v44 = vpop.f32.mrb[27].mxu1 }
 0x3fd   : > { %v10410_v46 = vadd.f32 %v10311_v61, %v12041_v37  ;;  %v6526_v27 = vmax.f32 %v6490_v3, 0.0  ;;  %v6495_v13 = vadd.f32 %v10408_v32, %v12064_v11  ;;  %v6493_v53 = vadd.f32 %v10409_v54, %v12064_v11 }
 0x3fe   : > { %v7556_v9 = vrot.slane %v7540_v15, %v12070_v28  ;;  %v6560_v33 = vpack.c.bf16 %v6528_v24, %v6527_v14  ;;  %v9221_v10 = vpack.c.bf16 %v6528_v24, %v6528_v24  ;;  %v10411_v7 = vadd.f32 %v6226_v44, %v12043_v40 }
 0x3ff   : > { %v6496_v21 = vadd.f32 %v10410_v46, %v12064_v11  ;;  %v6559_v41 = vpack.c.bf16 %v6526_v27, %v6525_v23  ;;  %v9220_v14 = vpack.c.bf16 %v6526_v27, %v6526_v27  ;;  %v6531_v58 = vmax.f32 %v6495_v13, 0.0 }
 0x400   : > { %v12125_v55 = vcombine.low %v7549_v30, %v7556_v9  ;;  %v6747_v4 = vrot.slane %v6560_v33, %v12070_v28  ;;  %v6754_v39 = vrot.slane %v9221_v10, %v12070_v28  ;;  %v6529_v59 = vmax.f32 %v6493_v53, 0.0 }
 0x401   : > { %v10314_v37 = vpop.f32.mrb[28].mxu1  ;;  %v6698_v30 = vrot.slane %v6559_v41, %v12070_v28  ;;  %v6705_v44 = vrot.slane %v9220_v14, %v12070_v28  ;;  %v6532_v32 = vmax.f32 %v6496_v21, 0.0  ;;  %v6494_v54 = vadd.f32 %v10411_v7, %v12064_v11 }
 0x402   : > { %v6755_v61 = vcombine.high %v6747_v4, %v6747_v4  ;;  %v6756_v15 = vcombine.high %v6754_v39, %v6754_v39  ;;  %v6763_v24 = vrot.slane %v6747_v4, %v12070_v28  ;;  %v12132_v3 = vrot.slane %v6754_v39, %v12070_v28  ;;  %v6239_v40 = vpop.f32.mrb[29].mxu1 }
 0x403   : > { %v10315_v23 = vpop.f32.mrb[30].mxu1  ;;  %v10412_v46 = vadd.f32 %v10314_v37, %v12045_v42  ;;  %v6706_v13 = vcombine.high %v6698_v30, %v6698_v30  ;;  %v6707_v53 = vcombine.high %v6705_v44, %v6705_v44  ;;  %v12145_v4 = vrot.slane %v6698_v30, %v12070_v28 }
 0x404   : > { %v6777_v9 = vrot.slane %v6755_v61, %v12070_v28  ;;  %v12139_v33 = vrot.slane %v6756_v15, %v12070_v28  ;;  %v6242_v27 = vpop.f32.mrb[31].mxu1  ;;  %v12148_v39 = vrot.slane %v6705_v44, %v12070_v28  ;;  %v6562_v41 = vpack.c.bf16 %v6532_v32, %v6531_v58 }
 0x405   : > { %v9223_v14 = vpack.c.bf16 %v6532_v32, %v6532_v32  ;;  %v12153_v61 = vrot.slane %v6706_v13, %v12070_v28  ;;  %v12156_v15 = vrot.slane %v6707_v53, %v12070_v28  ;;  %v7542_v42 = vcombine.low %v6690_v12, %v12145_v4 }
 0x406   : > { %v6786_v7 = vcombine.high %v6777_v9, %v6777_v9  ;;  %v12150_v21 = vcombine.low %v6763_v24, %v6777_v9  ;;  %v6530_v37 = vmax.f32 %v6494_v54, 0.0  ;;  %v6843_v44 = vrot.slane %v6562_v41, %v12070_v28 }
 0x407   : > { %v6850_v10 = vrot.slane %v9223_v14, %v12070_v28  ;;  %v6787_v58 = vcombine.high %v12139_v33, %v12139_v33  ;;  %v7570_v24 = vrot.slane %v7542_v42, %v12070_v28  ;;  %v6499_v9 = vadd.f32 %v10412_v46, %v12064_v11 }
 0x408   : > { %v12160_v30 = vcombine.low %v6786_v7, %v12132_v3  ;;  %v6851_v13 = vcombine.high %v6843_v44, %v6843_v44  ;;  %v12174_v7 = vrot.slane %v6843_v44, %v12070_v28  ;;  %v6561_v32 = vpack.c.bf16 %v6530_v37, %v6529_v59 }
 0x409   : > { %v10318_v54 = vpop.f32.mrb[32].mxu1  ;;  %v6852_v53 = vcombine.high %v6850_v10, %v6850_v10  ;;  %v6866_v41 = vrot.slane %v6850_v10, %v12070_v28  ;;  %v12180_v42 = vcombine.low %v7563_v1, %v7570_v24  ;;  %v9222_v20 = vpack.c.bf16 %v6530_v37, %v6530_v37 }
 0x40a   : > { %v6255_v14 = vpop.f32.mrb[33].mxu1  ;;  %v12184_v12 = vrot.slane %v6851_v13, %v12070_v28  ;;  %v10413_v10 = vadd.f32 %v6239_v40, %v12047_v43  ;;  %v6795_v25 = vrot.slane %v6561_v32, %v12070_v28  ;;  %v6535_v59 = vmax.f32 %v6499_v9, 0.0 }
 0x40b   : > { %v10319_v31 = vpop.f32.mrb[34].mxu1  ;;  %v12187_v35 = vrot.slane %v6852_v53, %v12070_v28  ;;  %v6882_v44 = vcombine.high %v6866_v41, %v6866_v41  ;;  %v6802_v1 = vrot.slane %v9222_v20, %v12070_v28  ;;  %v10414_v37 = vadd.f32 %v10315_v23, %v12049_v45 }
 0x40c   : > { %v12190_v63 = vpop.f32.mrb[35].mxu1  ;;  %v6497_v43 = vadd.f32 %v10413_v10, %v12064_v11  ;;  %v6803_v40 = vcombine.high %v6795_v25, %v6795_v25  ;;  %v12204_v32 = vrot.slane %v6795_v25, %v12070_v28  ;;  %v10415_v9 = vadd.f32 %v6242_v27, %v12051_v49 }
 0x40d   : > { %v12200_v13 = vcombine.low %v12187_v35, %v6882_v44  ;;  %v6804_v53 = vcombine.high %v6802_v1, %v6802_v1  ;;  %v12207_v20 = vrot.slane %v6802_v1, %v12070_v28  ;;  %v6500_v23 = vadd.f32 %v10414_v37, %v12064_v11 }
 0x40e   : > { %v6533_v45 = vmax.f32 %v6497_v43, 0.0  ;;  %v6884_v41 = vcombine.high %v12187_v35, %v12187_v35  ;;  %v12214_v44 = vrot.slane %v6803_v40, %v12070_v28  ;;  %v12222_v1 = vcombine.low %v6787_v58, %v12204_v32 }
 0x40f   : > { %v12217_v10 = vrot.slane %v6804_v53, %v12070_v28  ;;  %v6536_v37 = vmax.f32 %v6500_v23, 0.0  ;;  %v6498_v49 = vadd.f32 %v10415_v9, %v12064_v11  ;;  %v12976_v35 = vcombine.low %v12085_v22, %v12095_v29 }
 0x410   : > { %v12977_v40 = vcombine.high %v12085_v22, %v12095_v29  ;;  %v12978_v9 = vcombine.low %v12088_v34, %v12098_v16  ;;  %v10416_v23 = vadd.f32 %v10318_v54, %v12053_v50  ;;  %v10417_v36 = vadd.f32 %v6255_v14, %v12055_v51 }
 0x411   : > { %v12224_v43 = vpop.f32.mrb[0].mxu1  ;;  %v7500_v27 = vrot.slane %v12976_v35, %v12070_v28  ;;  %v12979_v35 = vcombine.high %v12088_v34, %v12098_v16  ;;  %v6564_v29 = vpack.c.bf16 %v6536_v37, %v6535_v59  ;;  %v6534_v8 = vmax.f32 %v6498_v49, 0.0 }
 0x412   : > { %v7507_v53 = vrot.slane %v12977_v40, %v12070_v28  ;;  %v12235_v24 = vpop.f32.mrb[1].mxu1  ;;  %v7514_v46 = vrot.slane %v12978_v9, %v12070_v28  ;;  %v9225_v40 = vpack.c.bf16 %v6536_v37, %v6536_v37  ;;  %v10418_v9 = vadd.f32 %v10319_v31, %v12057_v52 }
 0x413   : > { %v7521_v25 = vrot.slane %v12979_v35, %v12070_v28  ;;  %v12249_v22 = vpop.f32.mrb[2].mxu1  ;;  %v6941_v2 = vrot.slane %v6564_v29, %v12070_v28  ;;  %v6563_v16 = vpack.c.bf16 %v6534_v8, %v6533_v45  ;;  %v9224_v35 = vpack.c.bf16 %v6534_v8, %v6534_v8 }
 0x414   : > { %v7522_v19 = vcombine.low %v7500_v27, %v7507_v53  ;;  %v12251_v58 = vpop.f32.mrb[3].mxu1  ;;  %v6948_v34 = vrot.slane %v9225_v40, %v12070_v28  ;;  %v6503_v49 = vadd.f32 %v10416_v23, %v12064_v11 }
 0x415   : > { %v7523_v18 = vcombine.low %v7514_v46, %v7521_v25  ;;  %v12262_v46 = vadd.f32 %v10417_v36, %v12064_v11  ;;  %v6949_v50 = vcombine.high %v6941_v2, %v6941_v2  ;;  %v12265_v51 = vrot.slane %v6941_v2, %v12070_v28 }
 0x416   : > { %v7530_v59 = vrot.slane %v7522_v19, %v12070_v28  ;;  %v6950_v54 = vcombine.high %v6948_v34, %v6948_v34  ;;  %v6964_v52 = vrot.slane %v6948_v34, %v12070_v28  ;;  %v6892_v31 = vrot.slane %v6563_v16, %v12070_v28 }
 0x417   : > { %v7537_v37 = vrot.slane %v7523_v18, %v12070_v28  ;;  %v6899_v8 = vrot.slane %v9224_v35, %v12070_v28  ;;  %v6539_v19 = vmax.f32 %v6503_v49, 0.0  ;;  %v12273_v18 = vrot.slane %v6949_v50, %v12070_v28 }
 0x418   : > { %v12276_v36 = vrot.slane %v6950_v54, %v12070_v28  ;;  %v6537_v25 = vmax.f32 %v12262_v46, 0.0  ;;  %v6504_v2 = vadd.f32 %v10418_v9, %v12064_v11  ;;  %v6900_v53 = vcombine.high %v6892_v31, %v6892_v31 }
 0x419   : > { %v7538_v14 = vcombine.low %v7530_v59, %v7537_v37  ;;  %v12270_v45 = vpop.f32.mrb[4].mxu1  ;;  %v6901_v23 = vcombine.high %v6899_v8, %v6899_v8  ;;  %v12283_v29 = vrot.slane %v6892_v31, %v12070_v28  ;;  %v12286_v40 = vrot.slane %v6899_v8, %v12070_v28 }
 0x41a   : > { %v12280_v27 = vpop.f32.mrb[5].mxu1  ;;  %v12295_v9 = vcombine.low %v6964_v52, %v12276_v36  ;;  %v6540_v59 = vmax.f32 %v6504_v2, 0.0  ;;  %v12300_v49 = vrot.slane %v6900_v53, %v12070_v28  ;;  %v7579_v52 = vrot.slane %v12125_v55, %v12070_v28 }
 0x41b   : > { %10352 = vmatprep.mubr.bf16.mxu0 %v7538_v14  ;;  %v12288_v34 = vpop.f32.mrb[6].mxu1  ;;  %v12303_v46 = vrot.slane %v6901_v23, %v12070_v28  ;;  %v12308_v54 = vcombine.low %v6884_v41, %v12283_v29  ;;  %v7586_v14 = vrot.slane %v12180_v42, %v12070_v28  ;;  %v10419_v23 = vadd.f32 %v12190_v63, %v12059_v48 }
 0x41c   : > { %v12297_v37 = vpop.f32.mrb[7].mxu1  ;;  %v6566_v31 = vpack.c.bf16 %v6540_v59, %v6539_v19  ;;  %v9227_v8 = vpack.c.bf16 %v6540_v59, %v6540_v59  ;;  %v6932_v2 = vcombine.high %v12300_v49, %v12300_v49  ;;  %v6981_v41 = vcombine.high %v12276_v36, %v12276_v36 }
 0x41d   : > { %v7587_v55 = vcombine.low %v7579_v52, %v7586_v14  ;;  %v12980_v42 = vcombine.high %v12145_v4, %v12153_v61  ;;  %v6502_v53 = vadd.f32 %v10419_v23, %v12064_v11  ;;  %v12981_v48 = vcombine.low %v12148_v39, %v12156_v15 }
 0x41e   : > { %v7037_v19 = vrot.slane %v6566_v31, %v12070_v28  ;;  %v7044_v59 = vrot.slane %v9227_v8, %v12070_v28  ;;  %v12329_v16 = vcombine.low %v6932_v2, %v12286_v40  ;;  %v12982_v36 = vcombine.high %v12148_v39, %v12156_v15 }
 0x41f   : > { %v7598_v35 = vrot.slane %v12980_v42, %v12070_v28  ;;  %v7605_v63 = vrot.slane %v12981_v48, %v12070_v28  ;;  %10353 = vmatmul.mubr.bf16.vlgmr.msra.gmra.mrb[68].mxu0 %v7587_v55  ;;  %v6538_v23 = vmax.f32 %v6502_v53, 0.0  ;;  %v7619_v42 = vrot.slane %v12150_v21, %v12070_v28 }
 0x420   : > { %v7612_v31 = vrot.slane %v12982_v36, %v12070_v28  ;;  %v7045_v52 = vcombine.high %v7037_v19, %v7037_v19  ;;  %v7046_v4 = vcombine.high %v7044_v59, %v7044_v59  ;;  %v12343_v61 = vrot.slane %v7037_v19, %v12070_v28 }
 0x421   : > { %v12340_v8 = vpop.f32.mrb[8].mxu1  ;;  %v12346_v14 = vrot.slane %v7044_v59, %v12070_v28  ;;  %v7620_v48 = vcombine.low %v7598_v35, %v7605_v63  ;;  %v10420_v39 = vadd.f32 %v12224_v43, %v11988_v56  ;;  %v10421_v59 = vadd.f32 %v12235_v24, %v11990_v57 }
 0x422   : > { %v12348_v2 = vpop.f32.mrb[9].mxu1  ;;  %v12357_v36 = vrot.slane %v7045_v52, %v12070_v28  ;;  %v12360_v19 = vrot.slane %v7046_v4, %v12070_v28  ;;  %v10422_v53 = vadd.f32 %v12249_v22, %v11992_v47  ;;  %v6565_v21 = vpack.c.bf16 %v6538_v23, %v6537_v25 }
 0x423   : > { %v12354_v15 = vpop.f32.mrb[10].mxu1  ;;  %v9226_v35 = vpack.c.bf16 %v6538_v23, %v6538_v23  ;;  %v7621_v63 = vcombine.low %v7612_v31, %v7619_v42  ;;  %v7628_v56 = vrot.slane %v7620_v48, %v12070_v28  ;;  %v6507_v25 = vadd.f32 %v10420_v39, %v12064_v11 }
 0x424   : > { %v12366_v55 = vpop.f32.mrb[11].mxu1  ;;  %v6989_v47 = vrot.slane %v6565_v21, %v12070_v28  ;;  %v6505_v31 = vadd.f32 %v10421_v59, %v12064_v11  ;;  %v6508_v23 = vadd.f32 %v10422_v53, %v12064_v11  ;;  %v10423_v42 = vadd.f32 %v12251_v58, %v11994_v60 }
 0x425   : > { %v6996_v24 = vrot.slane %v9226_v35, %v12070_v28  ;;  %v7635_v22 = vrot.slane %v7621_v63, %v12070_v28  ;;  %v12983_v48 = vcombine.high %v12132_v3, %v12132_v3  ;;  %v6543_v53 = vmax.f32 %v6507_v25, 0.0 }
 0x426   : > { %v6997_v4 = vcombine.high %v6989_v47, %v6989_v47  ;;  %v12390_v35 = vrot.slane %v6989_v47, %v12070_v28  ;;  %v6541_v52 = vmax.f32 %v6505_v31, 0.0  ;;  %v6544_v43 = vmax.f32 %v6508_v23, 0.0 }
 0x427   : > { %v7638_v57 = vcombine.low %v12139_v33, %v12983_v48  ;;  %v6998_v21 = vcombine.high %v6996_v24, %v6996_v24  ;;  %v12393_v63 = vrot.slane %v6996_v24, %v12070_v28  ;;  %v7636_v59 = vcombine.low %v7628_v56, %v7635_v22 }
 0x428   : > { %v12400_v3 = vrot.slane %v6997_v4, %v12070_v28  ;;  %v12412_v56 = vcombine.low %v6981_v41, %v12390_v35  ;;  %v6568_v22 = vpack.c.bf16 %v6544_v43, %v6543_v53  ;;  %v9229_v25 = vpack.c.bf16 %v6544_v43, %v6544_v43 }
 0x429   : > { %v12395_v39 = vpop.f32.mrb[12].mxu1  ;;  %v12403_v33 = vrot.slane %v6998_v21, %v12070_v28  ;;  %10356 = vmatprep.mubr.bf16.mxu0 %v7636_v59  ;;  %v6506_v4 = vadd.f32 %v10423_v42, %v12064_v11  ;;  %v12985_v48 = vcombine.high %v12204_v32, %v12204_v32  ;;  %v7647_v47 = vrot.slane %v12160_v30, %v12070_v28 }
 0x42a   : > { %v12397_v60 = vpop.f32.mrb[13].mxu1  ;;  %v7029_v23 = vcombine.high %v12400_v3, %v12400_v3  ;;  %v7654_v41 = vrot.slane %v7638_v57, %v12070_v28  ;;  %v7135_v59 = vrot.slane %v6568_v22, %v12070_v28  ;;  %v7142_v43 = vrot.slane %v9229_v25, %v12070_v28 }
 0x42b   : > { %v12409_v24 = vpop.f32.mrb[14].mxu1  ;;  %v7640_v21 = vcombine.low %v12214_v44, %v12985_v48  ;;  %v6542_v42 = vmax.f32 %v6506_v4, 0.0  ;;  %v7661_v53 = vrot.slane %v12222_v1, %v12070_v28  ;;  %v12986_v30 = vcombine.low %v12207_v20, %v12217_v10 }
 0x42c   : > { %v12415_v31 = vpop.f32.mrb[15].mxu1  ;;  %v12431_v58 = vcombine.low %v7029_v23, %v12393_v63  ;;  %v7669_v50 = vcombine.low %v7647_v47, %v7654_v41  ;;  %v7143_v57 = vcombine.high %v7135_v59, %v7135_v59  ;;  %v7144_v48 = vcombine.high %v7142_v43, %v7142_v43 }
 0x42d   : > { %12984 = vst [vmem:[#allocation23_spill] sm:$0xff] %v12415_v31  ;;  %v7668_v32 = vrot.slane %v7640_v21, %v12070_v28  ;;  %v7696_v44 = vrot.slane %v12986_v30, %v12070_v28  ;;  %v12439_v22 = vrot.slane %v7135_v59, %v12070_v28  ;;  %v12442_v25 = vrot.slane %v7142_v43, %v12070_v28 }
 0x42e   : > { %v6567_v1 = vpack.c.bf16 %v6542_v42, %v6541_v52  ;;  %v9228_v4 = vpack.c.bf16 %v6542_v42, %v6542_v42  ;;  %v7677_v31 = vrot.slane %v7669_v50, %v12070_v28  ;;  %v12446_v47 = vrot.slane %v7143_v57, %v12070_v28 }
 0x42f   : > { %v7670_v23 = vcombine.low %v7661_v53, %v7668_v32  ;;  %v12449_v21 = vrot.slane %v7144_v48, %v12070_v28  ;;  %v12987_v41 = vcombine.high %v12207_v20, %v12217_v10  ;;  %v12988_v43 = vcombine.low %v12174_v7, %v12184_v12 }
 0x430   : > { %v7086_v42 = vrot.slane %v6567_v1, %v12070_v28  ;;  %v7093_v50 = vrot.slane %v9228_v4, %v12070_v28  ;;  %v12989_v32 = vcombine.high %v12174_v7, %v12184_v12 }
 0x431   : > { %v7703_v59 = vrot.slane %v12987_v41, %v12070_v28  ;;  %v7710_v52 = vrot.slane %v12988_v43, %v12070_v28  ;;  %v7684_v53 = vrot.slane %v7670_v23, %v12070_v28  ;;  %v9248_v57 = vcombine.high %v12442_v25, %v12449_v21 }
 0x432   : > { %v7717_v30 = vrot.slane %v12989_v32, %v12070_v28  ;;  %v7094_v1 = vcombine.high %v7086_v42, %v7086_v42  ;;  %v7095_v41 = vcombine.high %v7093_v50, %v7093_v50  ;;  %v7102_v4 = vrot.slane %v7086_v42, %v12070_v28 }
 0x433   : > { %v7718_v48 = vcombine.low %v7696_v44, %v7703_v59  ;;  %v12474_v23 = vrot.slane %v7093_v50, %v12070_v28  ;;  %v7685_v43 = vcombine.low %v7677_v31, %v7684_v53  ;;  %v10424_v32 = vadd.f32 %v12270_v45, %v11998_v38 }
 0x434   : > { %v7719_v12 = vcombine.low %v7710_v52, %v7717_v30  ;;  %v7116_v10 = vrot.slane %v7094_v1, %v12070_v28  ;;  %v12481_v20 = vrot.slane %v7095_v41, %v12070_v28  ;;  %v7124_v44 = vcombine.high %v7102_v4, %v7102_v4 }
 0x435   : > { %v7726_v7 = vrot.slane %v7718_v48, %v12070_v28  ;;  %v7125_v59 = vcombine.high %v12474_v23, %v12474_v23  ;;  %10357 = vmatmul.mubr.bf16.gmra.mrb[72].mxu0 %v7685_v43  ;;  %v6511_v31 = vadd.f32 %v10424_v32, %v12064_v11  ;;  %v10425_v52 = vadd.f32 %v12280_v27, %v12000_v0 }
 0x436   : > { %v7733_v42 = vrot.slane %v7719_v12, %v12070_v28  ;;  %v10426_v38 = vadd.f32 %v12288_v34, %v12002_v6  ;;  %v7126_v45 = vcombine.high %v7116_v10, %v7116_v10  ;;  %v7127_v50 = vcombine.high %v12481_v20, %v12481_v20 }
 0x437   : > { %v12493_v53 = vcombine.low %v7116_v10, %v7124_v44  ;;  %v10427_v30 = vadd.f32 %v12297_v37, %v12004_v17  ;;  %v6547_v1 = vmax.f32 %v6511_v31, 0.0  ;;  %v6509_v41 = vadd.f32 %v10425_v52, %v12064_v11 }
 0x438   : > { %v7734_v48 = vcombine.low %v7726_v7, %v7733_v42  ;;  %v6512_v4 = vadd.f32 %v10426_v38, %v12064_v11  ;;  %v12500_v0 = vcombine.low %v7126_v45, %v12474_v23  ;;  %v12990_v27 = vcombine.high %v12283_v29, %v12283_v29 }
 0x439   : > { %v6510_v6 = vadd.f32 %v10427_v30, %v12064_v11  ;;  %v7745_v10 = vrot.slane %v12200_v13, %v12070_v28  ;;  %v6545_v17 = vmax.f32 %v6509_v41, 0.0  ;;  %v7752_v43 = vrot.slane %v12308_v54, %v12070_v28 }
 0x43a   : > { %v7737_v34 = vcombine.low %v12300_v49, %v12990_v27  ;;  %10360 = vmatprep.mubr.bf16.mxu0 %v7734_v48  ;;  %v6548_v37 = vmax.f32 %v6512_v4, 0.0  ;;  %v7766_v12 = vrot.slane %v12329_v16, %v12070_v28  ;;  %v12991_v29 = vcombine.high %v12286_v40, %v12303_v46 }
 0x43b   : > { %v6546_v7 = vmax.f32 %v6510_v6, 0.0  ;;  %v12992_v13 = vcombine.low %v12265_v51, %v12273_v18  ;;  %v7767_v52 = vcombine.low %v7745_v10, %v7752_v43  ;;  %v12993_v16 = vcombine.high %v12265_v51, %v12273_v18 }
 0x43c   : > { %v7759_v32 = vrot.slane %v7737_v34, %v12070_v28  ;;  %v7794_v49 = vrot.slane %v12991_v29, %v12070_v28  ;;  %v6570_v42 = vpack.c.bf16 %v6548_v37, %v6547_v1  ;;  %v9231_v31 = vpack.c.bf16 %v6548_v37, %v6548_v37 }
 0x43d   : > { %v7801_v44 = vrot.slane %v12992_v13, %v12070_v28  ;;  %v7808_v54 = vrot.slane %v12993_v16, %v12070_v28  ;;  %v6569_v38 = vpack.c.bf16 %v6546_v7, %v6545_v17  ;;  %v9230_v45 = vpack.c.bf16 %v6546_v7, %v6546_v7 }
 0x43e   : > { %v7768_v30 = vcombine.low %v7759_v32, %v7766_v12  ;;  %v7815_v40 = vrot.slane %v12295_v9, %v12070_v28  ;;  %v7232_v46 = vrot.slane %v6570_v42, %v12070_v28  ;;  %v7239_v48 = vrot.slane %v9231_v31, %v12070_v28 }
 0x43f   : > { %v7775_v41 = vrot.slane %v7767_v52, %v12070_v28  ;;  %v7816_v1 = vcombine.low %v7794_v49, %v7801_v44  ;;  %v7184_v4 = vrot.slane %v6569_v38, %v12070_v28  ;;  %v7191_v6 = vrot.slane %v9230_v45, %v12070_v28 }
 0x440   : > { %v7782_v51 = vrot.slane %v7768_v30, %v12070_v28  ;;  %v7817_v18 = vcombine.low %v7808_v54, %v7815_v40  ;;  %v7240_v27 = vcombine.high %v7232_v46, %v7232_v46  ;;  %v7241_v34 = vcombine.high %v7239_v48, %v7239_v48 }
 0x441   : > { %v12535_v10 = vrot.slane %v7232_v46, %v12070_v28  ;;  %v12538_v9 = vrot.slane %v7239_v48, %v12070_v28  ;;  %v7192_v17 = vcombine.high %v7184_v4, %v7184_v4  ;;  %v7193_v37 = vcombine.high %v7191_v6, %v7191_v6 }
 0x442   : > { %v7200_v43 = vrot.slane %v7184_v4, %v12070_v28  ;;  %v12542_v12 = vrot.slane %v7191_v6, %v12070_v28  ;;  %v12545_v7 = vrot.slane %v7240_v27, %v12070_v28  ;;  %v12548_v32 = vrot.slane %v7241_v34, %v12070_v28  ;;  %v12994_v4 = vld [vmem:[#allocation18_spill] sm:$0xff] }
 0x443   : > { %v7270_v29 = vcombine.high %v12535_v10, %v12535_v10  ;;  %v7783_v49 = vcombine.low %v7775_v41, %v7782_v51  ;;  %v7214_v13 = vrot.slane %v7192_v17, %v12070_v28  ;;  %v12554_v44 = vrot.slane %v7193_v37, %v12070_v28 }
 0x444   : > { %v7222_v42 = vcombine.high %v12542_v12, %v12542_v12  ;;  %v7824_v31 = vrot.slane %v7816_v1, %v12070_v28  ;;  %v8078_v52 = vcombine.low %v12538_v9, %v12548_v32  ;;  %v9249_v16 = vcombine.high %v12538_v9, %v12548_v32 }
 0x445   : > { %10361 = vmatmul.mubr.bf16.gmra.mrb[76].mxu0 %v7783_v49  ;;  %v7831_v54 = vrot.slane %v7817_v18, %v12070_v28  ;;  %v10428_v38 = vadd.f32 %v12340_v8, %v12008_v26  ;;  %v7223_v45 = vcombine.high %v7214_v13, %v7214_v13  ;;  %v7224_v30 = vcombine.high %v12554_v44, %v12554_v44 }
 0x446   : > { %v12568_v40 = vcombine.low %v7200_v43, %v7214_v13  ;;  %v10429_v46 = vadd.f32 %v12348_v2, %v12010_v62  ;;  %v10430_v1 = vadd.f32 %v12354_v15, %v12012_v5  ;;  %v10431_v6 = vadd.f32 %v12366_v55, %v12994_v4 }
 0x447   : > { %v7832_v48 = vcombine.low %v7824_v31, %v7831_v54  ;;  %v6515_v41 = vadd.f32 %v10428_v38, %v12064_v11  ;;  %v12578_v26 = vcombine.low %v7223_v45, %v12542_v12  ;;  %v12995_v51 = vcombine.high %v12390_v35, %v12390_v35 }
 0x448   : > { %v6513_v8 = vadd.f32 %v10429_v46, %v12064_v11  ;;  %v12996_v62 = vcombine.high %v12393_v63, %v12393_v63  ;;  %v6516_v15 = vadd.f32 %v10430_v1, %v12064_v11  ;;  %v6514_v55 = vadd.f32 %v10431_v6, %v12064_v11 }
 0x449   : > { %v7834_v18 = vcombine.low %v12400_v3, %v12995_v51  ;;  %10364 = vmatprep.mubr.bf16.mxu0 %v7832_v48  ;;  %v6551_v5 = vmax.f32 %v6515_v41, 0.0  ;;  %v7843_v27 = vrot.slane %v12412_v56, %v12070_v28  ;;  %v7857_v35 = vrot.slane %v12431_v58, %v12070_v28 }
 0x44a   : > { %v7836_v2 = vcombine.low %v12403_v33, %v12996_v62  ;;  %v6549_v34 = vmax.f32 %v6513_v8, 0.0  ;;  %v6552_v63 = vmax.f32 %v6516_v15, 0.0  ;;  %v6550_v37 = vmax.f32 %v6514_v55, 0.0 }
 0x44b   : > { %v7850_v17 = vrot.slane %v7834_v18, %v12070_v28  ;;  %v12997_v33 = vcombine.low %v12343_v61, %v12357_v36  ;;  %v12998_v49 = vcombine.high %v12343_v61, %v12357_v36  ;;  %v12999_v58 = vcombine.low %v12346_v14, %v12360_v19 }
 0x44c   : > { %v7864_v3 = vrot.slane %v7836_v2, %v12070_v28  ;;  %v13000_v38 = vcombine.high %v12346_v14, %v12360_v19  ;;  %v6572_v46 = vpack.c.bf16 %v6552_v63, %v6551_v5  ;;  %v9233_v48 = vpack.c.bf16 %v6552_v63, %v6552_v63  ;;  %v13001_v5 = vld [vmem:[#allocation19_spill] sm:$0xff] }
 0x44d   : > { %v7892_v43 = vrot.slane %v12997_v33, %v12070_v28  ;;  %v7899_v56 = vrot.slane %v12998_v49, %v12070_v28  ;;  %v7865_v13 = vcombine.low %v7843_v27, %v7850_v17  ;;  %v7906_v54 = vrot.slane %v12999_v58, %v12070_v28 }
 0x44e   : > { %v7866_v31 = vcombine.low %v7857_v35, %v7864_v3  ;;  %v7913_v45 = vrot.slane %v13000_v38, %v12070_v28  ;;  %v6571_v41 = vpack.c.bf16 %v6550_v37, %v6549_v34  ;;  %v9232_v1 = vpack.c.bf16 %v6550_v37, %v6550_v37 }
 0x44f   : > { %v7873_v4 = vrot.slane %v7865_v13, %v12070_v28  ;;  %v7914_v36 = vcombine.low %v7892_v43, %v7899_v56  ;;  %v7329_v8 = vrot.slane %v6572_v46, %v12070_v28  ;;  %v7336_v51 = vrot.slane %v9233_v48, %v12070_v28  ;;  %v13003_v48 = vld [vmem:[#allocation21_spill] sm:$0xff] }
 0x450   : > { %v7880_v61 = vrot.slane %v7866_v31, %v12070_v28  ;;  %v7915_v6 = vcombine.low %v7906_v54, %v7913_v45  ;;  %v7280_v18 = vrot.slane %v6571_v41, %v12070_v28  ;;  %v7287_v62 = vrot.slane %v9232_v1, %v12070_v28  ;;  %v13002_v45 = vld [vmem:[#allocation20_spill] sm:$0xff] }
 0x451   : > { %v7922_v19 = vrot.slane %v7914_v36, %v12070_v28  ;;  %v10432_v15 = vadd.f32 %v12395_v39, %v13001_v5  ;;  %v7337_v55 = vcombine.high %v7329_v8, %v7329_v8  ;;  %v7338_v27 = vcombine.high %v7336_v51, %v7336_v51 }
 0x452   : > { %v7881_v14 = vcombine.low %v7873_v4, %v7880_v61  ;;  %v7929_v2 = vrot.slane %v7915_v6, %v12070_v28  ;;  %v12624_v34 = vrot.slane %v7329_v8, %v12070_v28  ;;  %v12627_v17 = vrot.slane %v7336_v51, %v12070_v28  ;;  %v13004_v51 = vld [vmem:[#allocation22_spill] sm:$0xff] }
 0x453   : > { %v7288_v35 = vcombine.high %v7280_v18, %v7280_v18  ;;  %v7289_v3 = vcombine.high %v7287_v62, %v7287_v62  ;;  %v12630_v63 = vrot.slane %v7280_v18, %v12070_v28  ;;  %v7303_v37 = vrot.slane %v7287_v62, %v12070_v28  ;;  %v13005_v18 = vld [vmem:[#allocation23_spill] sm:$0xff] }
 0x454   : > { %10365 = vmatmul.mubr.bf16.gmra.mrb[80].mxu0 %v7881_v14  ;;  %v12634_v33 = vrot.slane %v7337_v55, %v12070_v28  ;;  %v12637_v39 = vrot.slane %v7338_v27, %v12070_v28  ;;  %v7367_v43 = vcombine.high %v12624_v34, %v12624_v34  ;;  %v7930_v49 = vcombine.low %v7922_v19, %v7929_v2 }
 0x455   : > { %v12642_v56 = vrot.slane %v7288_v35, %v12070_v28  ;;  %v12645_v13 = vrot.slane %v7289_v3, %v12070_v28  ;;  %v7319_v31 = vcombine.high %v7303_v37, %v7303_v37  ;;  %v6519_v58 = vadd.f32 %v10432_v15, %v12064_v11 }
 0x456   : > { %v7369_v54 = vcombine.high %v12634_v33, %v12634_v33  ;;  %v9251_v38 = vcombine.high %v12627_v17, %v12637_v39  ;;  %10368 = vmatprep.mubr.bf16.mxu0 %v7930_v49  ;;  %v10433_v46 = vadd.f32 %v12397_v60, %v13002_v45  ;;  %v10434_v41 = vadd.f32 %v12409_v24, %v13003_v48 }
 0x457   : > { %v7321_v1 = vcombine.high %v12645_v13, %v12645_v13  ;;  %v8080_v4 = vcombine.low %v12630_v63, %v12642_v56  ;;  %v9250_v61 = vcombine.high %v12630_v63, %v12642_v56  ;;  %v12663_v36 = vcombine.low %v12645_v13, %v7319_v31 }
 0x458   : > { %v12666_v6 = vcombine.low %v7369_v54, %v12627_v17  ;;  %v6555_v8 = vmax.f32 %v6519_v58, 0.0  ;;  %v6517_v60 = vadd.f32 %v10433_v46, %v12064_v11  ;;  %v6520_v24 = vadd.f32 %v10434_v41, %v12064_v11 }
 0x459   : > { %v10435_v62 = vadd.f32 %v13005_v18, %v13004_v51  ;;  %v7933_v14 = vcombine.low %v12481_v20, %v7125_v59  ;;  %v7934_v19 = vcombine.low %v7127_v50, %v12439_v22  ;;  %v7941_v2 = vrot.slane %v12493_v53, %v12070_v28 }
 0x45a   : > { %v6553_v5 = vmax.f32 %v6517_v60, 0.0  ;;  %v6556_v15 = vmax.f32 %v6520_v24, 0.0  ;;  %v7948_v55 = vrot.slane %v12500_v0, %v12070_v28  ;;  %v13006_v27 = vcombine.high %v12439_v22, %v12446_v47 }
 0x45b   : > { %v6518_v59 = vadd.f32 %v10435_v62, %v12064_v11  ;;  %v7955_v35 = vrot.slane %v7933_v14, %v12070_v28  ;;  %v7962_v20 = vrot.slane %v7934_v19, %v12070_v28  ;;  %v13007_v50 = vcombine.low %v12442_v25, %v12449_v21 }
 0x45c   : > { %v7990_v23 = vrot.slane %v13006_v27, %v12070_v28  ;;  %v6574_v3 = vpack.c.bf16 %v6556_v15, %v6555_v8  ;;  %v9235_v37 = vpack.c.bf16 %v6556_v15, %v6556_v15  ;;  %v7963_v49 = vcombine.low %v7941_v2, %v7948_v55 }
 0x45d   : > { %v7997_v53 = vrot.slane %v13007_v50, %v12070_v28  ;;  %v8004_v22 = vrot.slane %v9248_v57, %v12070_v28  ;;  %v6554_v47 = vmax.f32 %v6518_v59, 0.0  ;;  %v7964_v0 = vcombine.low %v7955_v35, %v7962_v20 }
 0x45e   : > { %v8011_v11 = vrot.slane %v12568_v40, %v12070_v28  ;;  %v7426_v58 = vrot.slane %v6574_v3, %v12070_v28  ;;  %v7433_v54 = vrot.slane %v9235_v37, %v12070_v28  ;;  %v7971_v45 = vrot.slane %v7963_v49, %v12070_v28 }
 0x45f   : > { %v8012_v31 = vcombine.low %v7990_v23, %v7997_v53  ;;  %v8030_v46 = vcombine.low %v12554_v44, %v7222_v42  ;;  %v6573_v48 = vpack.c.bf16 %v6554_v47, %v6553_v5  ;;  %v9234_v25 = vpack.c.bf16 %v6554_v47, %v6554_v47 }
 0x460   : > { %v7978_v21 = vrot.slane %v7964_v0, %v12070_v28  ;;  %v8013_v57 = vcombine.low %v8004_v22, %v8011_v11  ;;  %v7434_v41 = vcombine.high %v7426_v58, %v7426_v58  ;;  %v7435_v8 = vcombine.high %v7433_v54, %v7433_v54 }
 0x461   : > { %v7442_v40 = vrot.slane %v7426_v58, %v12070_v28  ;;  %v12711_v60 = vrot.slane %v7433_v54, %v12070_v28  ;;  %v7378_v24 = vrot.slane %v6573_v48, %v12070_v28  ;;  %v7385_v51 = vrot.slane %v9234_v25, %v12070_v28 }
 0x462   : > { %v7979_v18 = vcombine.low %v7971_v45, %v7978_v21  ;;  %v8020_v12 = vrot.slane %v8012_v31, %v12070_v28  ;;  %v7456_v42 = vrot.slane %v7434_v41, %v12070_v28  ;;  %v7463_v62 = vrot.slane %v7435_v8, %v12070_v28 }
 0x463   : > { %v7464_v14 = vcombine.high %v7442_v40, %v7442_v40  ;;  %v7465_v19 = vcombine.high %v12711_v60, %v12711_v60  ;;  %v7386_v2 = vcombine.high %v7378_v24, %v7378_v24  ;;  %v7387_v5 = vcombine.high %v7385_v51, %v7385_v51 }
 0x464   : > { %v7394_v15 = vrot.slane %v7378_v24, %v12070_v28  ;;  %v7401_v55 = vrot.slane %v7385_v51, %v12070_v28  ;;  %10369 = vmatmul.mubr.bf16.gmra.mrb[84].mxu0 %v7979_v18  ;;  %v7466_v27 = vcombine.high %v7456_v42, %v7456_v42  ;;  %v8027_v23 = vrot.slane %v8013_v57, %v12070_v28 }
 0x465   : > { %v8031_v59 = vcombine.low %v7224_v30, %v12535_v10  ;;  %v8032_v35 = vcombine.low %v12545_v7, %v7270_v29  ;;  %v7408_v20 = vrot.slane %v7386_v2, %v12070_v28  ;;  %v7415_v50 = vrot.slane %v7387_v5, %v12070_v28 }
 0x466   : > { %v8039_v53 = vrot.slane %v12578_v26, %v12070_v28  ;;  %v8046_v3 = vrot.slane %v8030_v46, %v12070_v28  ;;  %v8227_v37 = vcombine.low %v7466_v27, %v12711_v60  ;;  %v8028_v49 = vcombine.low %v8020_v12, %v8027_v23  ;;  %v9365_v27 = vld [vmem:[%s11507_s8] sm:$0xff]   ;;  %v12795_v23 = vld [vmem:[%s12920_s6] ss:$0 sm:$0xff] }
 0x467   : > { %v8053_v44 = vrot.slane %v8031_v59, %v12070_v28  ;;  %v8060_v30 = vrot.slane %v8032_v35, %v12070_v28  ;;  %v7418_v22 = vcombine.high %v7415_v50, %v7415_v50  ;;  %v8177_v10 = vcombine.low %v7394_v15, %v7408_v20 }
 0x468   : > { %v9252_v47 = vcombine.high %v7394_v15, %v7408_v20  ;;  %v8179_v7 = vcombine.low %v7401_v55, %v7415_v50  ;;  %10372 = vmatprep.mubr.bf16.mxu0 %v8028_v49  ;;  %v8061_v29 = vcombine.low %v8039_v53, %v8046_v3  ;;  %v8088_v26 = vrot.slane %v8078_v52, %v12070_v28  ;;  %v9508_v55 = vld [vmem:[%s11507_s8 + $0x8] sm:$0xff]  }
 0x469   : > { %v8062_v0 = vcombine.low %v8053_v44, %v8060_v30  ;;  %v8095_v11 = vrot.slane %v9249_v16, %v12070_v28  ;;  %v8102_v31 = vrot.slane %v8080_v4, %v12070_v28  ;;  %v8109_v58 = vrot.slane %v9250_v61, %v12070_v28 }
 0x46a   : > { %v8128_v52 = vcombine.low %v7321_v1, %v12624_v34  ;;  %v8129_v9 = vcombine.low %v12634_v33, %v7367_v43  ;;  %v8069_v32 = vrot.slane %v8061_v29, %v12070_v28  ;;  %v8137_v54 = vrot.slane %v12663_v36, %v12070_v28 }
 0x46b   : > { %v8076_v16 = vrot.slane %v8062_v0, %v12070_v28  ;;  %v8110_v4 = vcombine.low %v8088_v26, %v8095_v11  ;;  %v8111_v63 = vcombine.low %v8102_v31, %v8109_v58  ;;  %v8158_v13 = vrot.slane %v12666_v6, %v12070_v28 }
 0x46c   : > { %v8144_v56 = vrot.slane %v8128_v52, %v12070_v28  ;;  %v8151_v61 = vrot.slane %v8129_v9, %v12070_v28  ;;  %v8186_v33 = vrot.slane %v9251_v38, %v12070_v28  ;;  %v8193_v43 = vrot.slane %v8177_v10, %v12070_v28  ;;  %v9510_v9 = vld [vmem:[%s11507_s8 + $0x18] sm:$0xff]  }
 0x46d   : > { %v8077_v1 = vcombine.low %v8069_v32, %v8076_v16  ;;  %v8118_v34 = vrot.slane %v8110_v4, %v12070_v28  ;;  %v8125_v36 = vrot.slane %v8111_v63, %v12070_v28  ;;  %v8200_v48 = vrot.slane %v9252_v47, %v12070_v28  ;;  %v9509_v32 = vld [vmem:[%s11507_s8 + $0x10] sm:$0xff]  }
 0x46e   : > { %v8159_v45 = vcombine.low %v8137_v54, %v8144_v56  ;;  %v8160_v46 = vcombine.low %v8151_v61, %v8158_v13  ;;  %v8207_v25 = vrot.slane %v8179_v7, %v12070_v28  ;;  %v8208_v6 = vcombine.low %v8186_v33, %v8193_v43 }
 0x46f   : > { %10373 = vmatmul.mubr.bf16.gmra.mrb[88].mxu0 %v8077_v1  ;;  %v8225_v21 = vcombine.low %v7418_v22, %v7442_v40  ;;  %v8226_v57 = vcombine.low %v7456_v42, %v7464_v14  ;;  %v8126_v41 = vcombine.low %v8118_v34, %v8125_v36  ;;  %v8228_v39 = vcombine.low %v7463_v62, %v7465_v19 }
 0x470   : > { %v8167_v8 = vrot.slane %v8159_v45, %v12070_v28  ;;  %v8174_v17 = vrot.slane %v8160_v46, %v12070_v28  ;;  %v8209_v38 = vcombine.low %v8200_v48, %v8207_v25  ;;  %v8216_v60 = vrot.slane %v8208_v6, %v12070_v28 }
 0x471   : > { %v8235_v24 = vrot.slane %v8225_v21, %v12070_v28  ;;  %v8242_v51 = vrot.slane %v8226_v57, %v12070_v28  ;;  %10376 = vmatprep.mubr.bf16.mxu0 %v8126_v41  ;;  %v8249_v40 = vrot.slane %v8227_v37, %v12070_v28  ;;  %v8256_v12 = vrot.slane %v8228_v39, %v12070_v28  ;;  %v9512_v39 = vld [vmem:[%s11507_s8 + $0x28] sm:$0xff]  }
 0x472   : > { %v8175_v18 = vcombine.low %v8167_v8, %v8174_v17  ;;  %v8223_v42 = vrot.slane %v8209_v38, %v12070_v28  ;;  %v9370_v59 = vunpack.c.l.bf16 %v9508_v55  ;;  %v9366_v20 = vunpack.c.l.bf16 %v9365_v27  ;;  %v9511_v38 = vld [vmem:[%s11507_s8 + $0x20] sm:$0xff]  }
 0x473   : > { %v8257_v14 = vcombine.low %v8235_v24, %v8242_v51  ;;  %v8258_v2 = vcombine.low %v8249_v40, %v8256_v12  ;;  %v9371_v3 = vunpack.c.h.bf16 %v9508_v55  ;;  %v9367_v49 = vunpack.c.h.bf16 %v9365_v27 }
 0x474   : > { %v8224_v62 = vcombine.low %v8216_v60, %v8223_v42  ;;  %v9378_v16 = vunpack.c.l.bf16 %v9510_v9  ;;  %v9374_v54 = vunpack.c.l.bf16 %v9509_v32  ;;  %v9379_v61 = vunpack.c.h.bf16 %v9510_v9 }
 0x475   : > { %v8265_v19 = vrot.slane %v8257_v14, %v12070_v28  ;;  %v8272_v5 = vrot.slane %v8258_v2, %v12070_v28  ;;  %v9375_v34 = vunpack.c.h.bf16 %v9509_v32  ;;  %v9386_v60 = vunpack.c.l.bf16 %v9512_v39 }
 0x476   : > { %v9382_v51 = vunpack.c.l.bf16 %v9511_v38  ;;  %v9387_v12 = vunpack.c.h.bf16 %v9512_v39  ;;  %v9383_v2 = vunpack.c.h.bf16 %v9511_v38 }
 0x477   : > { %10377 = vmatmul.mubr.bf16.gmra.mrb[92].mxu0 %v8175_v18  ;;  %v8273_v15 = vcombine.low %v8265_v19, %v8272_v5 }
 0x478   : > { %10380 = vmatprep.mubr.bf16.mxu0 %v8224_v62 }
 0x47f   : > { %10381 = vmatmul.mubr.bf16.gmra.mrb[96].mxu0 %v8273_v15 }
 0x4f2   : > { %v10354_v35 = vpop.f32.mrb[68].mxu0 }
 0x4f3   : > { %v8381_v50 = vadd.f32 %v10354_v35, %v12795_v23  ;;  %v8372_v53 = vpop.f32.mrb[69].mxu0 }
 0x4f4   : > { %v8373_v28 = vadd.f32 %v12795_v23, %v8372_v53  ;;  %v10355_v37 = vpop.f32.mrb[70].mxu0 }
 0x4f5   : > { %v8565_v44 = vadd.f32 %v9370_v59, %v8381_v50  ;;  %v8384_v30 = vadd.f32 %v10355_v37, %v12795_v23  ;;  %v8375_v22 = vpop.f32.mrb[71].mxu0 }
 0x4f6   : > { %v8563_v10 = vadd.f32 %v9366_v20, %v8373_v28  ;;  %v8376_v47 = vadd.f32 %v12795_v23, %v8375_v22  ;;  %v9514_v28 = vld [vmem:[%s11507_s8 + $0x38] sm:$0xff]  }
 0x4f7   : > { %v8566_v7 = vadd.f32 %v9371_v3, %v8384_v30  ;;  %v8597_v0 = vmax.f32 %v8565_v44, 0.0  ;;  %v9394_v44 = vunpack.c.l.bf16 %v9514_v28 }
 0x4f8   : > { %v8564_v29 = vadd.f32 %v9367_v49, %v8376_v47  ;;  %v8595_v11 = vmax.f32 %v8563_v10, 0.0  ;;  %v9513_v49 = vld [vmem:[%s11507_s8 + $0x30] sm:$0xff]  }
 0x4f9   : > { %v8598_v26 = vmax.f32 %v8566_v7, 0.0  ;;  %v9390_v22 = vunpack.c.l.bf16 %v9513_v49  ;;  %v9395_v7 = vunpack.c.h.bf16 %v9514_v28 }
 0x4fa   : > { %v8596_v31 = vmax.f32 %v8564_v29, 0.0 }
 0x4fb   : > { %v9436_v58 = vpack.c.bf16 %v8598_v26, %v8597_v0  ;;  %v9391_v26 = vunpack.c.h.bf16 %v9513_v49  ;;  %v9520_v49 = vld [vmem:[%s11507_s8 + $0x68] sm:$0xff]  }
 0x4fc   : > { %v9431_v52 = vpack.c.bf16 %v8596_v31, %v8595_v11 }
 0x4fd   : > { %9523 = vst [vmem:[%s12803_s21 + $0x8] sm:$0xff] %v9436_v58  }
 0x4fe   : > { %9432 = vst [vmem:[%s12803_s21] sm:$0xff] %v9431_v52  }
 0x508   : > { %v10358_v4 = vpop.f32.mrb[72].mxu0 }
 0x509   : > { %v8397_v63 = vadd.f32 %v10358_v4, %v12795_v23  ;;  %v8388_v56 = vpop.f32.mrb[73].mxu0 }
 0x50a   : > { %v8389_v13 = vadd.f32 %v12795_v23, %v8388_v56  ;;  %v10359_v1 = vpop.f32.mrb[74].mxu0 }
 0x50b   : > { %v8569_v33 = vadd.f32 %v9378_v16, %v8397_v63  ;;  %v8400_v43 = vadd.f32 %v10359_v1, %v12795_v23  ;;  %v8391_v36 = vpop.f32.mrb[75].mxu0  ;;  %v9516_v1 = vld [vmem:[%s11507_s8 + $0x48] sm:$0xff]  }
 0x50c   : > { %v8567_v45 = vadd.f32 %v9374_v54, %v8389_v13  ;;  %v8392_v46 = vadd.f32 %v12795_v23, %v8391_v36 }
 0x50d   : > { %v8570_v48 = vadd.f32 %v9379_v61, %v8400_v43  ;;  %v8601_v6 = vmax.f32 %v8569_v33, 0.0  ;;  %v9402_v33 = vunpack.c.l.bf16 %v9516_v1 }
 0x50e   : > { %v8568_v25 = vadd.f32 %v9375_v34, %v8392_v46  ;;  %v8599_v57 = vmax.f32 %v8567_v45, 0.0  ;;  %v9515_v34 = vld [vmem:[%s11507_s8 + $0x40] sm:$0xff]  }
 0x50f   : > { %v8602_v21 = vmax.f32 %v8570_v48, 0.0  ;;  %v9398_v36 = vunpack.c.l.bf16 %v9515_v34  ;;  %v9403_v48 = vunpack.c.h.bf16 %v9516_v1 }
 0x510   : > { %v8600_v41 = vmax.f32 %v8568_v25, 0.0 }
 0x511   : > { %v9446_v8 = vpack.c.bf16 %v8602_v21, %v8601_v6  ;;  %v9399_v21 = vunpack.c.h.bf16 %v9515_v34  ;;  %v9522_v34 = vld [vmem:[%s11507_s8 + $0x78] sm:$0xff]  }
 0x512   : > { %v9441_v17 = vpack.c.bf16 %v8600_v41, %v8599_v57 }
 0x513   : > { %9525 = vst [vmem:[%s12803_s21 + $0x18] sm:$0xff] %v9446_v8  }
 0x514   : > { %9524 = vst [vmem:[%s12803_s21 + $0x10] sm:$0xff] %v9441_v17  }
 0x518   : > { %v10362_v24 = vpop.f32.mrb[76].mxu0 }
 0x519   : > { %v8413_v18 = vadd.f32 %v10362_v24, %v12795_v23  ;;  %v8404_v40 = vpop.f32.mrb[77].mxu0 }
 0x51a   : > { %v8405_v42 = vadd.f32 %v12795_v23, %v8404_v40  ;;  %v10363_v14 = vpop.f32.mrb[78].mxu0 }
 0x51b   : > { %v8573_v62 = vadd.f32 %v9386_v60, %v8413_v18  ;;  %v8416_v19 = vadd.f32 %v10363_v14, %v12795_v23  ;;  %v8407_v5 = vpop.f32.mrb[79].mxu0  ;;  %v9518_v18 = vld [vmem:[%s11507_s8 + $0x58] sm:$0xff]  }
 0x51c   : > { %v8571_v15 = vadd.f32 %v9382_v51, %v8405_v42  ;;  %v8408_v55 = vadd.f32 %v12795_v23, %v8407_v5  ;;  %v9517_v42 = vld [vmem:[%s11507_s8 + $0x50] sm:$0xff]  }
 0x51d   : > { %v8574_v27 = vadd.f32 %v9387_v12, %v8416_v19  ;;  %v8605_v35 = vmax.f32 %v8573_v62, 0.0  ;;  %v9410_v62 = vunpack.c.l.bf16 %v9518_v18  ;;  %v9406_v5 = vunpack.c.l.bf16 %v9517_v42 }
 0x51e   : > { %v8572_v59 = vadd.f32 %v9383_v2, %v8408_v55  ;;  %v8603_v50 = vmax.f32 %v8571_v15, 0.0 }
 0x51f   : > { %v8606_v20 = vmax.f32 %v8574_v27, 0.0  ;;  %v9411_v27 = vunpack.c.h.bf16 %v9518_v18 }
 0x520   : > { %v8604_v53 = vmax.f32 %v8572_v59, 0.0 }
 0x521   : > { %v9456_v3 = vpack.c.bf16 %v8606_v20, %v8605_v35  ;;  %v9407_v20 = vunpack.c.h.bf16 %v9517_v42 }
 0x522   : > { %v9451_v37 = vpack.c.bf16 %v8604_v53, %v8603_v50 }
 0x523   : > { %9527 = vst [vmem:[%s12803_s21 + $0x28] sm:$0xff] %v9456_v3  }
 0x524   : > { %9526 = vst [vmem:[%s12803_s21 + $0x20] sm:$0xff] %v9451_v37  }
 0x527   : > { %v10366_v30 = vpop.f32.mrb[80].mxu0 }
 0x528   : > { %v8429_v10 = vadd.f32 %v10366_v30, %v12795_v23  ;;  %v8420_v47 = vpop.f32.mrb[81].mxu0  ;;  %v9519_v30 = vld [vmem:[%s11507_s8 + $0x60] sm:$0xff]  }
 0x529   : > { %v8421_v29 = vadd.f32 %v12795_v23, %v8420_v47  ;;  %v10367_v0 = vpop.f32.mrb[82].mxu0 }
 0x52a   : > { %v8577_v11 = vadd.f32 %v9394_v44, %v8429_v10  ;;  %v8432_v31 = vadd.f32 %v10367_v0, %v12795_v23  ;;  %v8423_v58 = vpop.f32.mrb[83].mxu0 }
 0x52b   : > { %v8575_v52 = vadd.f32 %v9390_v22, %v8421_v29  ;;  %v8424_v9 = vadd.f32 %v12795_v23, %v8423_v58 }
 0x52c   : > { %v8578_v32 = vadd.f32 %v9395_v7, %v8432_v31  ;;  %v8609_v4 = vmax.f32 %v8577_v11, 0.0  ;;  %v9418_v7 = vunpack.c.l.bf16 %v9520_v49  ;;  %v9414_v11 = vunpack.c.l.bf16 %v9519_v30 }
 0x52d   : > { %v8576_v16 = vadd.f32 %v9391_v26, %v8424_v9  ;;  %v8607_v63 = vmax.f32 %v8575_v52, 0.0  ;;  %v9419_v9 = vunpack.c.h.bf16 %v9520_v49 }
 0x52e   : > { %v8610_v54 = vmax.f32 %v8578_v32, 0.0 }
 0x52f   : > { %v8608_v56 = vmax.f32 %v8576_v16, 0.0 }
 0x530   : > { %v9466_v61 = vpack.c.bf16 %v8610_v54, %v8609_v4  ;;  %v9415_v54 = vunpack.c.h.bf16 %v9519_v30 }
 0x531   : > { %v9461_v13 = vpack.c.bf16 %v8608_v56, %v8607_v63 }
 0x532   : > { %9529 = vst [vmem:[%s12803_s21 + $0x38] sm:$0xff] %v9466_v61  }
 0x533   : > { %9528 = vst [vmem:[%s12803_s21 + $0x30] sm:$0xff] %v9461_v13  }
 0x537   : > { %v10370_v43 = vpop.f32.mrb[84].mxu0 }
 0x538   : > { %v8445_v45 = vadd.f32 %v10370_v43, %v12795_v23  ;;  %v8436_v46 = vpop.f32.mrb[85].mxu0  ;;  %v9521_v43 = vld [vmem:[%s11507_s8 + $0x70] sm:$0xff]   ;;  %s12866_s8 = scalar_lea.hbm %s12921_s7, %s9363_s16 }
 0x539   : > { %v8437_v25 = vadd.f32 %v12795_v23, %v8436_v46  ;;  %v10371_v6 = vpop.f32.mrb[86].mxu0 }
 0x53a   : > { %v8581_v57 = vadd.f32 %v9402_v33, %v8445_v45  ;;  %v8448_v41 = vadd.f32 %v10371_v6, %v12795_v23  ;;  %v8439_v8 = vpop.f32.mrb[87].mxu0 }
 0x53b   : > { %v8579_v17 = vadd.f32 %v9398_v36, %v8437_v25  ;;  %v8440_v39 = vadd.f32 %v12795_v23, %v8439_v8 }
 0x53c   : > { %v8582_v38 = vadd.f32 %v9403_v48, %v8448_v41  ;;  %v8613_v24 = vmax.f32 %v8581_v57, 0.0  ;;  %v9426_v48 = vunpack.c.l.bf16 %v9522_v34  ;;  %v9422_v57 = vunpack.c.l.bf16 %v9521_v43 }
 0x53d   : > { %v8580_v60 = vadd.f32 %v9399_v21, %v8440_v39  ;;  %v8611_v40 = vmax.f32 %v8579_v17, 0.0  ;;  %v9427_v39 = vunpack.c.h.bf16 %v9522_v34 }
 0x53e   : > { %v8614_v51 = vmax.f32 %v8582_v38, 0.0 }
 0x53f   : > { %v8612_v12 = vmax.f32 %v8580_v60, 0.0 }
 0x540   : > { %v9476_v14 = vpack.c.bf16 %v8614_v51, %v8613_v24  ;;  %v9423_v51 = vunpack.c.h.bf16 %v9521_v43 }
 0x541   : > { %v9471_v2 = vpack.c.bf16 %v8612_v12, %v8611_v40 }
 0x542   : > { %9531 = vst [vmem:[%s12803_s21 + $0x48] sm:$0xff] %v9476_v14   ;;  %v10374_v19 = vpop.f32.mrb[88].mxu0 }
 0x543   : > { %9530 = vst [vmem:[%s12803_s21 + $0x40] sm:$0xff] %v9471_v2   ;;  %v8461_v15 = vadd.f32 %v10374_v19, %v12795_v23  ;;  %v8452_v55 = vpop.f32.mrb[89].mxu0 }
 0x544   : > { %v8453_v59 = vadd.f32 %v12795_v23, %v8452_v55  ;;  %v10375_v35 = vpop.f32.mrb[90].mxu0 }
 0x545   : > { %v8585_v50 = vadd.f32 %v9410_v62, %v8461_v15  ;;  %v8464_v53 = vadd.f32 %v10375_v35, %v12795_v23  ;;  %v8455_v3 = vpop.f32.mrb[91].mxu0 }
 0x546   : > { %v8583_v28 = vadd.f32 %v9406_v5, %v8453_v59  ;;  %v8456_v37 = vadd.f32 %v12795_v23, %v8455_v3 }
 0x547   : > { %v8586_v44 = vadd.f32 %v9411_v27, %v8464_v53  ;;  %v8617_v10 = vmax.f32 %v8585_v50, 0.0 }
 0x548   : > { %v8584_v22 = vadd.f32 %v9407_v20, %v8456_v37  ;;  %v8615_v29 = vmax.f32 %v8583_v28, 0.0 }
 0x549   : > { %v8618_v47 = vmax.f32 %v8586_v44, 0.0 }
 0x54a   : > { %v8616_v0 = vmax.f32 %v8584_v22, 0.0  ;;  %v10378_v26 = vpop.f32.mrb[92].mxu0 }
 0x54b   : > { %v9486_v31 = vpack.c.bf16 %v8618_v47, %v8617_v10  ;;  %v8477_v58 = vadd.f32 %v10378_v26, %v12795_v23  ;;  %v8468_v52 = vpop.f32.mrb[93].mxu0 }
 0x54c   : > { %v9481_v32 = vpack.c.bf16 %v8616_v0, %v8615_v29  ;;  %v8469_v16 = vadd.f32 %v12795_v23, %v8468_v52  ;;  %v10379_v4 = vpop.f32.mrb[94].mxu0 }
 0x54d   : > { %9533 = vst [vmem:[%s12803_s21 + $0x58] sm:$0xff] %v9486_v31   ;;  %v8589_v63 = vadd.f32 %v9418_v7, %v8477_v58  ;;  %v8480_v56 = vadd.f32 %v10379_v4, %v12795_v23  ;;  %v8471_v61 = vpop.f32.mrb[95].mxu0 }
 0x54e   : > { %9532 = vst [vmem:[%s12803_s21 + $0x50] sm:$0xff] %v9481_v32   ;;  %v8587_v13 = vadd.f32 %v9414_v11, %v8469_v16  ;;  %v8472_v1 = vadd.f32 %v12795_v23, %v8471_v61 }
 0x54f   : > { %v8590_v33 = vadd.f32 %v9419_v9, %v8480_v56  ;;  %v8621_v45 = vmax.f32 %v8589_v63, 0.0 }
 0x550   : > { %v8588_v36 = vadd.f32 %v9415_v54, %v8472_v1  ;;  %v8619_v25 = vmax.f32 %v8587_v13, 0.0 }
 0x551   : > { %v8622_v46 = vmax.f32 %v8590_v33, 0.0 }
 0x552   : > { %v8620_v6 = vmax.f32 %v8588_v36, 0.0  ;;  %v10382_v21 = vpop.f32.mrb[96].mxu0 }
 0x553   : > { %v9496_v41 = vpack.c.bf16 %v8622_v46, %v8621_v45  ;;  %v8493_v8 = vadd.f32 %v10382_v21, %v12795_v23  ;;  %v8484_v17 = vpop.f32.mrb[97].mxu0 }
 0x554   : > { %v9491_v38 = vpack.c.bf16 %v8620_v6, %v8619_v25  ;;  %v8485_v60 = vadd.f32 %v12795_v23, %v8484_v17  ;;  %v10383_v24 = vpop.f32.mrb[98].mxu0 }
 0x555   : > { %9535 = vst [vmem:[%s12803_s21 + $0x68] sm:$0xff] %v9496_v41   ;;  %v8593_v18 = vadd.f32 %v9426_v48, %v8493_v8  ;;  %v8496_v40 = vadd.f32 %v10383_v24, %v12795_v23  ;;  %v8487_v12 = vpop.f32.mrb[99].mxu0 }
 0x556   : > { %9534 = vst [vmem:[%s12803_s21 + $0x60] sm:$0xff] %v9491_v38   ;;  %v8591_v42 = vadd.f32 %v9422_v57, %v8485_v60  ;;  %v8488_v14 = vadd.f32 %v12795_v23, %v8487_v12 }
 0x557   : > { %v8594_v2 = vadd.f32 %v9427_v39, %v8496_v40  ;;  %v8625_v19 = vmax.f32 %v8593_v18, 0.0 }
 0x558   : > { %v8592_v62 = vadd.f32 %v9423_v51, %v8488_v14  ;;  %v8623_v15 = vmax.f32 %v8591_v42, 0.0 }
 0x559   : > { %v8626_v5 = vmax.f32 %v8594_v2, 0.0 }
 0x55a   : > { %v8624_v55 = vmax.f32 %v8592_v62, 0.0 }
 0x55b   : > { %v9506_v27 = vpack.c.bf16 %v8626_v5, %v8625_v19 }
 0x55c   : > { %v9501_v23 = vpack.c.bf16 %v8624_v55, %v8623_v15 }
 0x55d   : > { %9537 = vst [vmem:[%s12803_s21 + $0x78] sm:$0xff] %v9506_v27  }
 0x55e   : > { %9536 = vst [vmem:[%s12803_s21 + $0x70] sm:$0xff] %v9501_v23  }
 0x55f   : > { %11182 = shalt.err (!%p11179_p4)
}
 0x560   : > { %s11183_s10 = scalar_lea.hbm %s12866_s8, 2048  ;;  %s11187_s20 = scalar_lea.hbm %s12921_s7, 4096 }
 0x561   : > { %p11184_p9 = scmp.ne.s32.totalorder %s12866_s8, %s11183_s10  ;;  %p11188_p8 = scmp.lt.u32.totalorder %s12866_s8, %s12921_s7 }
 0x562   : > { %p11189_p13 = scmp.lt.u32.totalorder %s11187_s20, %s11183_s10  ;;  %p11191_p10 = scmp.lt.u32.totalorder %s11183_s10, %s12866_s8 }
 0x563   : > { %p11185_p0 = pnand %p11184_p9, %p11450_p5 }
 0x564   : > { %p11190_p6 = por %p11189_p13, %p11188_p8 }
 0x565   : > { %p11186_p11 = pneg %p11185_p0 }
 0x566   : > { %p11192_p3 = por %p11191_p10, %p11190_p6 }
 0x568   : > { %p11193_p7 = pnand %p11192_p3, %p11186_p11 }
 0x56a   : > { %11196 = shalt.err (!%p11193_p7)
}
 0x56b   : > { %s11254_s23 = smov 64   ;;  %s11255_s11 = smov 4  }
 0x56c   : > { %10702 = dma.vmem_to_hbm [thread:$0]  (%p11450_p5), %s12868_s29, 2048, %s12866_s8, %s8788_s28, %s11254_s23, %s11254_s23, %s11255_s11  }
 0x56d PF: > { %s13008_s30 = sld [smem:[#allocation17_spill]]  ;;  %s8816_s9 = sand.u32 1, %s11231_s24  }
 0x56e   : > { %p13010_p1 = scmp.ge.s32.totalorder %s11243_s27, 2  ;;  %s8817_s13 = scalar_lea.sflag [#allocation6], %s8816_s9 }
 0x573   : > { %p13009_p12 = scmp.ne.s32.totalorder %s13008_s30, 0 }
 0x575   : > { %p10719_p2 = pnand %p13010_p1, %p13009_p12 }
 0x577   : > { %11226 = dma.done.wait (!%p10719_p2), %s8817_s13, 2048  }
 0x578   : > { %11228 = vsyncadd (!%p10719_p2), %s8817_s13, 4294965248  ;;  %p22_p4 = scmp.ge.s32.totalorder %s11436_s22, 4   ;;  %s13011_s24 = smov %s11235_s25 }
 0x579   : > { %s13012_s25 = smov %s11239_s26  ;;  %s13013_s26 = smov %s11446_s18 }
 0x57a   : > { %s13014_s27 = smov %s11436_s22  ;;  %24 = sbr.rel (!%p22_p4) target bundleno = 7 (0x7), region = 113 }
 0x581   :  { %8822 = vsyncpa [#allocation5], 1 }
 0x582   :  { %8824 = vsyncpa [#allocation5 + $0x1], 1 }
 0x583   :  { %8825 = vsyncpa [#allocation8], 1 }
 0x584   :  { %8826 = vsyncpa [#allocation11], 1 }
 0x585   :  { %8827 = vsyncpa [#allocation6], 1 }
 0x586   :  { %8829 = vsyncpa [#allocation6 + $0x1], 1 }

</bundles_post_ra>
